<compile_context>
chip_gen: v5e
topology: v5e:2x2
jax: 0.10.0
libtpu: 0.0.40
codegen_flags: <defaults>
</compile_context>

<pallas_src>
import functools

import jax
import jax.numpy as jnp
from jax.experimental import pallas as pl
from jax.experimental.pallas import tpu as pltpu


# ----------------------------------------------------------------------------
# Pallas kernel: the entire NeRF MLP for one tile of rows.
# ----------------------------------------------------------------------------
def nerf_kernel(
    gx_ref, gd_ref,
    w16, b1,                                      # fused [layer1 | layer6-gx] weight
    w2, b2, w3, b3, w4, b4, w5, b5,               # rest of first_half_network
    w6h, b6,                                      # sixth_layer_network (h branch)
    w7, b7, w8, b8,                               # second_half_network
    wrd, brd,                                     # fused [rgb_network | volume_density]
    wfd, wfh, bfb,                                # rgb_network_final_layer (split concat)
    out_ref,                                      # (tile_m, 256): rgb lanes 0..127, sigma lane 128
):
    f32 = jnp.float32
    bf16 = jnp.bfloat16

    # Inputs are only ever matmul operands -> cast once to bf16 (MXU input dtype).
    gx = gx_ref[...].astype(bf16)
    gd = gd_ref[...].astype(bf16)

    def lin(x_f32, w, b):
        # bf16 x bf16 -> f32 accumulation on the MXU; bias add stays f32 (VPU).
        return jnp.dot(x_f32.astype(bf16), w[...], preferred_element_type=f32) + b[...]

    # Fused matmul over gammaX: lanes 0..255 = layer-1 pre-activation,
    # lanes 256..511 = gammaX @ w6x (sixth-layer gammaX branch, bias added later).
    a16 = jnp.dot(gx, w16[...], preferred_element_type=f32)       # (tile_m, 512)
    h = jnp.maximum(a16[:, 0:256] + b1[...], 0.0)
    gx6 = a16[:, 256:512]

    # remaining first_half_network layers: Linear + ReLU
    h = jnp.maximum(lin(h, w2, b2), 0.0)
    h = jnp.maximum(lin(h, w3, b3), 0.0)
    h = jnp.maximum(lin(h, w4, b4), 0.0)
    h = jnp.maximum(lin(h, w5, b5), 0.0)

    # sixth_layer_network: Linear(cat([gammaX, h])) -- NO activation (as in ref)
    h = gx6 + jnp.dot(h.astype(bf16), w6h[...], preferred_element_type=f32) + b6[...]

    # second_half_network: Linear + ReLU + Linear (no final activation)
    h = jnp.maximum(lin(h, w7, b7), 0.0)
    h = lin(h, w8, b8)

    # Fused heads: ReLU(h @ [wr | wd | 0] + [br | bd | 0])
    #   rd[:, :256]    == rgb_network output r   (Linear + ReLU)
    #   rd[:, 256:257] == volume_density sigma   (Linear + ReLU)
    #   rd[:, 257:]    == 0 (zero weights/bias, ReLU(0) = 0)
    rd = jnp.maximum(lin(h, wrd, brd), 0.0)                        # (tile_m, 384)
    r = rd[:, :256]

    # rgb_network_final_layer: Linear(cat([gammaD, r]) -> 128) + Sigmoid
    z = (jnp.dot(gd, wfd[...], preferred_element_type=f32)
         + jnp.dot(r.astype(bf16), wfh[...], preferred_element_type=f32)
         + bfb[...])

    # Lane-dense output slab: both stores are 128-lane aligned (unmasked vst).
    out_ref[:, 0:128] = jax.nn.sigmoid(z).astype(out_ref.dtype)
    out_ref[:, 128:256] = rd[:, 256:384].astype(out_ref.dtype)


# ----------------------------------------------------------------------------
# Parameter init (PyTorch-style Linear init), weights stored bf16, biases f32.
# ----------------------------------------------------------------------------
def init_params(key, pos_enc, dir_enc):
    """Weights are (in_features, out_features) so the kernel does y = x @ W + b."""
    def linear(key, fan_in, fan_out):
        kw, kb = jax.random.split(key)
        bound = float(fan_in) ** -0.5
        w = jax.random.uniform(kw, (fan_in, fan_out), jnp.float32, -bound, bound)
        b = jax.random.uniform(kb, (1, fan_out), jnp.float32, -bound, bound)
        return w, b

    bf16 = jnp.bfloat16
    keys = jax.random.split(key, 12)
    p = {}
    w1, p["b1"] = linear(keys[0], pos_enc, 256)
    w, p["b2"] = linear(keys[1], 256, 256);     p["w2"] = w.astype(bf16)
    w, p["b3"] = linear(keys[2], 256, 256);     p["w3"] = w.astype(bf16)
    w, p["b4"] = linear(keys[3], 256, 256);     p["w4"] = w.astype(bf16)
    w, p["b5"] = linear(keys[4], 256, 256);     p["w5"] = w.astype(bf16)

    # sixth layer: in_features = pos_enc + 256; split rows into [pos_enc | 256].
    # The gammaX rows are fused with w1 into a single (pos_enc, 512) weight.
    w6, p["b6"] = linear(keys[5], pos_enc + 256, 256)
    w6x, w6h = w6[:pos_enc], w6[pos_enc:]
    p["w16"] = jnp.concatenate([w1, w6x], axis=1).astype(bf16)      # (pos_enc, 512)
    p["w6h"] = w6h.astype(bf16)

    w, p["b7"] = linear(keys[6], 256, 256);     p["w7"] = w.astype(bf16)
    w, p["b8"] = linear(keys[7], 256, 256);     p["w8"] = w.astype(bf16)

    # Fused rgb_network (256->256) + volume_density (256->1) heads, zero-padded
    # to 384 output lanes (multiple of 128).
    wd, bd = linear(keys[8], 256, 1)
    wr, br = linear(keys[9], 256, 256)
    zpad_w = jnp.zeros((256, 127), jnp.float32)
    zpad_b = jnp.zeros((1, 127), jnp.float32)
    p["wrd"] = jnp.concatenate([wr, wd, zpad_w], axis=1).astype(bf16)   # (256, 384)
    p["brd"] = jnp.concatenate([br, bd, zpad_b], axis=1)                # (1, 384) f32

    # final rgb layer: in_features = dir_enc + 256, concat order is [gammaD | r]
    wf, p["bf"] = linear(keys[10], 256 + dir_enc, 128)
    p["wfd"], p["wfh"] = wf[:dir_enc].astype(bf16), wf[dir_enc:].astype(bf16)
    return p


PARAM_ORDER = (
    "w16", "b1", "w2", "b2", "w3", "b3", "w4", "b4", "w5", "b5",
    "w6h", "b6",
    "w7", "b7", "w8", "b8",
    "wrd", "brd",
    "wfd", "wfh", "bf",
)


def _ceil_to(x, m):
    return -(-x // m) * m


# ----------------------------------------------------------------------------
# Wrapper: padding + pallas_call plumbing.
# ----------------------------------------------------------------------------
@functools.partial(jax.jit, static_argnames=("tile_m",))
def nerf_forward(gammaX, gammaD, params, *, tile_m=1024):
    N, pos_enc = gammaX.shape
    _, dir_enc = gammaD.shape

    # Clamp the row tile to the problem size (multiple of 8 sublanes) and pad
    # rows so N need not divide the tile.
    tm = _ceil_to(min(tile_m, _ceil_to(N, 8)), 8)
    Np = _ceil_to(N, tm)
    if Np != N:
        gammaX = jnp.pad(gammaX, ((0, Np - N), (0, 0)))
        gammaD = jnp.pad(gammaD, ((0, Np - N), (0, 0)))

    param_list = [params[name] for name in PARAM_ORDER]

    row_spec = lambda feat: pl.BlockSpec((tm, feat), lambda i: (i, 0))
    # Constant index_map -> fetched once, stays resident across grid steps.
    full_spec = lambda arr: pl.BlockSpec(arr.shape, lambda i: (0, 0))

    in_specs = [row_spec(pos_enc), row_spec(dir_enc)] + [full_spec(a) for a in param_list]
    out_specs = pl.BlockSpec((tm, 256), lambda i: (i, 0))

    out = pl.pallas_call(
        nerf_kernel,
        out_shape=jax.ShapeDtypeStruct((Np, 256), jnp.float32),
        grid=(Np // tm,),
        in_specs=in_specs,
        out_specs=out_specs,
        compiler_params=pltpu.CompilerParams(
            dimension_semantics=("parallel",),
        ),
    )(gammaX, gammaD, *param_list)

    rgb = out[:N, :128]
    sigma = out[:N, 128:129]
    return sigma, rgb


# ----------------------------------------------------------------------------
# Pure-JAX reference with the SAME precision policy (bf16 matmul inputs, f32
# accumulation / elementwise), mirroring the PyTorch forward exactly.
# ----------------------------------------------------------------------------
def nerf_reference(gammaX, gammaD, p):
    f32, bf16 = jnp.float32, jnp.bfloat16

    def lin(x, w, b):
        return jnp.dot(x.astype(bf16), w.astype(bf16), preferred_element_type=f32) + b

    w1 = p["w16"][:, :256]
    w6x = p["w16"][:, 256:]

    h = jnp.maximum(lin(gammaX, w1, p["b1"]), 0.0)
    for i in (2, 3, 4, 5):
        h = jnp.maximum(lin(h, p[f"w{i}"], p[f"b{i}"]), 0.0)
    # sixth layer on cat([gammaX, h]) == split matmul
    h = (jnp.dot(gammaX.astype(bf16), w6x, preferred_element_type=f32)
         + jnp.dot(h.astype(bf16), p["w6h"], preferred_element_type=f32)
         + p["b6"])
    h = jnp.maximum(lin(h, p["w7"], p["b7"]), 0.0)
    h = lin(h, p["w8"], p["b8"])
    rd = jnp.maximum(lin(h, p["wrd"], p["brd"]), 0.0)
    sigma = rd[:, 256:257]          # volume_density (Linear + ReLU)
    r = rd[:, :256]                 # rgb_network    (Linear + ReLU)
    z = (jnp.dot(gammaD.astype(bf16), p["wfd"], preferred_element_type=f32)
         + jnp.dot(r.astype(bf16), p["wfh"], preferred_element_type=f32)
         + p["bf"])
    rgb = jax.nn.sigmoid(z)
    return sigma, rgb


if __name__ == "__main__":
    POS_ENC = 64   # position_encoder_size
    DIR_ENC = 32   # direction_encoder_size
    N = 200        # number of sampled points; deliberately NOT a multiple of tile_m

    key = jax.random.PRNGKey(0)
    kx, kd, kp = jax.random.split(key, 3)
    gammaX = jax.random.normal(kx, (N, POS_ENC), jnp.float32)
    gammaD = jax.random.normal(kd, (N, DIR_ENC), jnp.float32)
    params = init_params(kp, POS_ENC, DIR_ENC)

    # Small demo tile (128) -> 2 grid steps even at this tiny N. For production
    # N (hundreds of thousands of samples) use the default tile_m=1024.
    sigma, rgb = nerf_forward(gammaX, gammaD, params, tile_m=128)
    jax.block_until_ready((sigma, rgb))

    sigma_ref, rgb_ref = nerf_reference(gammaX, gammaD, params)
    assert sigma.shape == (N, 1) and rgb.shape == (N, 128)
    assert jnp.allclose(sigma, sigma_ref, atol=1e-2, rtol=1e-2), \
        float(jnp.max(jnp.abs(sigma - sigma_ref)))
    assert jnp.allclose(rgb, rgb_ref, atol=1e-2, rtol=1e-2), \
        float(jnp.max(jnp.abs(rgb - rgb_ref)))

    print("KERNEL_OK")
</pallas_src>

<mosaic_0001>
module attributes {stable_mosaic.version = 11 : i64} {
  func.func @nerf_kernel(%arg0: i32, %arg1: memref<128x64xf32, #tpu.memory_space<vmem>>, %arg2: memref<128x32xf32, #tpu.memory_space<vmem>>, %arg3: memref<64x512xbf16, #tpu.memory_space<vmem>>, %arg4: memref<1x256xf32, #tpu.memory_space<vmem>>, %arg5: memref<256x256xbf16, #tpu.memory_space<vmem>>, %arg6: memref<1x256xf32, #tpu.memory_space<vmem>>, %arg7: memref<256x256xbf16, #tpu.memory_space<vmem>>, %arg8: memref<1x256xf32, #tpu.memory_space<vmem>>, %arg9: memref<256x256xbf16, #tpu.memory_space<vmem>>, %arg10: memref<1x256xf32, #tpu.memory_space<vmem>>, %arg11: memref<256x256xbf16, #tpu.memory_space<vmem>>, %arg12: memref<1x256xf32, #tpu.memory_space<vmem>>, %arg13: memref<256x256xbf16, #tpu.memory_space<vmem>>, %arg14: memref<1x256xf32, #tpu.memory_space<vmem>>, %arg15: memref<256x256xbf16, #tpu.memory_space<vmem>>, %arg16: memref<1x256xf32, #tpu.memory_space<vmem>>, %arg17: memref<256x256xbf16, #tpu.memory_space<vmem>>, %arg18: memref<1x256xf32, #tpu.memory_space<vmem>>, %arg19: memref<256x384xbf16, #tpu.memory_space<vmem>>, %arg20: memref<1x384xf32, #tpu.memory_space<vmem>>, %arg21: memref<32x128xbf16, #tpu.memory_space<vmem>>, %arg22: memref<256x128xbf16, #tpu.memory_space<vmem>>, %arg23: memref<1x128xf32, #tpu.memory_space<vmem>>, %arg24: memref<128x256xf32, #tpu.memory_space<vmem>>) attributes {dimension_semantics = [#tpu.dimension_semantics<parallel>], iteration_bounds = array<i64: 2>, scalar_prefetch = 0 : i64, scratch_operands = 0 : i64, tpu.core_type = #tpu.core_type<tc>, window_params = [{transform_indices = @transform_0, window_bounds = array<i64: 128, 64>}, {transform_indices = @transform_1, window_bounds = array<i64: 128, 32>}, {pipeline_mode = #tpu.pipeline_mode<synchronous>, transform_indices = @transform_2, window_bounds = array<i64: 64, 512>}, {pipeline_mode = #tpu.pipeline_mode<synchronous>, transform_indices = @transform_3, window_bounds = array<i64: 1, 256>}, {pipeline_mode = #tpu.pipeline_mode<synchronous>, transform_indices = @transform_4, window_bounds = array<i64: 256, 256>}, {pipeline_mode = #tpu.pipeline_mode<synchronous>, transform_indices = @transform_5, window_bounds = array<i64: 1, 256>}, {pipeline_mode = #tpu.pipeline_mode<synchronous>, transform_indices = @transform_6, window_bounds = array<i64: 256, 256>}, {pipeline_mode = #tpu.pipeline_mode<synchronous>, transform_indices = @transform_7, window_bounds = array<i64: 1, 256>}, {pipeline_mode = #tpu.pipeline_mode<synchronous>, transform_indices = @transform_8, window_bounds = array<i64: 256, 256>}, {pipeline_mode = #tpu.pipeline_mode<synchronous>, transform_indices = @transform_9, window_bounds = array<i64: 1, 256>}, {pipeline_mode = #tpu.pipeline_mode<synchronous>, transform_indices = @transform_10, window_bounds = array<i64: 256, 256>}, {pipeline_mode = #tpu.pipeline_mode<synchronous>, transform_indices = @transform_11, window_bounds = array<i64: 1, 256>}, {pipeline_mode = #tpu.pipeline_mode<synchronous>, transform_indices = @transform_12, window_bounds = array<i64: 256, 256>}, {pipeline_mode = #tpu.pipeline_mode<synchronous>, transform_indices = @transform_13, window_bounds = array<i64: 1, 256>}, {pipeline_mode = #tpu.pipeline_mode<synchronous>, transform_indices = @transform_14, window_bounds = array<i64: 256, 256>}, {pipeline_mode = #tpu.pipeline_mode<synchronous>, transform_indices = @transform_15, window_bounds = array<i64: 1, 256>}, {pipeline_mode = #tpu.pipeline_mode<synchronous>, transform_indices = @transform_16, window_bounds = array<i64: 256, 256>}, {pipeline_mode = #tpu.pipeline_mode<synchronous>, transform_indices = @transform_17, window_bounds = array<i64: 1, 256>}, {pipeline_mode = #tpu.pipeline_mode<synchronous>, transform_indices = @transform_18, window_bounds = array<i64: 256, 384>}, {pipeline_mode = #tpu.pipeline_mode<synchronous>, transform_indices = @transform_19, window_bounds = array<i64: 1, 384>}, {pipeline_mode = #tpu.pipeline_mode<synchronous>, transform_indices = @transform_20, window_bounds = array<i64: 32, 128>}, {pipeline_mode = #tpu.pipeline_mode<synchronous>, transform_indices = @transform_21, window_bounds = array<i64: 256, 128>}, {pipeline_mode = #tpu.pipeline_mode<synchronous>, transform_indices = @transform_22, window_bounds = array<i64: 1, 128>}, {transform_indices = @transform_23, window_bounds = array<i64: 128, 256>}]} {
    %c0 = arith.constant 0 : index
    %c0_0 = arith.constant 0 : index
    %0 = vector.load %arg1[%c0, %c0_0] : memref<128x64xf32, #tpu.memory_space<vmem>>, vector<128x64xf32>
    %1 = arith.truncf %0 : vector<128x64xf32> to vector<128x64xbf16>
    %c0_1 = arith.constant 0 : index
    %c0_2 = arith.constant 0 : index
    %2 = vector.load %arg2[%c0_1, %c0_2] : memref<128x32xf32, #tpu.memory_space<vmem>>, vector<128x32xf32>
    %3 = arith.truncf %2 : vector<128x32xf32> to vector<128x32xbf16>
    %c0_3 = arith.constant 0 : index
    %c0_4 = arith.constant 0 : index
    %4 = vector.load %arg3[%c0_3, %c0_4] : memref<64x512xbf16, #tpu.memory_space<vmem>>, vector<64x512xbf16>
    %cst = arith.constant dense<0.000000e+00> : vector<128x512xf32>
    %5 = tpu.matmul %1, %4, %cst {dimension_numbers = #tpu.dot_dimension_numbers<[1], [0], [0], [1], [0, 0, 1, 1], [], []>} : vector<128x64xbf16>, vector<64x512xbf16>, vector<128x512xf32> -> vector<128x512xf32>
    %6 = vector.extract_strided_slice %5 {offsets = [0, 0], sizes = [128, 256], strides = [1, 1]} : vector<128x512xf32> to vector<128x256xf32>
    %c0_5 = arith.constant 0 : index
    %c0_6 = arith.constant 0 : index
    %7 = vector.load %arg4[%c0_5, %c0_6] : memref<1x256xf32, #tpu.memory_space<vmem>>, vector<1x256xf32>
    %8 = vector.broadcast %7 : vector<1x256xf32> to vector<128x256xf32>
    %9 = arith.addf %6, %8 : vector<128x256xf32>
    %cst_7 = arith.constant 0.000000e+00 : f32
    %10 = vector.broadcast %cst_7 : f32 to vector<128x256xf32>
    %11 = arith.maximumf %9, %10 : vector<128x256xf32>
    %12 = vector.extract_strided_slice %5 {offsets = [0, 256], sizes = [128, 256], strides = [1, 1]} : vector<128x512xf32> to vector<128x256xf32>
    %13 = arith.truncf %11 : vector<128x256xf32> to vector<128x256xbf16>
    %c0_8 = arith.constant 0 : index
    %c0_9 = arith.constant 0 : index
    %14 = vector.load %arg5[%c0_8, %c0_9] : memref<256x256xbf16, #tpu.memory_space<vmem>>, vector<256x256xbf16>
    %cst_10 = arith.constant dense<0.000000e+00> : vector<128x256xf32>
    %15 = tpu.matmul %13, %14, %cst_10 {dimension_numbers = #tpu.dot_dimension_numbers<[1], [0], [0], [1], [0, 0, 1, 1], [], []>} : vector<128x256xbf16>, vector<256x256xbf16>, vector<128x256xf32> -> vector<128x256xf32>
    %c0_11 = arith.constant 0 : index
    %c0_12 = arith.constant 0 : index
    %16 = vector.load %arg6[%c0_11, %c0_12] : memref<1x256xf32, #tpu.memory_space<vmem>>, vector<1x256xf32>
    %17 = vector.broadcast %16 : vector<1x256xf32> to vector<128x256xf32>
    %18 = arith.addf %15, %17 : vector<128x256xf32>
    %cst_13 = arith.constant 0.000000e+00 : f32
    %19 = vector.broadcast %cst_13 : f32 to vector<128x256xf32>
    %20 = arith.maximumf %18, %19 : vector<128x256xf32>
    %21 = arith.truncf %20 : vector<128x256xf32> to vector<128x256xbf16>
    %c0_14 = arith.constant 0 : index
    %c0_15 = arith.constant 0 : index
    %22 = vector.load %arg7[%c0_14, %c0_15] : memref<256x256xbf16, #tpu.memory_space<vmem>>, vector<256x256xbf16>
    %cst_16 = arith.constant dense<0.000000e+00> : vector<128x256xf32>
    %23 = tpu.matmul %21, %22, %cst_16 {dimension_numbers = #tpu.dot_dimension_numbers<[1], [0], [0], [1], [0, 0, 1, 1], [], []>} : vector<128x256xbf16>, vector<256x256xbf16>, vector<128x256xf32> -> vector<128x256xf32>
    %c0_17 = arith.constant 0 : index
    %c0_18 = arith.constant 0 : index
    %24 = vector.load %arg8[%c0_17, %c0_18] : memref<1x256xf32, #tpu.memory_space<vmem>>, vector<1x256xf32>
    %25 = vector.broadcast %24 : vector<1x256xf32> to vector<128x256xf32>
    %26 = arith.addf %23, %25 : vector<128x256xf32>
    %cst_19 = arith.constant 0.000000e+00 : f32
    %27 = vector.broadcast %cst_19 : f32 to vector<128x256xf32>
    %28 = arith.maximumf %26, %27 : vector<128x256xf32>
    %29 = arith.truncf %28 : vector<128x256xf32> to vector<128x256xbf16>
    %c0_20 = arith.constant 0 : index
    %c0_21 = arith.constant 0 : index
    %30 = vector.load %arg9[%c0_20, %c0_21] : memref<256x256xbf16, #tpu.memory_space<vmem>>, vector<256x256xbf16>
    %cst_22 = arith.constant dense<0.000000e+00> : vector<128x256xf32>
    %31 = tpu.matmul %29, %30, %cst_22 {dimension_numbers = #tpu.dot_dimension_numbers<[1], [0], [0], [1], [0, 0, 1, 1], [], []>} : vector<128x256xbf16>, vector<256x256xbf16>, vector<128x256xf32> -> vector<128x256xf32>
    %c0_23 = arith.constant 0 : index
    %c0_24 = arith.constant 0 : index
    %32 = vector.load %arg10[%c0_23, %c0_24] : memref<1x256xf32, #tpu.memory_space<vmem>>, vector<1x256xf32>
    %33 = vector.broadcast %32 : vector<1x256xf32> to vector<128x256xf32>
    %34 = arith.addf %31, %33 : vector<128x256xf32>
    %cst_25 = arith.constant 0.000000e+00 : f32
    %35 = vector.broadcast %cst_25 : f32 to vector<128x256xf32>
    %36 = arith.maximumf %34, %35 : vector<128x256xf32>
    %37 = arith.truncf %36 : vector<128x256xf32> to vector<128x256xbf16>
    %c0_26 = arith.constant 0 : index
    %c0_27 = arith.constant 0 : index
    %38 = vector.load %arg11[%c0_26, %c0_27] : memref<256x256xbf16, #tpu.memory_space<vmem>>, vector<256x256xbf16>
    %cst_28 = arith.constant dense<0.000000e+00> : vector<128x256xf32>
    %39 = tpu.matmul %37, %38, %cst_28 {dimension_numbers = #tpu.dot_dimension_numbers<[1], [0], [0], [1], [0, 0, 1, 1], [], []>} : vector<128x256xbf16>, vector<256x256xbf16>, vector<128x256xf32> -> vector<128x256xf32>
    %c0_29 = arith.constant 0 : index
    %c0_30 = arith.constant 0 : index
    %40 = vector.load %arg12[%c0_29, %c0_30] : memref<1x256xf32, #tpu.memory_space<vmem>>, vector<1x256xf32>
    %41 = vector.broadcast %40 : vector<1x256xf32> to vector<128x256xf32>
    %42 = arith.addf %39, %41 : vector<128x256xf32>
    %cst_31 = arith.constant 0.000000e+00 : f32
    %43 = vector.broadcast %cst_31 : f32 to vector<128x256xf32>
    %44 = arith.maximumf %42, %43 : vector<128x256xf32>
    %45 = arith.truncf %44 : vector<128x256xf32> to vector<128x256xbf16>
    %c0_32 = arith.constant 0 : index
    %c0_33 = arith.constant 0 : index
    %46 = vector.load %arg13[%c0_32, %c0_33] : memref<256x256xbf16, #tpu.memory_space<vmem>>, vector<256x256xbf16>
    %cst_34 = arith.constant dense<0.000000e+00> : vector<128x256xf32>
    %47 = tpu.matmul %45, %46, %cst_34 {dimension_numbers = #tpu.dot_dimension_numbers<[1], [0], [0], [1], [0, 0, 1, 1], [], []>} : vector<128x256xbf16>, vector<256x256xbf16>, vector<128x256xf32> -> vector<128x256xf32>
    %48 = arith.addf %12, %47 : vector<128x256xf32>
    %c0_35 = arith.constant 0 : index
    %c0_36 = arith.constant 0 : index
    %49 = vector.load %arg14[%c0_35, %c0_36] : memref<1x256xf32, #tpu.memory_space<vmem>>, vector<1x256xf32>
    %50 = vector.broadcast %49 : vector<1x256xf32> to vector<128x256xf32>
    %51 = arith.addf %48, %50 : vector<128x256xf32>
    %52 = arith.truncf %51 : vector<128x256xf32> to vector<128x256xbf16>
    %c0_37 = arith.constant 0 : index
    %c0_38 = arith.constant 0 : index
    %53 = vector.load %arg15[%c0_37, %c0_38] : memref<256x256xbf16, #tpu.memory_space<vmem>>, vector<256x256xbf16>
    %cst_39 = arith.constant dense<0.000000e+00> : vector<128x256xf32>
    %54 = tpu.matmul %52, %53, %cst_39 {dimension_numbers = #tpu.dot_dimension_numbers<[1], [0], [0], [1], [0, 0, 1, 1], [], []>} : vector<128x256xbf16>, vector<256x256xbf16>, vector<128x256xf32> -> vector<128x256xf32>
    %c0_40 = arith.constant 0 : index
    %c0_41 = arith.constant 0 : index
    %55 = vector.load %arg16[%c0_40, %c0_41] : memref<1x256xf32, #tpu.memory_space<vmem>>, vector<1x256xf32>
    %56 = vector.broadcast %55 : vector<1x256xf32> to vector<128x256xf32>
    %57 = arith.addf %54, %56 : vector<128x256xf32>
    %cst_42 = arith.constant 0.000000e+00 : f32
    %58 = vector.broadcast %cst_42 : f32 to vector<128x256xf32>
    %59 = arith.maximumf %57, %58 : vector<128x256xf32>
    %60 = arith.truncf %59 : vector<128x256xf32> to vector<128x256xbf16>
    %c0_43 = arith.constant 0 : index
    %c0_44 = arith.constant 0 : index
    %61 = vector.load %arg17[%c0_43, %c0_44] : memref<256x256xbf16, #tpu.memory_space<vmem>>, vector<256x256xbf16>
    %cst_45 = arith.constant dense<0.000000e+00> : vector<128x256xf32>
    %62 = tpu.matmul %60, %61, %cst_45 {dimension_numbers = #tpu.dot_dimension_numbers<[1], [0], [0], [1], [0, 0, 1, 1], [], []>} : vector<128x256xbf16>, vector<256x256xbf16>, vector<128x256xf32> -> vector<128x256xf32>
    %c0_46 = arith.constant 0 : index
    %c0_47 = arith.constant 0 : index
    %63 = vector.load %arg18[%c0_46, %c0_47] : memref<1x256xf32, #tpu.memory_space<vmem>>, vector<1x256xf32>
    %64 = vector.broadcast %63 : vector<1x256xf32> to vector<128x256xf32>
    %65 = arith.addf %62, %64 : vector<128x256xf32>
    %66 = arith.truncf %65 : vector<128x256xf32> to vector<128x256xbf16>
    %c0_48 = arith.constant 0 : index
    %c0_49 = arith.constant 0 : index
    %67 = vector.load %arg19[%c0_48, %c0_49] : memref<256x384xbf16, #tpu.memory_space<vmem>>, vector<256x384xbf16>
    %cst_50 = arith.constant dense<0.000000e+00> : vector<128x384xf32>
    %68 = tpu.matmul %66, %67, %cst_50 {dimension_numbers = #tpu.dot_dimension_numbers<[1], [0], [0], [1], [0, 0, 1, 1], [], []>} : vector<128x256xbf16>, vector<256x384xbf16>, vector<128x384xf32> -> vector<128x384xf32>
    %c0_51 = arith.constant 0 : index
    %c0_52 = arith.constant 0 : index
    %69 = vector.load %arg20[%c0_51, %c0_52] : memref<1x384xf32, #tpu.memory_space<vmem>>, vector<1x384xf32>
    %70 = vector.broadcast %69 : vector<1x384xf32> to vector<128x384xf32>
    %71 = arith.addf %68, %70 : vector<128x384xf32>
    %cst_53 = arith.constant 0.000000e+00 : f32
    %72 = vector.broadcast %cst_53 : f32 to vector<128x384xf32>
    %73 = arith.maximumf %71, %72 : vector<128x384xf32>
    %74 = vector.extract_strided_slice %73 {offsets = [0, 0], sizes = [128, 256], strides = [1, 1]} : vector<128x384xf32> to vector<128x256xf32>
    %c0_54 = arith.constant 0 : index
    %c0_55 = arith.constant 0 : index
    %75 = vector.load %arg21[%c0_54, %c0_55] : memref<32x128xbf16, #tpu.memory_space<vmem>>, vector<32x128xbf16>
    %cst_56 = arith.constant dense<0.000000e+00> : vector<128x128xf32>
    %76 = tpu.matmul %3, %75, %cst_56 {dimension_numbers = #tpu.dot_dimension_numbers<[1], [0], [0], [1], [0, 0, 1, 1], [], []>} : vector<128x32xbf16>, vector<32x128xbf16>, vector<128x128xf32> -> vector<128x128xf32>
    %77 = arith.truncf %74 : vector<128x256xf32> to vector<128x256xbf16>
    %c0_57 = arith.constant 0 : index
    %c0_58 = arith.constant 0 : index
    %78 = vector.load %arg22[%c0_57, %c0_58] : memref<256x128xbf16, #tpu.memory_space<vmem>>, vector<256x128xbf16>
    %cst_59 = arith.constant dense<0.000000e+00> : vector<128x128xf32>
    %79 = tpu.matmul %77, %78, %cst_59 {dimension_numbers = #tpu.dot_dimension_numbers<[1], [0], [0], [1], [0, 0, 1, 1], [], []>} : vector<128x256xbf16>, vector<256x128xbf16>, vector<128x128xf32> -> vector<128x128xf32>
    %80 = arith.addf %76, %79 : vector<128x128xf32>
    %c0_60 = arith.constant 0 : index
    %c0_61 = arith.constant 0 : index
    %81 = vector.load %arg23[%c0_60, %c0_61] : memref<1x128xf32, #tpu.memory_space<vmem>>, vector<1x128xf32>
    %82 = vector.broadcast %81 : vector<1x128xf32> to vector<128x128xf32>
    %83 = arith.addf %80, %82 : vector<128x128xf32>
    %84 = arith.negf %83 : vector<128x128xf32>
    %85 = math.exp %84 : vector<128x128xf32>
    %cst_62 = arith.constant 1.000000e+00 : f32
    %86 = vector.broadcast %cst_62 : f32 to vector<128x128xf32>
    %87 = arith.addf %86, %85 : vector<128x128xf32>
    %88 = arith.divf %86, %87 : vector<128x128xf32>
    %c0_63 = arith.constant 0 : index
    %c0_64 = arith.constant 0 : index
    %89 = vector.load %arg24[%c0_63, %c0_64] : memref<128x256xf32, #tpu.memory_space<vmem>>, vector<128x128xf32>
    tpu.vector_store %arg24[%c0_63, %c0_64], %88 {strides = array<i32>} : memref<128x256xf32, #tpu.memory_space<vmem>>, vector<128x128xf32>,
    %90 = vector.extract_strided_slice %73 {offsets = [0, 256], sizes = [128, 128], strides = [1, 1]} : vector<128x384xf32> to vector<128x128xf32>
    %c0_65 = arith.constant 0 : index
    %c128 = arith.constant 128 : index
    %91 = vector.load %arg24[%c0_65, %c128] : memref<128x256xf32, #tpu.memory_space<vmem>>, vector<128x128xf32>
    tpu.vector_store %arg24[%c0_65, %c128], %90 {strides = array<i32>} : memref<128x256xf32, #tpu.memory_space<vmem>>, vector<128x128xf32>,
    return
  }
  func.func @transform_0(%arg0: i32) -> (i32, i32) {
    %c0_i32 = arith.constant 0 : i32
    %c0_i32_0 = arith.constant 0 : i32
    return %arg0, %c0_i32 : i32, i32
  }
  func.func @transform_1(%arg0: i32) -> (i32, i32) {
    %c0_i32 = arith.constant 0 : i32
    %c0_i32_0 = arith.constant 0 : i32
    return %arg0, %c0_i32 : i32, i32
  }
  func.func @transform_2(%arg0: i32) -> (i32, i32) {
    %c0_i32 = arith.constant 0 : i32
    %c0_i32_0 = arith.constant 0 : i32
    %c0_i32_1 = arith.constant 0 : i32
    return %c0_i32, %c0_i32_0 : i32, i32
  }
  func.func @transform_3(%arg0: i32) -> (i32, i32) {
    %c0_i32 = arith.constant 0 : i32
    %c0_i32_0 = arith.constant 0 : i32
    %c0_i32_1 = arith.constant 0 : i32
    return %c0_i32, %c0_i32_0 : i32, i32
  }
  func.func @transform_4(%arg0: i32) -> (i32, i32) {
    %c0_i32 = arith.constant 0 : i32
    %c0_i32_0 = arith.constant 0 : i32
    %c0_i32_1 = arith.constant 0 : i32
    return %c0_i32, %c0_i32_0 : i32, i32
  }
  func.func @transform_5(%arg0: i32) -> (i32, i32) {
    %c0_i32 = arith.constant 0 : i32
    %c0_i32_0 = arith.constant 0 : i32
    %c0_i32_1 = arith.constant 0 : i32
    return %c0_i32, %c0_i32_0 : i32, i32
  }
  func.func @transform_6(%arg0: i32) -> (i32, i32) {
    %c0_i32 = arith.constant 0 : i32
    %c0_i32_0 = arith.constant 0 : i32
    %c0_i32_1 = arith.constant 0 : i32
    return %c0_i32, %c0_i32_0 : i32, i32
  }
  func.func @transform_7(%arg0: i32) -> (i32, i32) {
    %c0_i32 = arith.constant 0 : i32
    %c0_i32_0 = arith.constant 0 : i32
    %c0_i32_1 = arith.constant 0 : i32
    return %c0_i32, %c0_i32_0 : i32, i32
  }
  func.func @transform_8(%arg0: i32) -> (i32, i32) {
    %c0_i32 = arith.constant 0 : i32
    %c0_i32_0 = arith.constant 0 : i32
    %c0_i32_1 = arith.constant 0 : i32
    return %c0_i32, %c0_i32_0 : i32, i32
  }
  func.func @transform_9(%arg0: i32) -> (i32, i32) {
    %c0_i32 = arith.constant 0 : i32
    %c0_i32_0 = arith.constant 0 : i32
    %c0_i32_1 = arith.constant 0 : i32
    return %c0_i32, %c0_i32_0 : i32, i32
  }
  func.func @transform_10(%arg0: i32) -> (i32, i32) {
    %c0_i32 = arith.constant 0 : i32
    %c0_i32_0 = arith.constant 0 : i32
    %c0_i32_1 = arith.constant 0 : i32
    return %c0_i32, %c0_i32_0 : i32, i32
  }
  func.func @transform_11(%arg0: i32) -> (i32, i32) {
    %c0_i32 = arith.constant 0 : i32
    %c0_i32_0 = arith.constant 0 : i32
    %c0_i32_1 = arith.constant 0 : i32
    return %c0_i32, %c0_i32_0 : i32, i32
  }
  func.func @transform_12(%arg0: i32) -> (i32, i32) {
    %c0_i32 = arith.constant 0 : i32
    %c0_i32_0 = arith.constant 0 : i32
    %c0_i32_1 = arith.constant 0 : i32
    return %c0_i32, %c0_i32_0 : i32, i32
  }
  func.func @transform_13(%arg0: i32) -> (i32, i32) {
    %c0_i32 = arith.constant 0 : i32
    %c0_i32_0 = arith.constant 0 : i32
    %c0_i32_1 = arith.constant 0 : i32
    return %c0_i32, %c0_i32_0 : i32, i32
  }
  func.func @transform_14(%arg0: i32) -> (i32, i32) {
    %c0_i32 = arith.constant 0 : i32
    %c0_i32_0 = arith.constant 0 : i32
    %c0_i32_1 = arith.constant 0 : i32
    return %c0_i32, %c0_i32_0 : i32, i32
  }
  func.func @transform_15(%arg0: i32) -> (i32, i32) {
    %c0_i32 = arith.constant 0 : i32
    %c0_i32_0 = arith.constant 0 : i32
    %c0_i32_1 = arith.constant 0 : i32
    return %c0_i32, %c0_i32_0 : i32, i32
  }
  func.func @transform_16(%arg0: i32) -> (i32, i32) {
    %c0_i32 = arith.constant 0 : i32
    %c0_i32_0 = arith.constant 0 : i32
    %c0_i32_1 = arith.constant 0 : i32
    return %c0_i32, %c0_i32_0 : i32, i32
  }
  func.func @transform_17(%arg0: i32) -> (i32, i32) {
    %c0_i32 = arith.constant 0 : i32
    %c0_i32_0 = arith.constant 0 : i32
    %c0_i32_1 = arith.constant 0 : i32
    return %c0_i32, %c0_i32_0 : i32, i32
  }
  func.func @transform_18(%arg0: i32) -> (i32, i32) {
    %c0_i32 = arith.constant 0 : i32
    %c0_i32_0 = arith.constant 0 : i32
    %c0_i32_1 = arith.constant 0 : i32
    return %c0_i32, %c0_i32_0 : i32, i32
  }
  func.func @transform_19(%arg0: i32) -> (i32, i32) {
    %c0_i32 = arith.constant 0 : i32
    %c0_i32_0 = arith.constant 0 : i32
    %c0_i32_1 = arith.constant 0 : i32
    return %c0_i32, %c0_i32_0 : i32, i32
  }
  func.func @transform_20(%arg0: i32) -> (i32, i32) {
    %c0_i32 = arith.constant 0 : i32
    %c0_i32_0 = arith.constant 0 : i32
    %c0_i32_1 = arith.constant 0 : i32
    return %c0_i32, %c0_i32_0 : i32, i32
  }
  func.func @transform_21(%arg0: i32) -> (i32, i32) {
    %c0_i32 = arith.constant 0 : i32
    %c0_i32_0 = arith.constant 0 : i32
    %c0_i32_1 = arith.constant 0 : i32
    return %c0_i32, %c0_i32_0 : i32, i32
  }
  func.func @transform_22(%arg0: i32) -> (i32, i32) {
    %c0_i32 = arith.constant 0 : i32
    %c0_i32_0 = arith.constant 0 : i32
    %c0_i32_1 = arith.constant 0 : i32
    return %c0_i32, %c0_i32_0 : i32, i32
  }
  func.func @transform_23(%arg0: i32) -> (i32, i32) {
    %c0_i32 = arith.constant 0 : i32
    %c0_i32_0 = arith.constant 0 : i32
    return %arg0, %c0_i32 : i32, i32
  }
}

</mosaic_0001>

<bundles_post_ra>
// kernel: nerf_forward.1
= control target key start
LH: loop header
LB: loop body
LE: loop exit
PB: predicated region body
PF: predicated region fallthrough
CT: control target
= control target key end

     0   :  { %s9887_s0 = inlined_call_operand.vmem [shape: f32[256,64], index: 0, kind: input, shape index: {}]   ;;  %s9888_s1 = inlined_call_operand.vmem [shape: f32[256,32], index: 1, kind: input, shape index: {}]   ;;  %s9889_s2 = inlined_call_operand.hbm [shape: bf16[64,512], index: 2, kind: input, shape index: {}]   ;;  %s9890_s3 = inlined_call_operand.vmem [shape: f32[1,256], index: 3, kind: input, shape index: {}]   ;;  %s9891_s4 = inlined_call_operand.vmem [shape: bf16[256,256], index: 4, kind: input, shape index: {}]   ;;  %s9892_s5 = inlined_call_operand.vmem [shape: f32[1,256], index: 5, kind: input, shape index: {}]   ;;  %s9893_s6 = inlined_call_operand.vmem [shape: bf16[256,256], index: 6, kind: input, shape index: {}]   ;;  %s9894_s7 = inlined_call_operand.vmem [shape: f32[1,256], index: 7, kind: input, shape index: {}]   ;;  %s9895_s8 = inlined_call_operand.vmem [shape: bf16[256,256], index: 8, kind: input, shape index: {}]   ;;  %s9896_s9 = inlined_call_operand.vmem [shape: f32[1,256], index: 9, kind: input, shape index: {}]   ;;  %s9897_s10 = inlined_call_operand.vmem [shape: bf16[256,256], index: 10, kind: input, shape index: {}]   ;;  %s9898_s11 = inlined_call_operand.vmem [shape: f32[1,256], index: 11, kind: input, shape index: {}]   ;;  %s9899_s12 = inlined_call_operand.hbm [shape: bf16[256,256], index: 12, kind: input, shape index: {}]   ;;  %s9900_s13 = inlined_call_operand.vmem [shape: f32[1,256], index: 13, kind: input, shape index: {}]   ;;  %s9901_s14 = inlined_call_operand.hbm [shape: bf16[256,256], index: 14, kind: input, shape index: {}]   ;;  %s9902_s15 = inlined_call_operand.vmem [shape: f32[1,256], index: 15, kind: input, shape index: {}]   ;;  %s9903_s16 = inlined_call_operand.hbm [shape: bf16[256,256], index: 16, kind: input, shape index: {}]   ;;  %s9904_s17 = inlined_call_operand.hbm [shape: f32[1,256], index: 17, kind: input, shape index: {}]   ;;  %s9905_s18 = inlined_call_operand.vmem [shape: bf16[256,384], index: 18, kind: input, shape index: {}]   ;;  %s9906_s19 = inlined_call_operand.vmem [shape: f32[1,384], index: 19, kind: input, shape index: {}]   ;;  %s9907_s20 = inlined_call_operand.vmem [shape: bf16[32,128], index: 20, kind: input, shape index: {}]   ;;  %s9908_s21 = inlined_call_operand.hbm [shape: bf16[256,128], index: 21, kind: input, shape index: {}]   ;;  %s9909_s22 = inlined_call_operand.vmem [shape: f32[1,128], index: 22, kind: input, shape index: {}]   ;;  %s9910_s23 = inlined_call_operand.vmem [shape: f32[256,256], index: 23, kind: output, shape index: {}]  }
   0x1   :  { %9915 = sst [smem:[#allocation16_spill]] %s9887_s0 }
   0x2   :  { %9916 = sst [smem:[#allocation17_spill]] %s9888_s1 }
   0x3   :  { %9917 = sst [smem:[#allocation18_spill]] %s9889_s2 }
   0x4   :  { %9918 = sst [smem:[#allocation19_spill]] %s9890_s3 }
   0x5   :  { %9919 = sst [smem:[#allocation20_spill]] %s9891_s4 }
   0x6   :  { %9920 = sst [smem:[#allocation21_spill]] %s9892_s5 }
   0x7   :  { %9921 = sst [smem:[#allocation22_spill]] %s9893_s6 }
   0x8   :  { %9922 = sst [smem:[#allocation23_spill]] %s9894_s7 }
   0x9   :  { %9923 = sst [smem:[#allocation24_spill]] %s9899_s12 }
   0xa   :  { %9924 = sst [smem:[#allocation25_spill]] %s9903_s16 }
   0xb   :  { %9925 = sst [smem:[#allocation26_spill]] %s9906_s19 }
   0xc   :  { %9926 = sst [smem:[#allocation27_spill]] %s9907_s20 }
   0xd   :  { %9927 = sst [smem:[#allocation28_spill]] %s9909_s22 }
   0xe   :  { %9928 = sst [smem:[#allocation29_spill]] %s9910_s23 }
   0xf   :  { %28 = vsyncpa [#allocation3], 0 }
  0x10   :  { %29 = vsyncpa [#allocation5], 0 }
  0x11   :  { %30 = vsyncpa [#allocation8], 0 }
  0x12   :  { %31 = vsyncpa [#allocation11], 0  ;;  %s7971_s4 = smov 0  }
  0x13 LB: > { %s9929_s12 = sld [smem:[#allocation24_spill]]  ;;  %s9913_s5 = sadd.s32 4294967295, %s7837_s4   ;;  %s7837_s4 = sphi %s7971_s4, %s37_s4  }
  0x14   : > { %p5872_p0 = scmp.ge.s32.totalorder %s7837_s4, 1  ;;  %p561_p1 = scmp.lt.s32.totalorder %s7837_s4, 3 }
  0x15   : > { %p7984_p2 = scmp.eq.s32.totalorder %s9913_s5, 0  ;;  %s7839_s2 = smov [#allocation4]  }
  0x16   : > { %p7988_p3 = pnand %p5872_p0, %p561_p1  ;;  %s615_s6 = sshll.u32 %s7839_s2, 4  ;;  %s616_s6 = int_to_ptr.vmem [resolvable:$true] %s615_s6 }
  0x17   : > { %s9932_s16 = sld [smem:[#allocation25_spill]]  ;;  %s7840_s3 = smov [#allocation7]  }
  0x18   : > { %p7519_p4 = pneg %p7988_p3  ;;  %s649_s0 = sshll.u32 %s7840_s3, 4  ;;  %s650_s0 = int_to_ptr.vmem [resolvable:$true] %s649_s0 }
  0x19   : > { %s613_s25 = sshll.u32 %s9929_s12, 4  ;;  %s9934_s2 = sld [smem:[#allocation18_spill]]  ;;  %s614_s25 = int_to_ptr.hbm [resolvable:$true] %s613_s25 }
  0x1a   : > { %p7999_p5 = pnand %p7984_p2, %p7519_p4  ;;  %s7841_s12 = smov 128  }
  0x1b   : > { %s7842_s22 = smov 8   ;;  %s7843_s27 = smov [#allocation2]  }
  0x1c   : > { %7525 = dma.hbm_to_vmem [thread:$0]  (!%p7999_p5), %s614_s25, 4096, %s616_s6, [#allocation5], %s7841_s12, %s7841_s12, %s7842_s22  }
  0x1d   : > { %s647_s28 = sshll.u32 %s9932_s16, 4  ;;  %s574_s7 = sshll.u32 %s7843_s27, 4  ;;  %s648_s28 = int_to_ptr.hbm [resolvable:$true] %s647_s28  ;;  %s575_s7 = int_to_ptr.vmem [resolvable:$true] %s574_s7 }
  0x1e   : > { %7531 = dma.hbm_to_vmem [thread:$0]  (!%p7999_p5), %s648_s28, 4096, %s650_s0, [#allocation8], %s7841_s12, %s7841_s12, %s7842_s22  }
  0x1f   : > { %s572_s5 = sshll.u32 %s9934_s2, 4  ;;  %s7844_s16 = smov 256   ;;  %s573_s5 = int_to_ptr.hbm [resolvable:$true] %s572_s5 }
  0x20   : > { %s7845_s23 = smov 16   ;;  %s630_s24 = sshll.u32 %s9901_s14, 4  ;;  %s631_s24 = int_to_ptr.hbm [resolvable:$true] %s630_s24 }
  0x21   : > { %7522 = dma.hbm_to_vmem [thread:$0]  (!%p7999_p5), %s573_s5, 2048, %s575_s7, [#allocation3], %s7844_s16, %s7844_s16, %s7845_s23  }
  0x22   : > { %s7846_s2 = smov [#allocation6]   ;;  %s662_s28 = sshll.u32 %s9904_s17, 4  ;;  %s663_s28 = int_to_ptr.hbm [resolvable:$true] %s662_s28 }
  0x23   : > { %s632_s19 = sshll.u32 %s7846_s2, 4  ;;  %s7847_s0 = smov [#allocation9]   ;;  %s633_s19 = int_to_ptr.vmem [resolvable:$true] %s632_s19 }
  0x24   : > { %7528 = dma.hbm_to_vmem [thread:$0]  (!%p7999_p5), %s631_s24, 4096, %s633_s19, [#allocation5], %s7841_s12, %s7841_s12, %s7842_s22  }
  0x25   : > { %s664_s27 = sshll.u32 %s7847_s0, 4  ;;  %s682_s23 = sshll.u32 %s9908_s21, 4  ;;  %s665_s27 = int_to_ptr.vmem [resolvable:$true] %s664_s27  ;;  %s683_s23 = int_to_ptr.hbm [resolvable:$true] %s682_s23 }
  0x26   : > { %7534 = dma.hbm_to_vmem [thread:$0]  (!%p7999_p5), %s663_s28, 32, %s665_s27, [#allocation8]  }
  0x27   : > { %s7848_s5 = smov [#allocation10]   ;;  %s7849_s3 = smov 64  }
  0x28   : > { %s684_s7 = sshll.u32 %s7848_s5, 4  ;;  %s7850_s30 = smov 4   ;;  %s685_s7 = int_to_ptr.vmem [resolvable:$true] %s684_s7 }
  0x29   : > { %7537 = dma.hbm_to_vmem [thread:$0]  (!%p7999_p5), %s683_s23, 2048, %s685_s7, [#allocation11], %s7849_s3, %s7849_s3, %s7850_s30  }
  0x2a   : > { %721 = sbr.rel (%p7988_p3) target bundleno = 1797 (0x705), region = 112 }
  0x2f   : > { %7820 = dma.done.wait (%p7984_p2), [#allocation3], 2048  }
  0x30   : > { %7822 = vsyncadd (%p7984_p2), [#allocation3], 4294965248 }
  0x31   : > { %7824 = dma.done.wait (%p7984_p2), [#allocation5], 8192  }
  0x32   : > { %7826 = vsyncadd (%p7984_p2), [#allocation5], 4294959104 }
  0x33   : > { %7828 = dma.done.wait (%p7984_p2), [#allocation8], 4128  }
  0x34   : > { %7830 = vsyncadd (%p7984_p2), [#allocation8], 4294963168 }
  0x35   : > { %7832 = dma.done.wait (%p7984_p2), [#allocation11], 2048  }
  0x36   : > { %7834 = vsyncadd (%p7984_p2), [#allocation11], 4294965248  ;;  %s9935_s12 = sadd.s32 4294967295, %s7837_s4   ;;  %v5944_v0 = vld [vmem:[#allocation2 + $0x60] sm:$0xf]  ;;  %s9936_s26 = sld [smem:[#allocation16_spill]] }
  0x37   : > { %s5887_s19 = sshll.u32 %s9935_s12, 4  ;;  %v7191_v1 = vld [vmem:[#allocation2 + $0x6c] sm:$0xf0]  ;;  %v5928_v2 = vld [vmem:[#allocation2 + $0x40] sm:$0xf]  ;;  %vm981_vm0 = vcmask 523264  }
  0x38   : > { %p818_p6 = scmp.lt.s32.totalorder %s5887_s19, 31  ;;  %v5945_v3 = vor.u32 %v7191_v1, %v5944_v0  ;;  %v7187_v4 = vld [vmem:[#allocation2 + $0x4c] sm:$0xf0]  ;;  %v5912_v6 = vld [vmem:[#allocation2 + $0x20] sm:$0xf]  ;;  %s9937_s25 = sld [smem:[#allocation20_spill]] }
  0x39   : > { %v5929_v5 = vor.u32 %v7187_v4, %v5928_v2  ;;  %v7183_v7 = vld [vmem:[#allocation2 + $0x2c] sm:$0xf0]  ;;  %v5896_v9 = vld [vmem:[#allocation2] sm:$0xf]  ;;  %v7189_v13 = vld [vmem:[#allocation2 + $0x64] sm:$0xf] }
  0x3a   : > { %s9948_s19 = smov (!%p818_p6, %s5887_s19), 31  ;;  %1010 = vmatpush.bf16.msra.mxu0 %v5945_v3  ;;  %7483 = vmatpush.bf16.msra.mxu1 %v5945_v3  ;;  %v5913_v8 = vor.u32 %v7183_v7, %v5912_v6  ;;  %v7179_v10 = vld [vmem:[#allocation2 + $0xc] sm:$0xf0]  ;;  %v5946_v14 = vld [vmem:[#allocation2 + $0x70] sm:$0xf0]  ;;  %s9938_s28 = sld [smem:[#allocation19_spill]] }
  0x3b   : > { %s5888_s20 = sshll.u32 %s9948_s19, 3  ;;  %7484 = vmatpush.bf16.msra.mxu2 %v5945_v3  ;;  %7485 = vmatpush.bf16.msra.mxu3 %v5945_v3  ;;  %v5952_v16 = vld [vmem:[#allocation2 + $0x68] sm:$0xf]  ;;  %v7192_v17 = vld [vmem:[#allocation2 + $0x74] sm:$0xf0]  ;;  %v5897_v18 = vor.u32 %v7179_v10, %v5896_v9  ;;  %v5949_v22 = vor.u32 %v7189_v13, %v5946_v14  ;;  %s9939_s1 = sld [smem:[#allocation22_spill]] }
  0x3c   : > { %s8055_s29 = scalar_lea.vmem %s9936_s26, %s5888_s20  ;;  %v7190_v24 = vld [vmem:[#allocation2 + $0x6c] sm:$0xf]  ;;  %v5954_v25 = vld [vmem:[#allocation2 + $0x78] sm:$0xf0]  ;;  %v7185_v27 = vld [vmem:[#allocation2 + $0x44] sm:$0xf]  ;;  %v5953_v29 = vor.u32 %v7192_v17, %v5952_v16 }
  0x3d   : > { %v837_v11 = vld [vmem:[%s8055_s29] sm:$0xff]  ;;  %v838_v12 = vld [vmem:[%s8055_s29 + $0x8] sm:$0xff]  ;;  %v5930_v28 = vld [vmem:[#allocation2 + $0x50] sm:$0xf0]  ;;  %v5957_v35 = vor.u32 %v7190_v24, %v5954_v25  ;;  %s9940_s26 = sld [smem:[#allocation21_spill]]  ;;  %vm5310_vm1 = vcmask 261120  }
  0x3e   : > { %1011 = vmatpush.bf16.msra.mxu0 %v5929_v5  ;;  %7486 = vmatpush.bf16.msra.mxu1 %v5929_v5  ;;  %v841_v15 = vld [vmem:[%s8055_s29 + $0x20] sm:$0xff]  ;;  %v842_v19 = vld [vmem:[%s8055_s29 + $0x28] sm:$0xff]  ;;  %v8065_v30 = vpack.c.bf16 %v838_v12, %v837_v11  ;;  %v7188_v33 = vld [vmem:[#allocation2 + $0x54] sm:$0xf0]  ;;  %v5933_v37 = vor.u32 %v7185_v27, %v5930_v28  ;;  %s9941_s2 = sld [smem:[#allocation23_spill]] }
  0x3f   : > { %7487 = vmatpush.bf16.msra.mxu2 %v5929_v5  ;;  %7488 = vmatpush.bf16.msra.mxu3 %v5929_v5  ;;  %v845_v20 = vld [vmem:[%s8055_s29 + $0x40] sm:$0xff]  ;;  %v846_v21 = vld [vmem:[%s8055_s29 + $0x48] sm:$0xff]  ;;  %v8067_v31 = vpack.c.bf16 %v842_v19, %v841_v15  ;;  %v5938_v39 = vld [vmem:[#allocation2 + $0x58] sm:$0xf0]  ;;  %s9942_s5 = sld [smem:[#allocation27_spill]] }
  0x40   : > { %v849_v23 = vld [vmem:[%s8055_s29 + $0x60] sm:$0xff]  ;;  %v850_v26 = vld [vmem:[%s8055_s29 + $0x68] sm:$0xff]  ;;  %v8069_v34 = vpack.c.bf16 %v846_v21, %v845_v20  ;;  %v5914_v41 = vld [vmem:[#allocation2 + $0x30] sm:$0xf0]  ;;  %s9944_s0 = sld [smem:[#allocation17_spill]] }
  0x41   : > { %v5936_v32 = vld [vmem:[#allocation2 + $0x48] sm:$0xf]  ;;  %v8071_v36 = vpack.c.bf16 %v850_v26, %v849_v23  ;;  %v7186_v38 = vld [vmem:[#allocation2 + $0x4c] sm:$0xf]  ;;  %v7181_v40 = vld [vmem:[#allocation2 + $0x24] sm:$0xf] }
  0x42   : > { %1012 = vmatpush.bf16.msra.mxu0 %v5913_v8  ;;  %7489 = vmatpush.bf16.msra.mxu1 %v5913_v8  ;;  %v5937_v42 = vor.u32 %v7188_v33, %v5936_v32  ;;  %v5920_v43 = vld [vmem:[#allocation2 + $0x28] sm:$0xf]  ;;  %v7184_v44 = vld [vmem:[#allocation2 + $0x34] sm:$0xf0]  ;;  %v5941_v45 = vor.u32 %v7186_v38, %v5938_v39  ;;  %v5917_v46 = vor.u32 %v7181_v40, %v5914_v41  ;;  %v7182_v47 = vld [vmem:[#allocation2 + $0x2c] sm:$0xf] }
  0x43   : > { %7490 = vmatpush.bf16.msra.mxu2 %v5913_v8  ;;  %7491 = vmatpush.bf16.msra.mxu3 %v5913_v8  ;;  %v5922_v48 = vld [vmem:[#allocation2 + $0x38] sm:$0xf0]  ;;  %v7177_v49 = vld [vmem:[#allocation2 + $0x4] sm:$0xf]  ;;  %v5898_v50 = vld [vmem:[#allocation2 + $0x10] sm:$0xf0]  ;;  %v5921_v51 = vor.u32 %v7184_v44, %v5920_v43 }
  0x44   : > { %v5904_v52 = vld [vmem:[#allocation2 + $0x8] sm:$0xf]  ;;  %v7180_v53 = vld [vmem:[#allocation2 + $0x14] sm:$0xf0]  ;;  %v5925_v54 = vor.u32 %v7182_v47, %v5922_v48  ;;  %v7207_v55 = vld [vmem:[%s9937_s25 + $0x74] sm:$0xf]  ;;  %v5901_v57 = vor.u32 %v7177_v49, %v5898_v50 }
  0x45   : > { %v6050_v56 = vld [vmem:[%s9937_s25 + $0x78] sm:$0xf0]  ;;  %v7178_v58 = vld [vmem:[#allocation2 + $0xc] sm:$0xf]  ;;  %v5905_v60 = vor.u32 %v7180_v53, %v5904_v52  ;;  %v7223_v61 = vld [vmem:[%s9937_s25 + $0xf4] sm:$0xf] }
  0x46   : > { %1013 = vmatpush.bf16.msra.mxu0 %v5897_v18  ;;  %7492 = vmatpush.bf16.msra.mxu1 %v5897_v18  ;;  %v5906_v59 = vld [vmem:[#allocation2 + $0x18] sm:$0xf0]  ;;  %v839_v63 = vld [vmem:[%s8055_s29 + $0x10] sm:$0xff]  ;;  %v6053_v0 = vor.u32 %v7207_v55, %v6050_v56  ;;  %v7224_v15 = vld [vmem:[%s9937_s25 + $0xf4] sm:$0xf0]  ;;  %s9772_s27 = scalar_lea.vmem %s9944_s0, %s5888_s20  ;;  %s7176_s20 = sshll.u32 %s9948_s19, 4 }
  0x47   : > { %7493 = vmatpush.bf16.msra.mxu2 %v5897_v18  ;;  %7494 = vmatpush.bf16.msra.mxu3 %v5897_v18  ;;  %v6114_v62 = vld [vmem:[%s9937_s25 + $0xf8] sm:$0xf0]  ;;  %v843_v2 = vld [vmem:[%s8055_s29 + $0x30] sm:$0xff]  ;;  %v5909_v4 = vor.u32 %v7178_v58, %v5906_v59  ;;  %v7205_v17 = vld [vmem:[%s9937_s25 + $0x64] sm:$0xf]  ;;  %s9945_s7 = sld [smem:[#allocation29_spill]] }
  0x48   : > { %v840_v1 = vld [vmem:[%s8055_s29 + $0x18] sm:$0xff]  ;;  %v847_v5 = vld [vmem:[%s8055_s29 + $0x50] sm:$0xff]  ;;  %v6117_v7 = vor.u32 %v7223_v61, %v6114_v62  ;;  %v6042_v18 = vld [vmem:[%s9937_s25 + $0x68] sm:$0xf0]  ;;  %s9946_s12 = sld [smem:[#allocation28_spill]] }
  0x49   : > { %5958 = vmatmul.msk.bf16.vlgmr.msra.gmra.mxu0 %vm981_vm0, %v8065_v30  ;;  %5960 = vmatmul.msk.bf16.vlgmr.msra.gmra.mxu1 %vm981_vm0, %v8067_v31  ;;  %v844_v3 = vld [vmem:[%s8055_s29 + $0x38] sm:$0xff]  ;;  %v851_v8 = vld [vmem:[%s8055_s29 + $0x70] sm:$0xff]  ;;  %v854_v10 = vpack.c.bf16 %v840_v1, %v839_v63  ;;  %v7221_v19 = vld [vmem:[%s9937_s25 + $0xe4] sm:$0xf]  ;;  %v6045_v20 = vor.u32 %v7205_v17, %v6042_v18 }
  0x4a   : > { %1059 = vmatpush.bf16.msrb.mxu1 %v5949_v22  ;;  %5962 = vmatmul.msk.bf16.vlgmr.msra.gmra.mxu2 %vm981_vm0, %v8069_v34  ;;  %v848_v6 = vld [vmem:[%s8055_s29 + $0x58] sm:$0xff]  ;;  %v8101_v11 = vpack.c.bf16 %v844_v3, %v843_v2  ;;  %v6112_v14 = vld [vmem:[%s9937_s25 + $0xf0] sm:$0xf]  ;;  %v6106_v21 = vld [vmem:[%s9937_s25 + $0xe8] sm:$0xf0] }
  0x4b   : > { %1108 = vmatpush.bf16.msrb.mxu2 %v5953_v29  ;;  %1157 = vmatpush.bf16.msrb.mxu3 %v5957_v35  ;;  %v852_v9 = vld [vmem:[%s8055_s29 + $0x78] sm:$0xff]  ;;  %v8103_v12 = vpack.c.bf16 %v848_v6, %v847_v5  ;;  %v6113_v16 = vor.u32 %v7224_v15, %v6112_v14  ;;  %v6109_v22 = vor.u32 %v7221_v19, %v6106_v21  ;;  %v6104_v23 = vld [vmem:[%s9937_s25 + $0xe0] sm:$0xf]  ;;  %v7222_v24 = vld [vmem:[%s9937_s25 + $0xe4] sm:$0xf0]  ;;  %s9943_s29 = sld [smem:[#allocation26_spill]] }
  0x4c   : > { %5964 = vmatmul.msk.bf16.vlgmr.msra.gmra.mxu3 %vm981_vm0, %v8071_v36  ;;  %v8105_v13 = vpack.c.bf16 %v852_v9, %v851_v8  ;;  %v6105_v25 = vor.u32 %v7222_v24, %v6104_v23  ;;  %v7203_v26 = vld [vmem:[%s9937_s25 + $0x54] sm:$0xf]  ;;  %v6034_v27 = vld [vmem:[%s9937_s25 + $0x58] sm:$0xf0]  ;;  %v6096_v33 = vld [vmem:[%s9937_s25 + $0xd0] sm:$0xf] }
  0x4d   : > { %v7219_v28 = vld [vmem:[%s9937_s25 + $0xd4] sm:$0xf]  ;;  %v6037_v29 = vor.u32 %v7203_v26, %v6034_v27  ;;  %v6098_v32 = vld [vmem:[%s9937_s25 + $0xd8] sm:$0xf0]  ;;  %v7220_v35 = vld [vmem:[%s9937_s25 + $0xd4] sm:$0xf0]  ;;  %s9790_s3 = scalar_lea.vmem %s9945_s7, %s7176_s20 }
  0x4e   : > { %1060 = vmatpush.bf16.msrb.mxu1 %v5933_v37  ;;  %v6097_v37 = vor.u32 %v7220_v35, %v6096_v33  ;;  %v7201_v38 = vld [vmem:[%s9937_s25 + $0x44] sm:$0xf]  ;;  %v6026_v39 = vld [vmem:[%s9937_s25 + $0x48] sm:$0xf0]  ;;  %v6088_v44 = vld [vmem:[%s9937_s25 + $0xc0] sm:$0xf] }
  0x4f   : > { %1109 = vmatpush.bf16.msrb.mxu2 %v5937_v42  ;;  %1158 = vmatpush.bf16.msrb.mxu3 %v5941_v45  ;;  %v7217_v40 = vld [vmem:[%s9937_s25 + $0xc4] sm:$0xf]  ;;  %v6029_v41 = vor.u32 %v7201_v38, %v6026_v39  ;;  %v6090_v42 = vld [vmem:[%s9937_s25 + $0xc8] sm:$0xf0]  ;;  %v7218_v45 = vld [vmem:[%s9937_s25 + $0xc4] sm:$0xf0] }
  0x50   : > { %v6093_v43 = vor.u32 %v7217_v40, %v6090_v42  ;;  %v7199_v47 = vld [vmem:[%s9937_s25 + $0x34] sm:$0xf]  ;;  %v6018_v48 = vld [vmem:[%s9937_s25 + $0x38] sm:$0xf0]  ;;  %v7208_v52 = vld [vmem:[%s9937_s25 + $0x74] sm:$0xf0] }
  0x51   : > { %v7215_v49 = vld [vmem:[%s9937_s25 + $0xb4] sm:$0xf]  ;;  %v6021_v50 = vor.u32 %v7199_v47, %v6018_v48  ;;  %v6040_v55 = vld [vmem:[%s9937_s25 + $0x60] sm:$0xf]  ;;  %v7206_v56 = vld [vmem:[%s9937_s25 + $0x64] sm:$0xf0] }
  0x52   : > { %1061 = vmatpush.bf16.msrb.mxu1 %v5917_v46  ;;  %v6089_v46 = vor.u32 %v7218_v45, %v6088_v44  ;;  %v6080_v58 = vld [vmem:[%s9937_s25 + $0xb0] sm:$0xf]  ;;  %v7216_v59 = vld [vmem:[%s9937_s25 + $0xb4] sm:$0xf0]  ;;  %v6024_v63 = vld [vmem:[%s9937_s25 + $0x40] sm:$0xf] }
  0x53   : > { %1110 = vmatpush.bf16.msrb.mxu2 %v5921_v51  ;;  %1159 = vmatpush.bf16.msrb.mxu3 %v5925_v54  ;;  %v6082_v51 = vld [vmem:[%s9937_s25 + $0xb8] sm:$0xf0]  ;;  %v6032_v61 = vld [vmem:[%s9937_s25 + $0x50] sm:$0xf]  ;;  %v7204_v62 = vld [vmem:[%s9937_s25 + $0x54] sm:$0xf0] }
  0x54   : > { %v6085_v53 = vor.u32 %v7215_v49, %v6082_v51  ;;  %v7202_v1 = vld [vmem:[%s9937_s25 + $0x44] sm:$0xf0]  ;;  %v7197_v2 = vld [vmem:[%s9937_s25 + $0x24] sm:$0xf]  ;;  %v6010_v3 = vld [vmem:[%s9937_s25 + $0x28] sm:$0xf0] }
  0x55   : > { %v7213_v5 = vld [vmem:[%s9937_s25 + $0xa4] sm:$0xf]  ;;  %v6074_v6 = vld [vmem:[%s9937_s25 + $0xa8] sm:$0xf0]  ;;  %v6025_v8 = vor.u32 %v7202_v1, %v6024_v63  ;;  %v6016_v9 = vld [vmem:[%s9937_s25 + $0x30] sm:$0xf] }
  0x56   : > { %1062 = vmatpush.bf16.msrb.mxu1 %v5901_v57  ;;  %v6041_v57 = vor.u32 %v7206_v56, %v6040_v55  ;;  %v6008_v14 = vld [vmem:[%s9937_s25 + $0x20] sm:$0xf]  ;;  %v7198_v15 = vld [vmem:[%s9937_s25 + $0x24] sm:$0xf0]  ;;  %v7196_v21 = vld [vmem:[%s9937_s25 + $0x14] sm:$0xf0] }
  0x57   : > { %1111 = vmatpush.bf16.msrb.mxu2 %v5905_v60  ;;  %1160 = vmatpush.bf16.msrb.mxu3 %v5909_v4  ;;  %v6081_v60 = vor.u32 %v7216_v59, %v6080_v58  ;;  %v6013_v4 = vor.u32 %v7197_v2, %v6010_v3  ;;  %v6072_v17 = vld [vmem:[%s9937_s25 + $0xa0] sm:$0xf]  ;;  %v7214_v18 = vld [vmem:[%s9937_s25 + $0xa4] sm:$0xf0]  ;;  %v6002_v26 = vld [vmem:[%s9937_s25 + $0x18] sm:$0xf0] }
  0x58   : > { %v6073_v19 = vor.u32 %v7214_v18, %v6072_v17  ;;  %v5992_v23 = vld [vmem:[%s9937_s25] sm:$0xf]  ;;  %v7212_v33 = vld [vmem:[%s9937_s25 + $0x94] sm:$0xf0]  ;;  %v5994_v38 = vld [vmem:[%s9937_s25 + $0x8] sm:$0xf0] }
  0x59   : > { %5959 = vmatmul.msk.bf16.gmra.mxu0 %vm981_vm0, %v854_v10  ;;  %5961 = vmatmul.msk.bf16.gmra.mxu1 %vm981_vm0, %v8101_v11  ;;  %v7210_v47 = vld [vmem:[%s9937_s25 + $0x84] sm:$0xf0] }
  0x5a   : > { %5963 = vmatmul.msk.bf16.gmra.mxu2 %vm981_vm0, %v8103_v12  ;;  %1535 = vmatpush.bf16.msra.mxu1 %v6113_v16  ;;  %v6009_v16 = vor.u32 %v7198_v15, %v6008_v14  ;;  %v6178_v15 = vld [vmem:[%s9939_s1 + $0x78] sm:$0xf0] }
  0x5b   : > { %1584 = vmatpush.bf16.msra.mxu2 %v6053_v0  ;;  %1633 = vmatpush.bf16.msra.mxu3 %v6117_v7  ;;  %v6033_v0 = vor.u32 %v7204_v62, %v6032_v61  ;;  %v6077_v7 = vor.u32 %v7213_v5, %v6074_v6 }
  0x5c   : > { %5965 = vmatmul.msk.bf16.gmra.mxu3 %vm981_vm0, %v8105_v13 }
  0x5e   : > { %1536 = vmatpush.bf16.msra.mxu1 %v6105_v25  ;;  %v7195_v25 = vld [vmem:[%s9937_s25 + $0x14] sm:$0xf] }
  0x5f   : > { %1585 = vmatpush.bf16.msra.mxu2 %v6045_v20  ;;  %1634 = vmatpush.bf16.msra.mxu3 %v6109_v22  ;;  %v6000_v20 = vld [vmem:[%s9937_s25 + $0x10] sm:$0xf]  ;;  %v6005_v27 = vor.u32 %v7195_v25, %v6002_v26  ;;  %v7240_v25 = vld [vmem:[%s9939_s1 + $0x74] sm:$0xf0] }
  0x60   : > { %v6001_v22 = vor.u32 %v7196_v21, %v6000_v20  ;;  %v7255_v21 = vld [vmem:[%s9939_s1 + $0xf4] sm:$0xf] }
  0x62   : > { %1537 = vmatpush.bf16.msra.mxu1 %v6097_v37  ;;  %v7193_v37 = vld [vmem:[%s9937_s25 + $0x4] sm:$0xf] }
  0x63   : > { %1586 = vmatpush.bf16.msra.mxu2 %v6037_v29  ;;  %v6066_v29 = vld [vmem:[%s9937_s25 + $0x98] sm:$0xf0]  ;;  %v5997_v39 = vor.u32 %v7193_v37, %v5994_v38 }
  0x66   : > { %1538 = vmatpush.bf16.msra.mxu1 %v6089_v46  ;;  %v6056_v46 = vld [vmem:[%s9937_s25 + $0x80] sm:$0xf] }
  0x67   : > { %1587 = vmatpush.bf16.msra.mxu2 %v6029_v41  ;;  %v1202_v41 = vld [vmem:[%s9938_s28] sm:$0x3]  ;;  %v6057_v49 = vor.u32 %v7210_v47, %v6056_v46 }
  0x68   : > { %v8326_v44 = vperm.slane %v1202_v41, 0  ;;  %v8374_v20 = vperm.slane %v1202_v41, 1 }
  0x69   : > { %5966 = vmatmul.msk.bf16.vlgmr.msrb.gmra.mxu1 %vm981_vm0, %v8065_v30 }
  0x6a   : > { %5974 = vmatmul.msk.bf16.vlgmr.msrb.gmra.mxu2 %vm981_vm0, %v8065_v30  ;;  %1539 = vmatpush.bf16.msra.mxu1 %v6081_v60 }
  0x6b   : > { %1588 = vmatpush.bf16.msra.mxu2 %v6021_v50 }
  0x6c   : > { %5982 = vmatmul.msk.bf16.vlgmr.msrb.gmra.mxu3 %vm981_vm0, %v8065_v30  ;;  %v6101_v30 = vor.u32 %v7219_v28, %v6098_v32  ;;  %v7211_v28 = vld [vmem:[%s9937_s25 + $0x94] sm:$0xf] }
  0x6d   : > { %v6069_v32 = vor.u32 %v7211_v28, %v6066_v29  ;;  %v6240_v28 = vld [vmem:[%s9939_s1 + $0xf0] sm:$0xf]  ;;  %v7256_v29 = vld [vmem:[%s9939_s1 + $0xf4] sm:$0xf0] }
  0x6e   : > { %1635 = vmatpush.bf16.msra.mxu3 %v6101_v30  ;;  %1540 = vmatpush.bf16.msra.mxu1 %v6073_v19  ;;  %v6064_v30 = vld [vmem:[%s9937_s25 + $0x90] sm:$0xf] }
  0x6f   : > { %1589 = vmatpush.bf16.msra.mxu2 %v6013_v4  ;;  %v6065_v35 = vor.u32 %v7212_v33, %v6064_v30 }
  0x72   : > { %1636 = vmatpush.bf16.msra.mxu3 %v6093_v43  ;;  %1541 = vmatpush.bf16.msra.mxu1 %v6065_v35  ;;  %v6058_v43 = vld [vmem:[%s9937_s25 + $0x88] sm:$0xf0] }
  0x73   : > { %1590 = vmatpush.bf16.msra.mxu2 %v6005_v27 }
  0x76   : > { %1637 = vmatpush.bf16.msra.mxu3 %v6085_v53  ;;  %1542 = vmatpush.bf16.msra.mxu1 %v6057_v49  ;;  %v7237_v49 = vld [vmem:[%s9939_s1 + $0x64] sm:$0xf] }
  0x77   : > { %1591 = vmatpush.bf16.msra.mxu2 %v5997_v39 }
  0x79   : > { %5967 = vmatmul.msk.bf16.gmra.mxu1 %vm981_vm0, %v854_v10 }
  0x7a   : > { %5975 = vmatmul.msk.bf16.gmra.mxu2 %vm981_vm0, %v854_v10  ;;  %1638 = vmatpush.bf16.msra.mxu3 %v6077_v7 }
  0x7c   : > { %5983 = vmatmul.msk.bf16.gmra.mxu3 %vm981_vm0, %v854_v10  ;;  %v7200_v10 = vld [vmem:[%s9937_s25 + $0x34] sm:$0xf0] }
  0x7e   : > { %1639 = vmatpush.bf16.msra.mxu3 %v6069_v32  ;;  %v6241_v32 = vor.u32 %v7256_v29, %v6240_v28 }
  0x80   : > { %1977 = vmatpush.bf16.msrb.mxu1 %v6241_v32  ;;  %v7252_v32 = vld [vmem:[%s9939_s1 + $0xd4] sm:$0xf0] }
  0x89   : > { %5968 = vmatmul.msk.bf16.gmra.mxu1 %vm981_vm0, %v8067_v31 }
  0x8a   : > { %5976 = vmatmul.msk.bf16.gmra.mxu2 %vm981_vm0, %v8067_v31 }
  0x8c   : > { %5984 = vmatmul.msk.bf16.gmra.mxu3 %vm981_vm0, %v8067_v31  ;;  %v6048_v31 = vld [vmem:[%s9937_s25 + $0x70] sm:$0xf] }
  0x8d   : > { %v6049_v54 = vor.u32 %v7208_v52, %v6048_v31 }
  0x8f   : > { %1486 = vmatpush.bf16.msrb.mxu0 %v6049_v54 }
  0x93   : > { %1487 = vmatpush.bf16.msrb.mxu0 %v6041_v57 }
  0x97   : > { %1488 = vmatpush.bf16.msrb.mxu0 %v6033_v0 }
  0x99   : > { %5969 = vmatmul.msk.bf16.gmra.mxu1 %vm981_vm0, %v8101_v11 }
  0x9a   : > { %5977 = vmatmul.msk.bf16.gmra.mxu2 %vm981_vm0, %v8101_v11 }
  0x9b   : > { %1489 = vmatpush.bf16.msrb.mxu0 %v6025_v8 }
  0x9c   : > { %5985 = vmatmul.msk.bf16.gmra.mxu3 %vm981_vm0, %v8101_v11  ;;  %v6017_v11 = vor.u32 %v7200_v10, %v6016_v9 }
  0x9f   : > { %1490 = vmatpush.bf16.msrb.mxu0 %v6017_v11 }
  0xa3   : > { %1491 = vmatpush.bf16.msrb.mxu0 %v6009_v16 }
  0xa7   : > { %1492 = vmatpush.bf16.msrb.mxu0 %v6001_v22  ;;  %v6242_v22 = vld [vmem:[%s9939_s1 + $0xf8] sm:$0xf0] }
  0xa9   : > { %5970 = vmatmul.msk.bf16.gmra.mxu1 %vm981_vm0, %v8069_v34 }
  0xaa   : > { %5978 = vmatmul.msk.bf16.gmra.mxu2 %vm981_vm0, %v8069_v34 }
  0xac   : > { %5986 = vmatmul.msk.bf16.gmra.mxu3 %vm981_vm0, %v8069_v34  ;;  %v7194_v34 = vld [vmem:[%s9937_s25 + $0x4] sm:$0xf0] }
  0xad   : > { %v5993_v24 = vor.u32 %v7194_v34, %v5992_v23  ;;  %v6245_v34 = vor.u32 %v7255_v21, %v6242_v22  ;;  %v7251_v22 = vld [vmem:[%s9939_s1 + $0xd4] sm:$0xf] }
  0xaf   : > { %1493 = vmatpush.bf16.msrb.mxu0 %v5993_v24  ;;  %v6176_v24 = vld [vmem:[%s9939_s1 + $0x70] sm:$0xf] }
  0xb0   : > { %v6177_v27 = vor.u32 %v7240_v25, %v6176_v24  ;;  %v6160_v24 = vld [vmem:[%s9939_s1 + $0x50] sm:$0xf]  ;;  %v7236_v25 = vld [vmem:[%s9939_s1 + $0x54] sm:$0xf0] }
  0xb1   : > { %v6161_v29 = vor.u32 %v7236_v25, %v6160_v24  ;;  %v7247_v24 = vld [vmem:[%s9939_s1 + $0xb4] sm:$0xf]  ;;  %v6210_v25 = vld [vmem:[%s9939_s1 + $0xb8] sm:$0xf0] }
  0xb3   : > { %1928 = vmatpush.bf16.msra.mxu0 %v6177_v27 }
  0xb9   : > { %5971 = vmatmul.msk.bf16.gmra.mxu1 %vm981_vm0, %v8103_v12 }
  0xba   : > { %5979 = vmatmul.msk.bf16.gmra.mxu2 %vm981_vm0, %v8103_v12 }
  0xbc   : > { %5987 = vmatmul.msk.bf16.gmra.mxu3 %vm981_vm0, %v8103_v12  ;;  %v7209_v12 = vld [vmem:[%s9937_s25 + $0x84] sm:$0xf] }
  0xbd   : > { %v6061_v45 = vor.u32 %v7209_v12, %v6058_v43 }
  0xbf   : > { %1640 = vmatpush.bf16.msra.mxu3 %v6061_v45 }
  0xc3   : > { %2075 = vmatpush.bf16.msrb.mxu3 %v6245_v34 }
  0xc6   : > { %v1015_v40 = vpop.f32.mrf.mxu0  ;;  %v8318_v42 = vpop.f32.mrf.mxu1 }
  0xc7   : > { %v1208_v48 = vadd.f32 %v8326_v44, %v1015_v40  ;;  %v1216_v33 = vadd.f32 %v8326_v44, %v8318_v42 }
  0xc9   : > { %5972 = vmatmul.msk.bf16.gmra.mxu1 %vm981_vm0, %v8071_v36  ;;  %v1240_v52 = vmax.f32 %v1208_v48, 0.0  ;;  %v1248_v12 = vmax.f32 %v1216_v33, 0.0 }
  0xca   : > { %5980 = vmatmul.msk.bf16.gmra.mxu2 %vm981_vm0, %v8071_v36 }
  0xcc   : > { %5988 = vmatmul.msk.bf16.gmra.mxu3 %vm981_vm0, %v8071_v36 }
  0xcd   : > { %v8341_v50 = vpop.f32.mrf.mxu2 }
  0xce   : > { %v1017_v51 = vpop.f32.mrf.mxu0  ;;  %v1027_v31 = vpop.f32.mrf.mxu1  ;;  %v1224_v27 = vadd.f32 %v8326_v44, %v8341_v50 }
  0xcf   : > { %v1210_v53 = vadd.f32 %v8326_v44, %v1017_v51  ;;  %v1045_v54 = vpop.f32.mrf.mxu3  ;;  %v1218_v26 = vadd.f32 %v8326_v44, %v1027_v31  ;;  %v6170_v51 = vld [vmem:[%s9939_s1 + $0x68] sm:$0xf0] }
  0xd0   : > { %v1232_v55 = vadd.f32 %v8326_v44, %v1045_v54  ;;  %v6234_v54 = vld [vmem:[%s9939_s1 + $0xe8] sm:$0xf0] }
  0xd1   : > { %v1242_v56 = vmax.f32 %v1210_v53, 0.0  ;;  %v1250_v39 = vmax.f32 %v1218_v26, 0.0  ;;  %v7253_v53 = vld [vmem:[%s9939_s1 + $0xe4] sm:$0xf]  ;;  %v6224_v26 = vld [vmem:[%s9939_s1 + $0xd0] sm:$0xf] }
  0xd2   : > { %v1264_v61 = vmax.f32 %v1232_v55, 0.0  ;;  %v6237_v55 = vor.u32 %v7253_v53, %v6234_v54  ;;  %v6225_v33 = vor.u32 %v7252_v32, %v6224_v26  ;;  %v6213_v26 = vor.u32 %v7247_v24, %v6210_v25  ;;  %v6194_v25 = vld [vmem:[%s9939_s1 + $0x98] sm:$0xf0] }
  0xd3   : > { %v1272_v57 = vpack.c.bf16 %v1242_v56, %v1240_v52  ;;  %v1276_v47 = vpack.c.bf16 %v1250_v39, %v1248_v12  ;;  %v6173_v52 = vor.u32 %v7237_v49, %v6170_v51  ;;  %v6168_v56 = vld [vmem:[%s9939_s1 + $0x60] sm:$0xf]  ;;  %v7233_v51 = vld [vmem:[%s9939_s1 + $0x44] sm:$0xf] }
  0xd4   : > { %2076 = vmatpush.bf16.msrb.mxu3 %v6237_v55  ;;  %v7249_v55 = vld [vmem:[%s9939_s1 + $0xc4] sm:$0xf] }
  0xd5   : > { %v8345_v58 = vpop.f32.mrf.mxu2  ;;  %1494 = vmatmul.bf16.vlgmr.msrb.gmra.mxu0 %v1272_v57 }
  0xd6   : > { %v1020_v59 = vpop.f32.mrf.mxu0  ;;  %v8347_v36 = vpop.f32.mrf.mxu1  ;;  %v1226_v28 = vadd.f32 %v8326_v44, %v8345_v58 }
  0xd7   : > { %v1047_v60 = vpop.f32.mrf.mxu3  ;;  %v1212_v0 = vadd.f32 %v8326_v44, %v1020_v59  ;;  %v6232_v59 = vld [vmem:[%s9939_s1 + $0xe0] sm:$0xf] }
  0xd8   : > { %v1234_v62 = vadd.f32 %v8326_v44, %v1047_v60  ;;  %v1258_v12 = vmax.f32 %v1226_v28, 0.0  ;;  %v7232_v28 = vld [vmem:[%s9939_s1 + $0x34] sm:$0xf0] }
  0xd9   : > { %5973 = vmatmul.msk.bf16.gmra.mxu1 %vm981_vm0, %v8105_v13  ;;  %v1244_v5 = vmax.f32 %v1212_v0, 0.0  ;;  %v1220_v0 = vadd.f32 %v8326_v44, %v8347_v36 }
  0xda   : > { %v1266_v63 = vmax.f32 %v1234_v62, 0.0  ;;  %5981 = vmatmul.msk.bf16.gmra.mxu2 %vm981_vm0, %v8105_v13  ;;  %v7254_v62 = vld [vmem:[%s9939_s1 + $0xe4] sm:$0xf0] }
  0xdc   : > { %5989 = vmatmul.msk.bf16.gmra.mxu3 %vm981_vm0, %v8105_v13  ;;  %v8357_v1 = vpack.c.bf16 %v1266_v63, %v1264_v61  ;;  %v7239_v13 = vld [vmem:[%s9939_s1 + $0x74] sm:$0xf]  ;;  %v6233_v63 = vor.u32 %v7254_v62, %v6232_v59  ;;  %v6152_v59 = vld [vmem:[%s9939_s1 + $0x40] sm:$0xf] }
  0xdd   : > { %v8359_v2 = vpop.f32.mrf.mxu2  ;;  %v6181_v17 = vor.u32 %v7239_v13, %v6178_v15 }
  0xde   : > { %v1022_v3 = vpop.f32.mrf.mxu0  ;;  %v8361_v4 = vpop.f32.mrf.mxu1  ;;  %1978 = vmatpush.bf16.msrb.mxu1 %v6233_v63  ;;  %v1228_v62 = vadd.f32 %v8326_v44, %v8359_v2 }
  0xdf   : > { %v1214_v6 = vadd.f32 %v8326_v44, %v1022_v3  ;;  %v1050_v7 = vpop.f32.mrf.mxu3  ;;  %2026 = vmatpush.bf16.msrb.mxu2 %v6181_v17  ;;  %v1222_v60 = vadd.f32 %v8326_v44, %v8361_v4  ;;  %v7235_v17 = vld [vmem:[%s9939_s1 + $0x54] sm:$0xf] }
  0xe0   : > { %v1236_v8 = vadd.f32 %v8326_v44, %v1050_v7 }
  0xe1   : > { %v1246_v9 = vmax.f32 %v1214_v6, 0.0  ;;  %v1254_v7 = vmax.f32 %v1222_v60, 0.0  ;;  %v7234_v60 = vld [vmem:[%s9939_s1 + $0x44] sm:$0xf0] }
  0xe2   : > { %v1268_v18 = vmax.f32 %v1236_v8, 0.0  ;;  %1979 = vmatpush.bf16.msrb.mxu1 %v6225_v33  ;;  %v7248_v33 = vld [vmem:[%s9939_s1 + $0xb4] sm:$0xf0] }
  0xe3   : > { %v1274_v10 = vpack.c.bf16 %v1246_v9, %v1244_v5  ;;  %2027 = vmatpush.bf16.msrb.mxu2 %v6173_v52  ;;  %v1252_v9 = vmax.f32 %v1220_v0, 0.0  ;;  %v6154_v52 = vld [vmem:[%s9939_s1 + $0x48] sm:$0xf0]  ;;  %v6153_v0 = vor.u32 %v7234_v60, %v6152_v59 }
  0xe4   : > { %v6157_v54 = vor.u32 %v7233_v51, %v6154_v52  ;;  %v7229_v52 = vld [vmem:[%s9939_s1 + $0x24] sm:$0xf]  ;;  %v6202_v59 = vld [vmem:[%s9939_s1 + $0xa8] sm:$0xf0] }
  0xe5   : > { %v8365_v11 = vpop.f32.mrf.mxu2  ;;  %1499 = vmatmul.bf16.gmra.mxu0 %v1274_v10  ;;  %v1278_v13 = vpack.c.bf16 %v1254_v7, %v1252_v9 }
  0xe6   : > { %v1064_v14 = vpop.f32.mrf.mxu1  ;;  %v1230_v63 = vadd.f32 %v8326_v44, %v8365_v11 }
  0xe7   : > { %v1052_v16 = vpop.f32.mrf.mxu3  ;;  %v1209_v35 = vadd.f32 %v8374_v20, %v1064_v14 }
  0xe8   : > { %v1238_v19 = vadd.f32 %v8326_v44, %v1052_v16 }
  0xe9   : > { %v1241_v43 = vmax.f32 %v1209_v35, 0.0 }
  0xea   : > { %v1270_v23 = vmax.f32 %v1238_v19, 0.0  ;;  %1592 = vmatmul.bf16.vlgmr.msra.gmra.mxu2 %v1272_v57  ;;  %v7238_v57 = vld [vmem:[%s9939_s1 + $0x64] sm:$0xf0] }
  0xeb   : > { %v6169_v61 = vor.u32 %v7238_v57, %v6168_v56  ;;  %v6218_v56 = vld [vmem:[%s9939_s1 + $0xc8] sm:$0xf0] }
  0xec   : > { %v8395_v30 = vpack.c.bf16 %v1270_v23, %v1268_v18  ;;  %v6162_v18 = vld [vmem:[%s9939_s1 + $0x58] sm:$0xf0]  ;;  %v6221_v57 = vor.u32 %v7249_v55, %v6218_v56 }
  0xed   : > { %v8400_v37 = vpop.f32.mrf.mxu2  ;;  %1929 = vmatpush.bf16.msra.mxu0 %v6169_v61  ;;  %v6165_v21 = vor.u32 %v7235_v17, %v6162_v18  ;;  %v6226_v23 = vld [vmem:[%s9939_s1 + $0xd8] sm:$0xf0]  ;;  %v6216_v61 = vld [vmem:[%s9939_s1 + $0xc0] sm:$0xf] }
  0xee   : > { %v1066_v38 = vpop.f32.mrf.mxu1  ;;  %v6229_v34 = vor.u32 %v7251_v22, %v6226_v23  ;;  %v6146_v22 = vld [vmem:[%s9939_s1 + $0x38] sm:$0xf0] }
  0xef   : > { %v1211_v40 = vadd.f32 %v8374_v20, %v1066_v38  ;;  %v8403_v41 = vpop.f32.mrf.mxu3  ;;  %2028 = vmatpush.bf16.msrb.mxu2 %v6165_v21  ;;  %v7231_v21 = vld [vmem:[%s9939_s1 + $0x34] sm:$0xf] }
  0xf0   : > { %2077 = vmatpush.bf16.msrb.mxu3 %v6229_v34  ;;  %v6149_v34 = vor.u32 %v7231_v21, %v6146_v22  ;;  %v7227_v21 = vld [vmem:[%s9939_s1 + $0x14] sm:$0xf]  ;;  %v6130_v22 = vld [vmem:[%s9939_s1 + $0x18] sm:$0xf0] }
  0xf1   : > { %v1243_v45 = vmax.f32 %v1211_v40, 0.0  ;;  %1930 = vmatpush.bf16.msra.mxu0 %v6161_v29  ;;  %v1256_v40 = vmax.f32 %v1224_v27, 0.0  ;;  %v6144_v27 = vld [vmem:[%s9939_s1 + $0x30] sm:$0xf]  ;;  %v6133_v24 = vor.u32 %v7227_v21, %v6130_v22  ;;  %v7242_v21 = vld [vmem:[%s9939_s1 + $0x84] sm:$0xf0] }
  0xf2   : > { %v6208_v29 = vld [vmem:[%s9939_s1 + $0xb0] sm:$0xf]  ;;  %v6145_v32 = vor.u32 %v7232_v28, %v6144_v27  ;;  %v7228_v27 = vld [vmem:[%s9939_s1 + $0x14] sm:$0xf0] }
  0xf3   : > { %v1273_v46 = vpack.c.bf16 %v1243_v45, %v1241_v43  ;;  %2029 = vmatpush.bf16.msrb.mxu2 %v6157_v54  ;;  %v6138_v54 = vld [vmem:[%s9939_s1 + $0x28] sm:$0xf0] }
  0xf4   : > { %2078 = vmatpush.bf16.msrb.mxu3 %v6221_v57  ;;  %v6141_v56 = vor.u32 %v7229_v52, %v6138_v54  ;;  %v7245_v57 = vld [vmem:[%s9939_s1 + $0xa4] sm:$0xf] }
  0xf5   : > { %v8405_v48 = vpop.f32.mrf.mxu2  ;;  %1504 = vmatmul.bf16.gmra.mxu0 %v1276_v47  ;;  %1543 = vmatmul.bf16.vlgmr.msra.gmra.mxu1 %v1273_v46  ;;  %v6205_v60 = vor.u32 %v7245_v57, %v6202_v59  ;;  %v7225_v59 = vld [vmem:[%s9939_s1 + $0x4] sm:$0xf] }
  0xf6   : > { %1641 = vmatmul.bf16.vlgmr.msra.gmra.mxu3 %v1273_v46  ;;  %v1069_v42 = vpop.f32.mrf.mxu1  ;;  %v1280_v46 = vpack.c.bf16 %v1258_v12, %v1256_v40  ;;  %1931 = vmatpush.bf16.msra.mxu0 %v6153_v0  ;;  %v6200_v0 = vld [vmem:[%s9939_s1 + $0xa0] sm:$0xf] }
  0xf7   : > { %v8413_v31 = vpop.f32.mrf.mxu3  ;;  %v1213_v3 = vadd.f32 %v8374_v20, %v1069_v42  ;;  %2030 = vmatpush.bf16.msrb.mxu2 %v6149_v34  ;;  %v7243_v34 = vld [vmem:[%s9939_s1 + $0x94] sm:$0xf] }
  0xf8   : > { %2079 = vmatpush.bf16.msrb.mxu3 %v6213_v26  ;;  %v6128_v26 = vld [vmem:[%s9939_s1 + $0x10] sm:$0xf]  ;;  %v6197_v28 = vor.u32 %v7243_v34, %v6194_v25 }
  0xfa   : > { %1597 = vmatmul.bf16.gmra.mxu2 %v1274_v10  ;;  %v1245_v10 = vmax.f32 %v1213_v3, 0.0  ;;  %v7250_v3 = vld [vmem:[%s9939_s1 + $0xc4] sm:$0xf0]  ;;  %1932 = vmatpush.bf16.msra.mxu0 %v6145_v32 }
  0xfb   : > { %2031 = vmatpush.bf16.msrb.mxu2 %v6141_v56 }
  0xfc   : > { %2080 = vmatpush.bf16.msrb.mxu3 %v6205_v60  ;;  %v6122_v60 = vld [vmem:[%s9939_s1 + $0x8] sm:$0xf0] }
  0xfd   : > { %v8438_v5 = vpop.f32.mrf.mxu2 }
  0xfe   : > { %v1071_v6 = vpop.f32.mrf.mxu1 }
  0xff   : > { %v1215_v4 = vadd.f32 %v8374_v20, %v1071_v6  ;;  %v8441_v8 = vpop.f32.mrf.mxu3  ;;  %v6217_v6 = vor.u32 %v7250_v3, %v6216_v61  ;;  %v6136_v61 = vld [vmem:[%s9939_s1 + $0x20] sm:$0xf]  ;;  %v7246_v3 = vld [vmem:[%s9939_s1 + $0xa4] sm:$0xf0]  ;;  %2032 = vmatpush.bf16.msrb.mxu2 %v6133_v24 }
 0x100   : > { %2081 = vmatpush.bf16.msrb.mxu3 %v6197_v28 }
 0x101   : > { %v1247_v14 = vmax.f32 %v1215_v4, 0.0  ;;  %1980 = vmatpush.bf16.msrb.mxu1 %v6217_v6  ;;  %v6201_v6 = vor.u32 %v7246_v3, %v6200_v0 }
 0x103   : > { %v1275_v15 = vpack.c.bf16 %v1247_v14, %v1245_v10  ;;  %v1260_v10 = vmax.f32 %v1228_v62, 0.0  ;;  %v1262_v14 = vmax.f32 %v1230_v63, 0.0  ;;  %v7230_v62 = vld [vmem:[%s9939_s1 + $0x24] sm:$0xf0] }
 0x104   : > { %v6137_v63 = vor.u32 %v7230_v62, %v6136_v61  ;;  %v7241_v61 = vld [vmem:[%s9939_s1 + $0x84] sm:$0xf]  ;;  %v6125_v62 = vor.u32 %v7225_v59, %v6122_v60 }
 0x105   : > { %v8443_v16 = vpop.f32.mrf.mxu2  ;;  %1509 = vmatmul.bf16.gmra.mxu0 %v1278_v13  ;;  %1548 = vmatmul.bf16.gmra.mxu1 %v1275_v15 }
 0x106   : > { %1646 = vmatmul.bf16.gmra.mxu3 %v1275_v15  ;;  %v1074_v36 = vpop.f32.mrf.mxu1  ;;  %v1282_v15 = vpack.c.bf16 %v1262_v14, %v1260_v10  ;;  %1933 = vmatpush.bf16.msra.mxu0 %v6137_v63  ;;  %v6186_v63 = vld [vmem:[%s9939_s1 + $0x88] sm:$0xf0] }
 0x107   : > { %v8451_v19 = vpop.f32.mrf.mxu3  ;;  %v1217_v35 = vadd.f32 %v8374_v20, %v1074_v36  ;;  %v6189_v0 = vor.u32 %v7241_v61, %v6186_v63  ;;  %2033 = vmatpush.bf16.msrb.mxu2 %v6125_v62 }
 0x109   : > { %v1249_v58 = vmax.f32 %v1217_v35, 0.0  ;;  %v6209_v35 = vor.u32 %v7248_v33, %v6208_v29  ;;  %v6129_v29 = vor.u32 %v7228_v27, %v6128_v26  ;;  %v6192_v33 = vld [vmem:[%s9939_s1 + $0x90] sm:$0xf]  ;;  %2082 = vmatpush.bf16.msrb.mxu3 %v6189_v0 }
 0x10a   : > { %1602 = vmatmul.bf16.gmra.mxu2 %v1276_v47 }
 0x10b   : > { %1981 = vmatpush.bf16.msrb.mxu1 %v6209_v35  ;;  %1934 = vmatpush.bf16.msra.mxu0 %v6129_v29  ;;  %v7244_v35 = vld [vmem:[%s9939_s1 + $0x94] sm:$0xf0] }
 0x10d   : > { %v8476_v38 = vpop.f32.mrf.mxu2 }
 0x10e   : > { %v1076_v39 = vpop.f32.mrf.mxu1 }
 0x10f   : > { %v1219_v50 = vadd.f32 %v8374_v20, %v1076_v39  ;;  %v8479_v43 = vpop.f32.mrf.mxu3  ;;  %1982 = vmatpush.bf16.msrb.mxu1 %v6201_v6  ;;  %v6120_v6 = vld [vmem:[%s9939_s1] sm:$0xf] }
 0x111   : > { %v1251_v45 = vmax.f32 %v1219_v50, 0.0 }
 0x113   : > { %v1277_v47 = vpack.c.bf16 %v1251_v45, %v1249_v58 }
 0x115   : > { %v8481_v42 = vpop.f32.mrf.mxu2  ;;  %1514 = vmatmul.bf16.gmra.mxu0 %v1280_v46  ;;  %1553 = vmatmul.bf16.gmra.mxu1 %v1277_v47 }
 0x116   : > { %1651 = vmatmul.bf16.gmra.mxu3 %v1277_v47  ;;  %v1079_v49 = vpop.f32.mrf.mxu1 }
 0x117   : > { %v8489_v53 = vpop.f32.mrf.mxu3  ;;  %v1221_v7 = vadd.f32 %v8374_v20, %v1079_v49 }
 0x119   : > { %v1253_v44 = vmax.f32 %v1221_v7, 0.0 }
 0x11a   : > { %1607 = vmatmul.bf16.gmra.mxu2 %v1278_v13 }
 0x11d   : > { %v8514_v4 = vpop.f32.mrf.mxu2 }
 0x11e   : > { %v1081_v9 = vpop.f32.mrf.mxu1 }
 0x11f   : > { %v1223_v2 = vadd.f32 %v8374_v20, %v1081_v9  ;;  %v8517_v13 = vpop.f32.mrf.mxu3 }
 0x121   : > { %v1255_v11 = vmax.f32 %v1223_v2, 0.0 }
 0x123   : > { %v1279_v36 = vpack.c.bf16 %v1255_v11, %v1253_v44 }
 0x125   : > { %v8519_v17 = vpop.f32.mrf.mxu2  ;;  %1519 = vmatmul.bf16.gmra.mxu0 %v1282_v15  ;;  %1558 = vmatmul.bf16.gmra.mxu1 %v1279_v36 }
 0x126   : > { %1656 = vmatmul.bf16.gmra.mxu3 %v1279_v36  ;;  %v1084_v18 = vpop.f32.mrf.mxu1 }
 0x127   : > { %v8527_v23 = vpop.f32.mrf.mxu3  ;;  %v1225_v39 = vadd.f32 %v8374_v20, %v1084_v18 }
 0x129   : > { %v1257_v45 = vmax.f32 %v1225_v39, 0.0  ;;  %v6193_v39 = vor.u32 %v7244_v35, %v6192_v33  ;;  %v1320_v33 = vld [vmem:[%s9940_s26] sm:$0x3] }
 0x12a   : > { %1612 = vmatmul.bf16.gmra.mxu2 %v1280_v46  ;;  %v8678_v62 = vperm.slane %v1320_v33, 1 }
 0x12b   : > { %1983 = vmatpush.bf16.msrb.mxu1 %v6193_v39 }
 0x12d   : > { %v8548_v40 = vpop.f32.mrf.mxu2 }
 0x12e   : > { %v1086_v12 = vpop.f32.mrf.mxu1 }
 0x12f   : > { %v1227_v50 = vadd.f32 %v8374_v20, %v1086_v12  ;;  %v8551_v58 = vpop.f32.mrf.mxu3 }
 0x131   : > { %v1259_v46 = vmax.f32 %v1227_v50, 0.0 }
 0x133   : > { %v1281_v47 = vpack.c.bf16 %v1259_v46, %v1257_v45 }
 0x135   : > { %v8553_v49 = vpop.f32.mrf.mxu2  ;;  %1524 = vmatmul.bf16.gmra.mxu0 %v8357_v1  ;;  %1563 = vmatmul.bf16.gmra.mxu1 %v1281_v47 }
 0x136   : > { %1661 = vmatmul.bf16.gmra.mxu3 %v1281_v47  ;;  %v1089_v51 = vpop.f32.mrf.mxu1 }
 0x137   : > { %v8562_v55 = vpop.f32.mrf.mxu3  ;;  %v1229_v7 = vadd.f32 %v8374_v20, %v1089_v51 }
 0x139   : > { %v1261_v44 = vmax.f32 %v1229_v7, 0.0  ;;  %v7226_v7 = vld [vmem:[%s9939_s1 + $0x4] sm:$0xf0] }
 0x13a   : > { %1617 = vmatmul.bf16.gmra.mxu2 %v1282_v15 }
 0x13d   : > { %v8583_v9 = vpop.f32.mrf.mxu2 }
 0x13e   : > { %v1091_v10 = vpop.f32.mrf.mxu1 }
 0x13f   : > { %v1231_v14 = vadd.f32 %v8374_v20, %v1091_v10  ;;  %v8586_v2 = vpop.f32.mrf.mxu3 }
 0x141   : > { %v1263_v11 = vmax.f32 %v1231_v14, 0.0 }
 0x143   : > { %v1283_v15 = vpack.c.bf16 %v1263_v11, %v1261_v44  ;;  %v6121_v11 = vor.u32 %v7226_v7, %v6120_v6  ;;  %v6370_v6 = vld [vmem:[%s9895_s8 + $0xf8] sm:$0xf0] }
 0x145   : > { %v8588_v36 = vpop.f32.mrf.mxu2  ;;  %1529 = vmatmul.bf16.gmra.mxu0 %v8395_v30  ;;  %1568 = vmatmul.bf16.gmra.mxu1 %v1283_v15 }
 0x146   : > { %1666 = vmatmul.bf16.gmra.mxu3 %v1283_v15  ;;  %v1094_v18 = vpop.f32.mrf.mxu1  ;;  %1935 = vmatpush.bf16.msra.mxu0 %v6121_v11 }
 0x147   : > { %v8609_v32 = vpop.f32.mrf.mxu3  ;;  %v1233_v12 = vadd.f32 %v8374_v20, %v1094_v18  ;;  %v6184_v18 = vld [vmem:[%s9939_s1 + $0x80] sm:$0xf] }
 0x148   : > { %v6185_v22 = vor.u32 %v7242_v21, %v6184_v18 }
 0x14a   : > { %1622 = vmatmul.bf16.gmra.mxu2 %v8357_v1  ;;  %v1265_v1 = vmax.f32 %v1233_v12, 0.0  ;;  %1984 = vmatpush.bf16.msrb.mxu1 %v6185_v22  ;;  %v8666_v12 = vperm.slane %v1320_v33, 0  ;;  %v6368_v22 = vld [vmem:[%s9895_s8 + $0xf0] sm:$0xf] }
 0x14d   : > { %v8619_v50 = vpop.f32.mrf.mxu2 }
 0x14e   : > { %v1096_v45 = vpop.f32.mrf.mxu1 }
 0x14f   : > { %v1235_v46 = vadd.f32 %v8374_v20, %v1096_v45  ;;  %v8622_v52 = vpop.f32.mrf.mxu3 }
 0x151   : > { %v1267_v47 = vmax.f32 %v1235_v46, 0.0 }
 0x152   : > { %v1495_v51 = vpop.f32.mrf.mxu0 }
 0x153   : > { %v1285_v54 = vpack.c.bf16 %v1267_v47, %v1265_v1  ;;  %v1496_v46 = vadd.f32 %v1495_v51, %v8666_v12  ;;  %v7271_v47 = vld [vmem:[%s9895_s8 + $0x74] sm:$0xf] }
 0x154   : > { %v7287_v51 = vld [vmem:[%s9895_s8 + $0xf4] sm:$0xf] }
 0x155   : > { %v8624_v56 = vpop.f32.mrf.mxu2  ;;  %1573 = vmatmul.bf16.gmra.mxu1 %v1285_v54 }
 0x156   : > { %1671 = vmatmul.bf16.gmra.mxu3 %v1285_v54  ;;  %v1099_v57 = vpop.f32.mrf.mxu1  ;;  %v6306_v54 = vld [vmem:[%s9895_s8 + $0x78] sm:$0xf0] }
 0x157   : > { %v1237_v10 = vadd.f32 %v8374_v20, %v1099_v57  ;;  %v8646_v14 = vpop.f32.mrf.mxu3  ;;  %v6309_v61 = vor.u32 %v7271_v47, %v6306_v54 }
 0x159   : > { %v1269_v34 = vmax.f32 %v1237_v10, 0.0  ;;  %2468 = vmatpush.bf16.msra.mxu2 %v6309_v61 }
 0x15a   : > { %1627 = vmatmul.bf16.gmra.mxu2 %v8395_v30  ;;  %v1497_v3 = vpop.f32.mrf.mxu0 }
 0x15b   : > { %v1498_v57 = vadd.f32 %v1497_v3, %v8666_v12  ;;  %v6373_v3 = vor.u32 %v7287_v51, %v6370_v6 }
 0x15d   : > { %v8648_v44 = vpop.f32.mrf.mxu2  ;;  %2517 = vmatpush.bf16.msra.mxu3 %v6373_v3 }
 0x15e   : > { %v1101_v15 = vpop.f32.mrf.mxu1 }
 0x15f   : > { %v1239_v30 = vadd.f32 %v8374_v20, %v1101_v15  ;;  %v8659_v20 = vpop.f32.mrf.mxu3  ;;  %v6304_v15 = vld [vmem:[%s9895_s8 + $0x70] sm:$0xf] }
 0x161   : > { %v1271_v24 = vmax.f32 %v1239_v30, 0.0  ;;  %v7272_v30 = vld [vmem:[%s9895_s8 + $0x74] sm:$0xf0] }
 0x162   : > { %v1500_v26 = vpop.f32.mrf.mxu0  ;;  %v6305_v21 = vor.u32 %v7272_v30, %v6304_v15 }
 0x163   : > { %v1287_v25 = vpack.c.bf16 %v1271_v24, %v1269_v34  ;;  %v7288_v34 = vld [vmem:[%s9895_s8 + $0xf4] sm:$0xf0] }
 0x164   : > { %2370 = vmatpush.bf16.msrb.mxu0 %v6305_v21 }
 0x165   : > { %v8657_v27 = vpop.f32.mrf.mxu2  ;;  %1578 = vmatmul.bf16.gmra.mxu1 %v1287_v25 }
 0x166   : > { %1676 = vmatmul.bf16.gmra.mxu3 %v1287_v25  ;;  %v6369_v25 = vor.u32 %v7288_v34, %v6368_v22 }
 0x167   : > { %v8664_v35 = vpop.f32.mrf.mxu3 }
 0x168   : > { %2419 = vmatpush.bf16.msra.mxu1 %v6369_v25  ;;  %v7270_v25 = vld [vmem:[%s9895_s8 + $0x64] sm:$0xf0] }
 0x16a   : > { %v1502_v29 = vpop.f32.mrf.mxu0 }
 0x16b   : > { %v1503_v51 = vadd.f32 %v1502_v29, %v8666_v12 }
 0x16d   : > { %v1593_v28 = vpop.f32.mrf.mxu2 }
 0x16e   : > { %v1594_v18 = vadd.f32 %v1593_v28, %v8678_v62 }
 0x172   : > { %v1544_v39 = vpop.f32.mrf.mxu1  ;;  %v8669_v1 = vpop.f32.mrf.mxu0 }
 0x173   : > { %v1545_v59 = vadd.f32 %v1544_v39, %v1496_v46 }
 0x175   : > { %v1595_v45 = vpop.f32.mrf.mxu2  ;;  %v1682_v7 = vmax.f32 %v1545_v59, 0.0 }
 0x176   : > { %v1596_v33 = vadd.f32 %v1595_v45, %v8678_v62  ;;  %v7269_v45 = vld [vmem:[%s9895_s8 + $0x64] sm:$0xf] }
 0x179   : > { %v1642_v60 = vpop.f32.mrf.mxu3 }
 0x17a   : > { %v1546_v63 = vpop.f32.mrf.mxu1  ;;  %v1643_v39 = vadd.f32 %v1642_v60, %v1594_v18  ;;  %v1507_v28 = vpop.f32.mrf.mxu0  ;;  %v6298_v60 = vld [vmem:[%s9895_s8 + $0x68] sm:$0xf0] }
 0x17b   : > { %v1547_v0 = vadd.f32 %v1546_v63, %v1498_v57  ;;  %v6362_v18 = vld [vmem:[%s9895_s8 + $0xe8] sm:$0xf0] }
 0x17c   : > { %v1683_v57 = vmax.f32 %v1643_v39, 0.0 }
 0x17d   : > { %v1684_v10 = vmax.f32 %v1547_v0, 0.0  ;;  %v1598_v11 = vpop.f32.mrf.mxu2  ;;  %v1501_v0 = vadd.f32 %v1500_v26, %v8666_v12  ;;  %v7285_v26 = vld [vmem:[%s9895_s8 + $0xe4] sm:$0xf] }
 0x17e   : > { %v6365_v29 = vor.u32 %v7285_v26, %v6362_v18  ;;  %v1508_v26 = vadd.f32 %v1507_v28, %v8666_v12  ;;  %v6288_v28 = vld [vmem:[%s9895_s8 + $0x50] sm:$0xf] }
 0x17f   : > { %v1714_v24 = vpack.c.bf16 %v1684_v10, %v1682_v7  ;;  %v6301_v10 = vor.u32 %v7269_v45, %v6298_v60 }
 0x180   : > { %2518 = vmatpush.bf16.msra.mxu3 %v6365_v29 }
 0x181   : > { %v1644_v46 = vpop.f32.mrf.mxu3  ;;  %1936 = vmatmul.bf16.vlgmr.msra.gmra.mxu0 %v1714_v24  ;;  %2034 = vmatmul.bf16.vlgmr.msrb.gmra.mxu2 %v1714_v24  ;;  %v6296_v24 = vld [vmem:[%s9895_s8 + $0x60] sm:$0xf] }
 0x182   : > { %v1645_v47 = vadd.f32 %v1644_v46, %v1596_v33  ;;  %v1549_v54 = vpop.f32.mrf.mxu1  ;;  %2469 = vmatpush.bf16.msra.mxu2 %v6301_v10  ;;  %v8708_v30 = vpop.f32.mrf.mxu0  ;;  %v1599_v33 = vadd.f32 %v1598_v11, %v8678_v62  ;;  %v6297_v39 = vor.u32 %v7270_v25, %v6296_v24  ;;  %v6360_v46 = vld [vmem:[%s9895_s8 + $0xe0] sm:$0xf]  ;;  %v6354_v25 = vld [vmem:[%s9895_s8 + $0xd8] sm:$0xf0] }
 0x183   : > { %v1550_v6 = vadd.f32 %v1549_v54, %v1501_v0 }
 0x184   : > { %v1685_v59 = vmax.f32 %v1645_v47, 0.0  ;;  %v7286_v47 = vld [vmem:[%s9895_s8 + $0xe4] sm:$0xf0]  ;;  %2371 = vmatpush.bf16.msrb.mxu0 %v6297_v39 }
 0x185   : > { %v1600_v61 = vpop.f32.mrf.mxu2  ;;  %v1686_v21 = vmax.f32 %v1550_v6, 0.0 }
 0x186   : > { %v1715_v63 = vpack.c.bf16 %v1685_v59, %v1683_v57  ;;  %v6361_v57 = vor.u32 %v7286_v47, %v6360_v46  ;;  %v1601_v59 = vadd.f32 %v1600_v61, %v8678_v62  ;;  %v7267_v61 = vld [vmem:[%s9895_s8 + $0x54] sm:$0xf] }
 0x188   : > { %1985 = vmatmul.bf16.vlgmr.msrb.gmra.mxu1 %v1715_v63  ;;  %2083 = vmatmul.bf16.vlgmr.msrb.gmra.mxu3 %v1715_v63 }
 0x189   : > { %v1647_v7 = vpop.f32.mrf.mxu3  ;;  %2420 = vmatpush.bf16.msra.mxu1 %v6361_v57 }
 0x18a   : > { %v1551_v3 = vpop.f32.mrf.mxu1  ;;  %v1648_v63 = vadd.f32 %v1647_v7, %v1599_v33  ;;  %v1512_v10 = vpop.f32.mrf.mxu0  ;;  %v6290_v7 = vld [vmem:[%s9895_s8 + $0x58] sm:$0xf0] }
 0x18b   : > { %v1552_v15 = vadd.f32 %v1551_v3, %v1503_v51 }
 0x18c   : > { %v1687_v60 = vmax.f32 %v1648_v63, 0.0  ;;  %v6352_v63 = vld [vmem:[%s9895_s8 + $0xd0] sm:$0xf] }
 0x18d   : > { %v1688_v22 = vmax.f32 %v1552_v15, 0.0  ;;  %v1603_v34 = vpop.f32.mrf.mxu2  ;;  %v1506_v15 = vadd.f32 %v8669_v1, %v8666_v12  ;;  %v7283_v1 = vld [vmem:[%s9895_s8 + $0xd4] sm:$0xf] }
 0x18e   : > { %v6357_v47 = vor.u32 %v7283_v1, %v6354_v25  ;;  %v1604_v57 = vadd.f32 %v1603_v34, %v8678_v62 }
 0x18f   : > { %v1716_v54 = vpack.c.bf16 %v1688_v22, %v1686_v21  ;;  %v6293_v22 = vor.u32 %v7267_v61, %v6290_v7 }
 0x190   : > { %2519 = vmatpush.bf16.msra.mxu3 %v6357_v47 }
 0x191   : > { %v1649_v0 = vpop.f32.mrf.mxu3  ;;  %1941 = vmatmul.bf16.gmra.mxu0 %v1716_v54  ;;  %2039 = vmatmul.bf16.gmra.mxu2 %v1716_v54  ;;  %v7268_v54 = vld [vmem:[%s9895_s8 + $0x54] sm:$0xf0] }
 0x192   : > { %v1650_v11 = vadd.f32 %v1649_v0, %v1601_v59  ;;  %v1554_v45 = vpop.f32.mrf.mxu1  ;;  %2470 = vmatpush.bf16.msra.mxu2 %v6293_v22  ;;  %v6289_v59 = vor.u32 %v7268_v54, %v6288_v28  ;;  %v7284_v0 = vld [vmem:[%s9895_s8 + $0xd4] sm:$0xf0]  ;;  %v6346_v54 = vld [vmem:[%s9895_s8 + $0xc8] sm:$0xf0] }
 0x193   : > { %v1555_v18 = vadd.f32 %v1554_v45, %v1506_v15  ;;  %v6353_v45 = vor.u32 %v7284_v0, %v6352_v63 }
 0x194   : > { %v1689_v51 = vmax.f32 %v1650_v11, 0.0  ;;  %2372 = vmatpush.bf16.msrb.mxu0 %v6289_v59 }
 0x195   : > { %v1605_v6 = vpop.f32.mrf.mxu2  ;;  %v1690_v33 = vmax.f32 %v1555_v18, 0.0  ;;  %2421 = vmatpush.bf16.msra.mxu1 %v6353_v45 }
 0x196   : > { %v1717_v3 = vpack.c.bf16 %v1689_v51, %v1687_v60  ;;  %v1515_v60 = vpop.f32.mrf.mxu0  ;;  %v1606_v51 = vadd.f32 %v1605_v6, %v8678_v62  ;;  %v7265_v6 = vld [vmem:[%s9895_s8 + $0x44] sm:$0xf] }
 0x198   : > { %1990 = vmatmul.bf16.gmra.mxu1 %v1717_v3  ;;  %2088 = vmatmul.bf16.gmra.mxu3 %v1717_v3 }
 0x199   : > { %v1652_v21 = vpop.f32.mrf.mxu3 }
 0x19a   : > { %v1556_v29 = vpop.f32.mrf.mxu1  ;;  %v1653_v3 = vadd.f32 %v1652_v21, %v1604_v57  ;;  %v6282_v21 = vld [vmem:[%s9895_s8 + $0x48] sm:$0xf0] }
 0x19b   : > { %v1557_v24 = vadd.f32 %v1556_v29, %v1508_v26  ;;  %v1511_v29 = vadd.f32 %v8708_v30, %v8666_v12  ;;  %v7281_v30 = vld [vmem:[%s9895_s8 + $0xc4] sm:$0xf] }
 0x19c   : > { %v1691_v7 = vmax.f32 %v1653_v3, 0.0  ;;  %v6349_v0 = vor.u32 %v7281_v30, %v6346_v54  ;;  %v6344_v3 = vld [vmem:[%s9895_s8 + $0xc0] sm:$0xf] }
 0x19d   : > { %v1692_v39 = vmax.f32 %v1557_v24, 0.0  ;;  %v1608_v46 = vpop.f32.mrf.mxu2  ;;  %v1513_v24 = vadd.f32 %v1512_v10, %v8666_v12  ;;  %v6280_v10 = vld [vmem:[%s9895_s8 + $0x40] sm:$0xf] }
 0x19e   : > { %v1609_v45 = vadd.f32 %v1608_v46, %v8678_v62  ;;  %2520 = vmatpush.bf16.msra.mxu3 %v6349_v0 }
 0x19f   : > { %v1718_v11 = vpack.c.bf16 %v1692_v39, %v1690_v33  ;;  %v6285_v33 = vor.u32 %v7265_v6, %v6282_v21  ;;  %v1517_v39 = vpop.f32.mrf.mxu0 }
 0x1a1   : > { %v1654_v15 = vpop.f32.mrf.mxu3  ;;  %1946 = vmatmul.bf16.gmra.mxu0 %v1718_v11  ;;  %2044 = vmatmul.bf16.gmra.mxu2 %v1718_v11  ;;  %v7266_v11 = vld [vmem:[%s9895_s8 + $0x44] sm:$0xf0] }
 0x1a2   : > { %v1655_v34 = vadd.f32 %v1654_v15, %v1606_v51  ;;  %v1559_v61 = vpop.f32.mrf.mxu1  ;;  %2471 = vmatpush.bf16.msra.mxu2 %v6285_v33  ;;  %v6281_v51 = vor.u32 %v7266_v11, %v6280_v10  ;;  %v7282_v15 = vld [vmem:[%s9895_s8 + $0xc4] sm:$0xf0]  ;;  %v6338_v10 = vld [vmem:[%s9895_s8 + $0xb8] sm:$0xf0] }
 0x1a3   : > { %v1560_v1 = vadd.f32 %v1559_v61, %v1511_v29  ;;  %v6345_v61 = vor.u32 %v7282_v15, %v6344_v3  ;;  %v7264_v15 = vld [vmem:[%s9895_s8 + $0x34] sm:$0xf0] }
 0x1a4   : > { %v1693_v26 = vmax.f32 %v1655_v34, 0.0  ;;  %2373 = vmatpush.bf16.msrb.mxu0 %v6281_v51 }
 0x1a5   : > { %v1610_v18 = vpop.f32.mrf.mxu2  ;;  %v1694_v57 = vmax.f32 %v1560_v1, 0.0  ;;  %2422 = vmatpush.bf16.msra.mxu1 %v6345_v61 }
 0x1a6   : > { %v1719_v22 = vpack.c.bf16 %v1693_v26, %v1691_v7  ;;  %v1611_v7 = vadd.f32 %v1610_v18, %v8678_v62  ;;  %v7263_v18 = vld [vmem:[%s9895_s8 + $0x34] sm:$0xf] }
 0x1a7   : > { %v1520_v6 = vpop.f32.mrf.mxu0 }
 0x1a8   : > { %1995 = vmatmul.bf16.gmra.mxu1 %v1719_v22  ;;  %2093 = vmatmul.bf16.gmra.mxu3 %v1719_v22 }
 0x1a9   : > { %v1657_v25 = vpop.f32.mrf.mxu3 }
 0x1aa   : > { %v1561_v47 = vpop.f32.mrf.mxu1  ;;  %v1658_v26 = vadd.f32 %v1657_v25, %v1609_v45  ;;  %v6274_v25 = vld [vmem:[%s9895_s8 + $0x38] sm:$0xf0] }
 0x1ab   : > { %v1562_v28 = vadd.f32 %v1561_v47, %v1513_v24  ;;  %v1516_v47 = vadd.f32 %v1515_v60, %v8666_v12  ;;  %v7279_v60 = vld [vmem:[%s9895_s8 + $0xb4] sm:$0xf] }
 0x1ac   : > { %v1695_v21 = vmax.f32 %v1658_v26, 0.0  ;;  %v6341_v3 = vor.u32 %v7279_v60, %v6338_v10  ;;  %v6336_v26 = vld [vmem:[%s9895_s8 + $0xb0] sm:$0xf] }
 0x1ad   : > { %v1696_v59 = vmax.f32 %v1562_v28, 0.0  ;;  %v1613_v63 = vpop.f32.mrf.mxu2  ;;  %v1518_v28 = vadd.f32 %v1517_v39, %v8666_v12  ;;  %v6272_v39 = vld [vmem:[%s9895_s8 + $0x30] sm:$0xf] }
 0x1ae   : > { %v1614_v61 = vadd.f32 %v1613_v63, %v8678_v62  ;;  %2521 = vmatpush.bf16.msra.mxu3 %v6341_v3 }
 0x1af   : > { %v1720_v34 = vpack.c.bf16 %v1696_v59, %v1694_v57  ;;  %v6277_v57 = vor.u32 %v7263_v18, %v6274_v25 }
 0x1b1   : > { %v1659_v22 = vpop.f32.mrf.mxu3  ;;  %1951 = vmatmul.bf16.gmra.mxu0 %v1720_v34  ;;  %2049 = vmatmul.bf16.gmra.mxu2 %v1720_v34  ;;  %v1522_v34 = vpop.f32.mrf.mxu0 }
 0x1b2   : > { %v1660_v46 = vadd.f32 %v1659_v22, %v1611_v7  ;;  %v1564_v29 = vpop.f32.mrf.mxu1  ;;  %2472 = vmatpush.bf16.msra.mxu2 %v6277_v57  ;;  %v6273_v7 = vor.u32 %v7264_v15, %v6272_v39  ;;  %v7280_v22 = vld [vmem:[%s9895_s8 + $0xb4] sm:$0xf0]  ;;  %v1521_v57 = vadd.f32 %v1520_v6, %v8666_v12  ;;  %v7277_v6 = vld [vmem:[%s9895_s8 + $0xa4] sm:$0xf]  ;;  %v6330_v39 = vld [vmem:[%s9895_s8 + $0xa8] sm:$0xf0] }
 0x1b3   : > { %v1565_v30 = vadd.f32 %v1564_v29, %v1516_v47  ;;  %v6337_v29 = vor.u32 %v7280_v22, %v6336_v26  ;;  %v7262_v26 = vld [vmem:[%s9895_s8 + $0x24] sm:$0xf0] }
 0x1b4   : > { %v1697_v24 = vmax.f32 %v1660_v46, 0.0  ;;  %2374 = vmatpush.bf16.msrb.mxu0 %v6273_v7  ;;  %v6333_v7 = vor.u32 %v7277_v6, %v6330_v39 }
 0x1b5   : > { %v1615_v1 = vpop.f32.mrf.mxu2  ;;  %v1698_v11 = vmax.f32 %v1565_v30, 0.0  ;;  %2423 = vmatpush.bf16.msra.mxu1 %v6337_v29  ;;  %v6328_v29 = vld [vmem:[%s9895_s8 + $0xa0] sm:$0xf] }
 0x1b6   : > { %v1721_v33 = vpack.c.bf16 %v1697_v24, %v1695_v21  ;;  %v1616_v21 = vadd.f32 %v1615_v1, %v8678_v62  ;;  %v7261_v1 = vld [vmem:[%s9895_s8 + $0x24] sm:$0xf]  ;;  %2522 = vmatpush.bf16.msra.mxu3 %v6333_v7  ;;  %v7260_v7 = vld [vmem:[%s9895_s8 + $0x14] sm:$0xf0] }
 0x1b8   : > { %2000 = vmatmul.bf16.gmra.mxu1 %v1721_v33  ;;  %2098 = vmatmul.bf16.gmra.mxu3 %v1721_v33 }
 0x1b9   : > { %v1662_v54 = vpop.f32.mrf.mxu3 }
 0x1ba   : > { %v1566_v59 = vpop.f32.mrf.mxu1  ;;  %v1663_v24 = vadd.f32 %v1662_v54, %v1614_v61  ;;  %v6266_v54 = vld [vmem:[%s9895_s8 + $0x28] sm:$0xf0] }
 0x1bb   : > { %v1567_v0 = vadd.f32 %v1566_v59, %v1518_v28  ;;  %v1525_v59 = vpop.f32.mrf.mxu0 }
 0x1bc   : > { %v1699_v18 = vmax.f32 %v1663_v24, 0.0 }
 0x1bd   : > { %v1700_v45 = vmax.f32 %v1567_v0, 0.0  ;;  %v1618_v51 = vpop.f32.mrf.mxu2  ;;  %v1523_v0 = vadd.f32 %v1522_v34, %v8666_v12  ;;  %v6264_v34 = vld [vmem:[%s9895_s8 + $0x20] sm:$0xf] }
 0x1be   : > { %v1619_v22 = vadd.f32 %v1618_v51, %v8678_v62 }
 0x1bf   : > { %v1722_v46 = vpack.c.bf16 %v1700_v45, %v1698_v11  ;;  %v6269_v11 = vor.u32 %v7261_v1, %v6266_v54 }
 0x1c1   : > { %v1664_v33 = vpop.f32.mrf.mxu3  ;;  %1956 = vmatmul.bf16.gmra.mxu0 %v1722_v46  ;;  %2054 = vmatmul.bf16.gmra.mxu2 %v1722_v46  ;;  %v6265_v46 = vor.u32 %v7262_v26, %v6264_v34 }
 0x1c2   : > { %v1665_v63 = vadd.f32 %v1664_v33, %v1616_v21  ;;  %v1569_v47 = vpop.f32.mrf.mxu1  ;;  %2473 = vmatpush.bf16.msra.mxu2 %v6269_v11  ;;  %v7278_v21 = vld [vmem:[%s9895_s8 + $0xa4] sm:$0xf0]  ;;  %v7275_v11 = vld [vmem:[%s9895_s8 + $0x94] sm:$0xf] }
 0x1c3   : > { %v1570_v60 = vadd.f32 %v1569_v47, %v1521_v57  ;;  %2375 = vmatpush.bf16.msrb.mxu0 %v6265_v46  ;;  %v1527_v51 = vpop.f32.mrf.mxu0  ;;  %v6320_v46 = vld [vmem:[%s9895_s8 + $0x90] sm:$0xf] }
 0x1c4   : > { %v1701_v25 = vmax.f32 %v1665_v63, 0.0  ;;  %v6329_v63 = vor.u32 %v7278_v21, %v6328_v29  ;;  %v7276_v29 = vld [vmem:[%s9895_s8 + $0x94] sm:$0xf0] }
 0x1c5   : > { %v1620_v28 = vpop.f32.mrf.mxu2  ;;  %v1702_v15 = vmax.f32 %v1570_v60, 0.0  ;;  %v1526_v60 = vadd.f32 %v1525_v59, %v8666_v12 }
 0x1c6   : > { %v1723_v30 = vpack.c.bf16 %v1701_v25, %v1699_v18  ;;  %v1621_v47 = vadd.f32 %v1620_v28, %v8678_v62  ;;  %2424 = vmatpush.bf16.msra.mxu1 %v6329_v63  ;;  %v7259_v28 = vld [vmem:[%s9895_s8 + $0x14] sm:$0xf] }
 0x1c8   : > { %2005 = vmatmul.bf16.gmra.mxu1 %v1723_v30  ;;  %2103 = vmatmul.bf16.gmra.mxu3 %v1723_v30 }
 0x1c9   : > { %v1667_v10 = vpop.f32.mrf.mxu3 }
 0x1ca   : > { %v1571_v45 = vpop.f32.mrf.mxu1  ;;  %v1668_v18 = vadd.f32 %v1667_v10, %v1619_v22  ;;  %v6258_v10 = vld [vmem:[%s9895_s8 + $0x18] sm:$0xf0] }
 0x1cb   : > { %v1572_v3 = vadd.f32 %v1571_v45, %v1523_v0  ;;  %v1528_v45 = vadd.f32 %v1527_v51, %v8666_v12  ;;  %v6261_v59 = vor.u32 %v7259_v28, %v6258_v10  ;;  %v1530_v63 = vpop.f32.mrf.mxu0 }
 0x1cc   : > { %v1703_v1 = vmax.f32 %v1668_v18, 0.0 }
 0x1cd   : > { %v1704_v61 = vmax.f32 %v1572_v3, 0.0  ;;  %v1623_v24 = vpop.f32.mrf.mxu2  ;;  %2474 = vmatpush.bf16.msra.mxu2 %v6261_v59 }
 0x1cf   : > { %v1724_v33 = vpack.c.bf16 %v1704_v61, %v1702_v15  ;;  %v6322_v15 = vld [vmem:[%s9895_s8 + $0x98] sm:$0xf0]  ;;  %v6256_v61 = vld [vmem:[%s9895_s8 + $0x10] sm:$0xf] }
 0x1d0   : > { %v6325_v26 = vor.u32 %v7275_v11, %v6322_v15  ;;  %v6257_v22 = vor.u32 %v7260_v7, %v6256_v61 }
 0x1d1   : > { %v1669_v25 = vpop.f32.mrf.mxu3  ;;  %1961 = vmatmul.bf16.gmra.mxu0 %v1724_v33  ;;  %2059 = vmatmul.bf16.gmra.mxu2 %v1724_v33  ;;  %v6321_v33 = vor.u32 %v7276_v29, %v6320_v46 }
 0x1d2   : > { %v1670_v30 = vadd.f32 %v1669_v25, %v1621_v47  ;;  %v1574_v57 = vpop.f32.mrf.mxu1  ;;  %2523 = vmatpush.bf16.msra.mxu3 %v6325_v26  ;;  %2376 = vmatpush.bf16.msrb.mxu0 %v6257_v22  ;;  %v1624_v25 = vadd.f32 %v1623_v24, %v8678_v62  ;;  %v7257_v24 = vld [vmem:[%s9895_s8 + $0x4] sm:$0xf] }
 0x1d3   : > { %v1575_v3 = vadd.f32 %v1574_v57, %v1526_v60  ;;  %2425 = vmatpush.bf16.msra.mxu1 %v6321_v33  ;;  %v1532_v11 = vpop.f32.mrf.mxu0 }
 0x1d4   : > { %v1705_v54 = vmax.f32 %v1670_v30, 0.0  ;;  %v1533_v59 = vadd.f32 %v1532_v11, %v8666_v12 }
 0x1d5   : > { %v1625_v6 = vpop.f32.mrf.mxu2  ;;  %v1706_v47 = vmax.f32 %v1575_v3, 0.0  ;;  %v1531_v3 = vadd.f32 %v1530_v63, %v8666_v12  ;;  %v6248_v12 = vld [vmem:[%s9895_s8] sm:$0xf] }
 0x1d6   : > { %v1725_v0 = vpack.c.bf16 %v1705_v54, %v1703_v1  ;;  %v1626_v30 = vadd.f32 %v1625_v6, %v8678_v62  ;;  %v6250_v6 = vld [vmem:[%s9895_s8 + $0x8] sm:$0xf0] }
 0x1d7   : > { %v6253_v7 = vor.u32 %v7257_v24, %v6250_v6 }
 0x1d8   : > { %2010 = vmatmul.bf16.gmra.mxu1 %v1725_v0  ;;  %2108 = vmatmul.bf16.gmra.mxu3 %v1725_v0 }
 0x1d9   : > { %v1672_v39 = vpop.f32.mrf.mxu3  ;;  %2475 = vmatpush.bf16.msra.mxu2 %v6253_v7 }
 0x1da   : > { %v1576_v34 = vpop.f32.mrf.mxu1  ;;  %v1673_v57 = vadd.f32 %v1672_v39, %v1624_v25  ;;  %v7273_v39 = vld [vmem:[%s9895_s8 + $0x84] sm:$0xf] }
 0x1db   : > { %v1577_v21 = vadd.f32 %v1576_v34, %v1528_v45  ;;  %v6314_v34 = vld [vmem:[%s9895_s8 + $0x88] sm:$0xf0] }
 0x1dc   : > { %v1707_v28 = vmax.f32 %v1673_v57, 0.0  ;;  %v6317_v22 = vor.u32 %v7273_v39, %v6314_v34 }
 0x1dd   : > { %v1708_v18 = vmax.f32 %v1577_v21, 0.0  ;;  %v1628_v60 = vpop.f32.mrf.mxu2 }
 0x1de   : > { %2524 = vmatpush.bf16.msra.mxu3 %v6317_v22  ;;  %v1629_v63 = vadd.f32 %v1628_v60, %v8678_v62 }
 0x1df   : > { %v1726_v51 = vpack.c.bf16 %v1708_v18, %v1706_v47  ;;  %v7258_v47 = vld [vmem:[%s9895_s8 + $0x4] sm:$0xf0] }
 0x1e0   : > { %v6249_v25 = vor.u32 %v7258_v47, %v6248_v12  ;;  %v7319_v12 = vld [vmem:[%s9897_s10 + $0xf4] sm:$0xf]  ;;  %v6498_v47 = vld [vmem:[%s9897_s10 + $0xf8] sm:$0xf0] }
 0x1e1   : > { %v1674_v1 = vpop.f32.mrf.mxu3  ;;  %1966 = vmatmul.bf16.gmra.mxu0 %v1726_v51  ;;  %2064 = vmatmul.bf16.gmra.mxu2 %v1726_v51 }
 0x1e2   : > { %v1675_v54 = vadd.f32 %v1674_v1, %v1626_v30  ;;  %v1579_v0 = vpop.f32.mrf.mxu1  ;;  %2377 = vmatpush.bf16.msrb.mxu0 %v6249_v25 }
 0x1e3   : > { %v1580_v15 = vadd.f32 %v1579_v0, %v1531_v3  ;;  %v7274_v0 = vld [vmem:[%s9895_s8 + $0x84] sm:$0xf0] }
 0x1e4   : > { %v1709_v10 = vmax.f32 %v1675_v54, 0.0  ;;  %v6312_v54 = vld [vmem:[%s9895_s8 + $0x80] sm:$0xf] }
 0x1e5   : > { %v1710_v29 = vmax.f32 %v1580_v15, 0.0  ;;  %v1630_v21 = vpop.f32.mrf.mxu2  ;;  %v6313_v60 = vor.u32 %v7274_v0, %v6312_v54  ;;  %v7303_v15 = vld [vmem:[%s9897_s10 + $0x74] sm:$0xf]  ;;  %v6496_v0 = vld [vmem:[%s9897_s10 + $0xf0] sm:$0xf] }
 0x1e6   : > { %v1727_v45 = vpack.c.bf16 %v1709_v10, %v1707_v28  ;;  %v1631_v51 = vadd.f32 %v1630_v21, %v8678_v62 }
 0x1e7   : > { %2426 = vmatpush.bf16.msra.mxu1 %v6313_v60  ;;  %v7320_v60 = vld [vmem:[%s9897_s10 + $0xf4] sm:$0xf0] }
 0x1e8   : > { %2015 = vmatmul.bf16.gmra.mxu1 %v1727_v45  ;;  %2113 = vmatmul.bf16.gmra.mxu3 %v1727_v45  ;;  %v1762_v45 = vld [vmem:[%s9941_s2] sm:$0x3] }
 0x1e9   : > { %v1677_v61 = vpop.f32.mrf.mxu3  ;;  %v8903_v6 = vperm.slane %v1762_v45, 0  ;;  %v8912_v22 = vperm.slane %v1762_v45, 1 }
 0x1ea   : > { %v1581_v26 = vpop.f32.mrf.mxu1  ;;  %v1678_v30 = vadd.f32 %v1677_v61, %v1629_v63  ;;  %v6434_v61 = vld [vmem:[%s9897_s10 + $0x78] sm:$0xf0] }
 0x1eb   : > { %v1582_v46 = vadd.f32 %v1581_v26, %v1533_v59  ;;  %v6437_v34 = vor.u32 %v7303_v15, %v6434_v61 }
 0x1ec   : > { %v1711_v28 = vmax.f32 %v1678_v30, 0.0 }
 0x1ed   : > { %v1712_v33 = vmax.f32 %v1582_v46, 0.0  ;;  %2910 = vmatpush.bf16.msrb.mxu2 %v6437_v34 }
 0x1ef   : > { %v1728_v18 = vpack.c.bf16 %v1712_v33, %v1710_v29 }
 0x1f1   : > { %v1679_v57 = vpop.f32.mrf.mxu3  ;;  %1971 = vmatmul.bf16.gmra.mxu0 %v1728_v18  ;;  %2069 = vmatmul.bf16.gmra.mxu2 %v1728_v18  ;;  %v6501_v18 = vor.u32 %v7319_v12, %v6498_v47 }
 0x1f2   : > { %v1680_v1 = vadd.f32 %v1679_v57, %v1631_v51  ;;  %v6432_v57 = vld [vmem:[%s9897_s10 + $0x70] sm:$0xf] }
 0x1f3   : > { %2959 = vmatpush.bf16.msrb.mxu3 %v6501_v18 }
 0x1f4   : > { %v1713_v10 = vmax.f32 %v1680_v1, 0.0  ;;  %v7304_v1 = vld [vmem:[%s9897_s10 + $0x74] sm:$0xf0] }
 0x1f5   : > { %v6433_v54 = vor.u32 %v7304_v1, %v6432_v57 }
 0x1f6   : > { %v1729_v11 = vpack.c.bf16 %v1713_v10, %v1711_v28 }
 0x1f7   : > { %2812 = vmatpush.bf16.msra.mxu0 %v6433_v54 }
 0x1f8   : > { %2020 = vmatmul.bf16.gmra.mxu1 %v1729_v11  ;;  %2118 = vmatmul.bf16.gmra.mxu3 %v1729_v11 }
 0x1fe   : > { %v1937_v62 = vpop.f32.mrf.mxu0 }
 0x1ff   : > { %v1938_v59 = vadd.f32 %v1937_v62, %v8903_v6  ;;  %v6497_v62 = vor.u32 %v7320_v60, %v6496_v0  ;;  %v6424_v60 = vld [vmem:[%s9897_s10 + $0x60] sm:$0xf] }
 0x201   : > { %2861 = vmatpush.bf16.msrb.mxu1 %v6497_v62  ;;  %v7318_v62 = vld [vmem:[%s9897_s10 + $0xe4] sm:$0xf0] }
 0x204   : > { %v2035_v3 = vpop.f32.mrf.mxu2 }
 0x205   : > { %v1986_v24 = vpop.f32.mrf.mxu1  ;;  %v2036_v51 = vadd.f32 %v2035_v3, %v8912_v22 }
 0x206   : > { %v1939_v39 = vpop.f32.mrf.mxu0  ;;  %v1987_v26 = vadd.f32 %v1986_v24, %v1938_v59 }
 0x207   : > { %v1940_v46 = vadd.f32 %v1939_v39, %v8903_v6 }
 0x208   : > { %v2124_v25 = vmax.f32 %v1987_v26, 0.0 }
 0x20b   : > { %v2084_v7 = vpop.f32.mrf.mxu3 }
 0x20c   : > { %v2037_v29 = vpop.f32.mrf.mxu2  ;;  %v2085_v28 = vadd.f32 %v2084_v7, %v2036_v51  ;;  %v7301_v7 = vld [vmem:[%s9897_s10 + $0x64] sm:$0xf] }
 0x20d   : > { %v1988_v21 = vpop.f32.mrf.mxu1  ;;  %v2038_v11 = vadd.f32 %v2037_v29, %v8912_v22  ;;  %v7317_v51 = vld [vmem:[%s9897_s10 + $0xe4] sm:$0xf] }
 0x20e   : > { %v1989_v33 = vadd.f32 %v1988_v21, %v1940_v46  ;;  %v1942_v63 = vpop.f32.mrf.mxu0  ;;  %v2125_v59 = vmax.f32 %v2085_v28, 0.0  ;;  %v6426_v46 = vld [vmem:[%s9897_s10 + $0x68] sm:$0xf0]  ;;  %v7302_v28 = vld [vmem:[%s9897_s10 + $0x64] sm:$0xf0] }
 0x20f   : > { %v1943_v26 = vadd.f32 %v1942_v63, %v8903_v6  ;;  %v6429_v21 = vor.u32 %v7301_v7, %v6426_v46 }
 0x210   : > { %v2126_v30 = vmax.f32 %v1989_v33, 0.0 }
 0x211   : > { %2911 = vmatpush.bf16.msrb.mxu2 %v6429_v21 }
 0x212   : > { %v2156_v10 = vpack.c.bf16 %v2126_v30, %v2124_v25  ;;  %v6490_v30 = vld [vmem:[%s9897_s10 + $0xe8] sm:$0xf0] }
 0x213   : > { %v2086_v45 = vpop.f32.mrf.mxu3  ;;  %v6493_v57 = vor.u32 %v7317_v51, %v6490_v30 }
 0x214   : > { %v2087_v3 = vadd.f32 %v2086_v45, %v2038_v11  ;;  %2378 = vmatmul.bf16.vlgmr.msrb.gmra.mxu0 %v2156_v10  ;;  %2476 = vmatmul.bf16.vlgmr.msra.gmra.mxu2 %v2156_v10  ;;  %v2040_v24 = vpop.f32.mrf.mxu2  ;;  %v6425_v10 = vor.u32 %v7302_v28, %v6424_v60  ;;  %v6488_v11 = vld [vmem:[%s9897_s10 + $0xe0] sm:$0xf] }
 0x215   : > { %v1991_v39 = vpop.f32.mrf.mxu1  ;;  %v2041_v54 = vadd.f32 %v2040_v24, %v8912_v22  ;;  %2960 = vmatpush.bf16.msrb.mxu3 %v6493_v57 }
 0x216   : > { %v2127_v15 = vmax.f32 %v2087_v3, 0.0  ;;  %v1944_v61 = vpop.f32.mrf.mxu0  ;;  %v1992_v33 = vadd.f32 %v1991_v39, %v1943_v26  ;;  %v6489_v39 = vor.u32 %v7318_v62, %v6488_v11  ;;  %2813 = vmatpush.bf16.msra.mxu0 %v6425_v10  ;;  %v6416_v62 = vld [vmem:[%s9897_s10 + $0x50] sm:$0xf] }
 0x217   : > { %v1945_v12 = vadd.f32 %v1944_v61, %v8903_v6 }
 0x218   : > { %v2157_v34 = vpack.c.bf16 %v2127_v15, %v2125_v59  ;;  %v2128_v1 = vmax.f32 %v1992_v33, 0.0  ;;  %2862 = vmatpush.bf16.msrb.mxu1 %v6489_v39  ;;  %v7316_v39 = vld [vmem:[%s9897_s10 + $0xd4] sm:$0xf0] }
 0x21a   : > { %2427 = vmatmul.bf16.vlgmr.msra.gmra.mxu1 %v2157_v34  ;;  %2525 = vmatmul.bf16.vlgmr.msra.gmra.mxu3 %v2157_v34 }
 0x21b   : > { %v2089_v29 = vpop.f32.mrf.mxu3 }
 0x21c   : > { %v2042_v47 = vpop.f32.mrf.mxu2  ;;  %v2090_v45 = vadd.f32 %v2089_v29, %v2041_v54  ;;  %v7299_v29 = vld [vmem:[%s9897_s10 + $0x54] sm:$0xf] }
 0x21d   : > { %v1993_v18 = vpop.f32.mrf.mxu1  ;;  %v2043_v3 = vadd.f32 %v2042_v47, %v8912_v22  ;;  %v7315_v54 = vld [vmem:[%s9897_s10 + $0xd4] sm:$0xf] }
 0x21e   : > { %v1994_v25 = vadd.f32 %v1993_v18, %v1945_v12  ;;  %v1947_v63 = vpop.f32.mrf.mxu0  ;;  %v2129_v26 = vmax.f32 %v2090_v45, 0.0  ;;  %v6418_v12 = vld [vmem:[%s9897_s10 + $0x58] sm:$0xf0]  ;;  %v7300_v45 = vld [vmem:[%s9897_s10 + $0x54] sm:$0xf0] }
 0x21f   : > { %v1948_v33 = vadd.f32 %v1947_v63, %v8903_v6  ;;  %v6421_v18 = vor.u32 %v7299_v29, %v6418_v12 }
 0x220   : > { %v2130_v0 = vmax.f32 %v1994_v25, 0.0 }
 0x221   : > { %2912 = vmatpush.bf16.msrb.mxu2 %v6421_v18 }
 0x222   : > { %v2158_v24 = vpack.c.bf16 %v2130_v0, %v2128_v1  ;;  %v6482_v0 = vld [vmem:[%s9897_s10 + $0xd8] sm:$0xf0] }
 0x223   : > { %v2091_v59 = vpop.f32.mrf.mxu3  ;;  %v6485_v60 = vor.u32 %v7315_v54, %v6482_v0 }
 0x224   : > { %v2092_v15 = vadd.f32 %v2091_v59, %v2043_v3  ;;  %2383 = vmatmul.bf16.gmra.mxu0 %v2158_v24  ;;  %2481 = vmatmul.bf16.gmra.mxu2 %v2158_v24  ;;  %v2045_v61 = vpop.f32.mrf.mxu2  ;;  %v6417_v3 = vor.u32 %v7300_v45, %v6416_v62  ;;  %v6480_v24 = vld [vmem:[%s9897_s10 + $0xd0] sm:$0xf] }
 0x225   : > { %v1996_v34 = vpop.f32.mrf.mxu1  ;;  %v2046_v10 = vadd.f32 %v2045_v61, %v8912_v22  ;;  %2961 = vmatpush.bf16.msrb.mxu3 %v6485_v60 }
 0x226   : > { %v2131_v7 = vmax.f32 %v2092_v15, 0.0  ;;  %v1949_v46 = vpop.f32.mrf.mxu0  ;;  %v1997_v25 = vadd.f32 %v1996_v34, %v1948_v33  ;;  %v6481_v34 = vor.u32 %v7316_v39, %v6480_v24  ;;  %2814 = vmatpush.bf16.msra.mxu0 %v6417_v3  ;;  %v6408_v39 = vld [vmem:[%s9897_s10 + $0x40] sm:$0xf] }
 0x227   : > { %v1950_v51 = vadd.f32 %v1949_v46, %v8903_v6 }
 0x228   : > { %v2159_v21 = vpack.c.bf16 %v2131_v7, %v2129_v26  ;;  %v2132_v28 = vmax.f32 %v1997_v25, 0.0  ;;  %2863 = vmatpush.bf16.msrb.mxu1 %v6481_v34  ;;  %v7314_v34 = vld [vmem:[%s9897_s10 + $0xc4] sm:$0xf0] }
 0x22a   : > { %2432 = vmatmul.bf16.gmra.mxu1 %v2159_v21  ;;  %2530 = vmatmul.bf16.gmra.mxu3 %v2159_v21 }
 0x22b   : > { %v2094_v47 = vpop.f32.mrf.mxu3 }
 0x22c   : > { %v2047_v30 = vpop.f32.mrf.mxu2  ;;  %v2095_v59 = vadd.f32 %v2094_v47, %v2046_v10  ;;  %v7297_v47 = vld [vmem:[%s9897_s10 + $0x44] sm:$0xf] }
 0x22d   : > { %v1998_v57 = vpop.f32.mrf.mxu1  ;;  %v2048_v15 = vadd.f32 %v2047_v30, %v8912_v22  ;;  %v7313_v10 = vld [vmem:[%s9897_s10 + $0xc4] sm:$0xf] }
 0x22e   : > { %v1999_v1 = vadd.f32 %v1998_v57, %v1950_v51  ;;  %v1952_v63 = vpop.f32.mrf.mxu0  ;;  %v2133_v33 = vmax.f32 %v2095_v59, 0.0  ;;  %v6410_v51 = vld [vmem:[%s9897_s10 + $0x48] sm:$0xf0]  ;;  %v7298_v59 = vld [vmem:[%s9897_s10 + $0x44] sm:$0xf0] }
 0x22f   : > { %v1953_v25 = vadd.f32 %v1952_v63, %v8903_v6  ;;  %v6413_v57 = vor.u32 %v7297_v47, %v6410_v51 }
 0x230   : > { %v2134_v11 = vmax.f32 %v1999_v1, 0.0 }
 0x231   : > { %2913 = vmatpush.bf16.msrb.mxu2 %v6413_v57 }
 0x232   : > { %v2160_v61 = vpack.c.bf16 %v2134_v11, %v2132_v28  ;;  %v6474_v11 = vld [vmem:[%s9897_s10 + $0xc8] sm:$0xf0] }
 0x233   : > { %v2096_v26 = vpop.f32.mrf.mxu3  ;;  %v6477_v62 = vor.u32 %v7313_v10, %v6474_v11 }
 0x234   : > { %v2097_v7 = vadd.f32 %v2096_v26, %v2048_v15  ;;  %2388 = vmatmul.bf16.gmra.mxu0 %v2160_v61  ;;  %2486 = vmatmul.bf16.gmra.mxu2 %v2160_v61  ;;  %v2050_v46 = vpop.f32.mrf.mxu2  ;;  %v6409_v15 = vor.u32 %v7298_v59, %v6408_v39  ;;  %v6472_v61 = vld [vmem:[%s9897_s10 + $0xc0] sm:$0xf] }
 0x235   : > { %v2001_v21 = vpop.f32.mrf.mxu1  ;;  %v2051_v3 = vadd.f32 %v2050_v46, %v8912_v22  ;;  %2962 = vmatpush.bf16.msrb.mxu3 %v6477_v62 }
 0x236   : > { %v2135_v29 = vmax.f32 %v2097_v7, 0.0  ;;  %v1954_v12 = vpop.f32.mrf.mxu0  ;;  %v2002_v1 = vadd.f32 %v2001_v21, %v1953_v25  ;;  %v6473_v21 = vor.u32 %v7314_v34, %v6472_v61  ;;  %2815 = vmatpush.bf16.msra.mxu0 %v6409_v15  ;;  %v6400_v34 = vld [vmem:[%s9897_s10 + $0x30] sm:$0xf] }
 0x237   : > { %v1955_v54 = vadd.f32 %v1954_v12, %v8903_v6 }
 0x238   : > { %v2161_v18 = vpack.c.bf16 %v2135_v29, %v2133_v33  ;;  %v2136_v45 = vmax.f32 %v2002_v1, 0.0  ;;  %2864 = vmatpush.bf16.msrb.mxu1 %v6473_v21  ;;  %v7312_v21 = vld [vmem:[%s9897_s10 + $0xb4] sm:$0xf0] }
 0x23a   : > { %2437 = vmatmul.bf16.gmra.mxu1 %v2161_v18  ;;  %2535 = vmatmul.bf16.gmra.mxu3 %v2161_v18 }
 0x23b   : > { %v2099_v30 = vpop.f32.mrf.mxu3 }
 0x23c   : > { %v2052_v0 = vpop.f32.mrf.mxu2  ;;  %v2100_v26 = vadd.f32 %v2099_v30, %v2051_v3  ;;  %v7295_v30 = vld [vmem:[%s9897_s10 + $0x34] sm:$0xf] }
 0x23d   : > { %v2003_v60 = vpop.f32.mrf.mxu1  ;;  %v2053_v7 = vadd.f32 %v2052_v0, %v8912_v22  ;;  %v7311_v3 = vld [vmem:[%s9897_s10 + $0xb4] sm:$0xf] }
 0x23e   : > { %v2004_v28 = vadd.f32 %v2003_v60, %v1955_v54  ;;  %v1957_v63 = vpop.f32.mrf.mxu0  ;;  %v2137_v25 = vmax.f32 %v2100_v26, 0.0  ;;  %v6402_v54 = vld [vmem:[%s9897_s10 + $0x38] sm:$0xf0]  ;;  %v7296_v26 = vld [vmem:[%s9897_s10 + $0x34] sm:$0xf0] }
 0x23f   : > { %v1958_v1 = vadd.f32 %v1957_v63, %v8903_v6  ;;  %v6405_v60 = vor.u32 %v7295_v30, %v6402_v54 }
 0x240   : > { %v2138_v24 = vmax.f32 %v2004_v28, 0.0 }
 0x241   : > { %2914 = vmatpush.bf16.msrb.mxu2 %v6405_v60 }
 0x242   : > { %v2162_v46 = vpack.c.bf16 %v2138_v24, %v2136_v45  ;;  %v6466_v24 = vld [vmem:[%s9897_s10 + $0xb8] sm:$0xf0] }
 0x243   : > { %v2101_v33 = vpop.f32.mrf.mxu3  ;;  %v6469_v39 = vor.u32 %v7311_v3, %v6466_v24 }
 0x244   : > { %v2102_v29 = vadd.f32 %v2101_v33, %v2053_v7  ;;  %2393 = vmatmul.bf16.gmra.mxu0 %v2162_v46  ;;  %2491 = vmatmul.bf16.gmra.mxu2 %v2162_v46  ;;  %v2055_v12 = vpop.f32.mrf.mxu2  ;;  %v6401_v7 = vor.u32 %v7296_v26, %v6400_v34  ;;  %v6464_v46 = vld [vmem:[%s9897_s10 + $0xb0] sm:$0xf] }
 0x245   : > { %v2006_v18 = vpop.f32.mrf.mxu1  ;;  %v2056_v15 = vadd.f32 %v2055_v12, %v8912_v22  ;;  %2963 = vmatpush.bf16.msrb.mxu3 %v6469_v39 }
 0x246   : > { %v2139_v47 = vmax.f32 %v2102_v29, 0.0  ;;  %v1959_v51 = vpop.f32.mrf.mxu0  ;;  %v2007_v28 = vadd.f32 %v2006_v18, %v1958_v1  ;;  %v6465_v18 = vor.u32 %v7312_v21, %v6464_v46  ;;  %2816 = vmatpush.bf16.msra.mxu0 %v6401_v7  ;;  %v6392_v21 = vld [vmem:[%s9897_s10 + $0x20] sm:$0xf] }
 0x247   : > { %v1960_v10 = vadd.f32 %v1959_v51, %v8903_v6 }
 0x248   : > { %v2163_v57 = vpack.c.bf16 %v2139_v47, %v2137_v25  ;;  %v2140_v59 = vmax.f32 %v2007_v28, 0.0  ;;  %2865 = vmatpush.bf16.msrb.mxu1 %v6465_v18  ;;  %v7310_v18 = vld [vmem:[%s9897_s10 + $0xa4] sm:$0xf0] }
 0x24a   : > { %2442 = vmatmul.bf16.gmra.mxu1 %v2163_v57  ;;  %2540 = vmatmul.bf16.gmra.mxu3 %v2163_v57 }
 0x24b   : > { %v2104_v0 = vpop.f32.mrf.mxu3 }
 0x24c   : > { %v2057_v11 = vpop.f32.mrf.mxu2  ;;  %v2105_v33 = vadd.f32 %v2104_v0, %v2056_v15  ;;  %v7293_v0 = vld [vmem:[%s9897_s10 + $0x24] sm:$0xf] }
 0x24d   : > { %v2008_v62 = vpop.f32.mrf.mxu1  ;;  %v2058_v29 = vadd.f32 %v2057_v11, %v8912_v22  ;;  %v7309_v15 = vld [vmem:[%s9897_s10 + $0xa4] sm:$0xf] }
 0x24e   : > { %v2009_v45 = vadd.f32 %v2008_v62, %v1960_v10  ;;  %v1962_v63 = vpop.f32.mrf.mxu0  ;;  %v2141_v1 = vmax.f32 %v2105_v33, 0.0  ;;  %v6394_v10 = vld [vmem:[%s9897_s10 + $0x28] sm:$0xf0]  ;;  %v7294_v33 = vld [vmem:[%s9897_s10 + $0x24] sm:$0xf0] }
 0x24f   : > { %v1963_v28 = vadd.f32 %v1962_v63, %v8903_v6  ;;  %v6397_v62 = vor.u32 %v7293_v0, %v6394_v10 }
 0x250   : > { %v2142_v61 = vmax.f32 %v2009_v45, 0.0 }
 0x251   : > { %2915 = vmatpush.bf16.msrb.mxu2 %v6397_v62 }
 0x252   : > { %v2164_v12 = vpack.c.bf16 %v2142_v61, %v2140_v59  ;;  %v6458_v61 = vld [vmem:[%s9897_s10 + $0xa8] sm:$0xf0] }
 0x253   : > { %v2106_v25 = vpop.f32.mrf.mxu3  ;;  %v6461_v34 = vor.u32 %v7309_v15, %v6458_v61  ;;  %v6384_v15 = vld [vmem:[%s9897_s10 + $0x10] sm:$0xf]  ;;  %v7292_v61 = vld [vmem:[%s9897_s10 + $0x14] sm:$0xf0] }
 0x254   : > { %v2107_v47 = vadd.f32 %v2106_v25, %v2058_v29  ;;  %2398 = vmatmul.bf16.gmra.mxu0 %v2164_v12  ;;  %2496 = vmatmul.bf16.gmra.mxu2 %v2164_v12  ;;  %v2060_v51 = vpop.f32.mrf.mxu2  ;;  %v6393_v29 = vor.u32 %v7294_v33, %v6392_v21  ;;  %v6456_v12 = vld [vmem:[%s9897_s10 + $0xa0] sm:$0xf]  ;;  %v6385_v21 = vor.u32 %v7292_v61, %v6384_v15  ;;  %v7305_v15 = vld [vmem:[%s9897_s10 + $0x84] sm:$0xf] }
 0x255   : > { %v2011_v57 = vpop.f32.mrf.mxu1  ;;  %v2061_v7 = vadd.f32 %v2060_v51, %v8912_v22  ;;  %2964 = vmatpush.bf16.msrb.mxu3 %v6461_v34 }
 0x256   : > { %v2143_v30 = vmax.f32 %v2107_v47, 0.0  ;;  %v1964_v54 = vpop.f32.mrf.mxu0  ;;  %v2012_v45 = vadd.f32 %v2011_v57, %v1963_v28  ;;  %v6457_v57 = vor.u32 %v7310_v18, %v6456_v12  ;;  %2817 = vmatpush.bf16.msra.mxu0 %v6393_v29 }
 0x257   : > { %v1965_v3 = vadd.f32 %v1964_v54, %v8903_v6 }
 0x258   : > { %v2165_v60 = vpack.c.bf16 %v2143_v30, %v2141_v1  ;;  %v2144_v26 = vmax.f32 %v2012_v45, 0.0  ;;  %2866 = vmatpush.bf16.msrb.mxu1 %v6457_v57 }
 0x25a   : > { %2447 = vmatmul.bf16.gmra.mxu1 %v2165_v60  ;;  %2545 = vmatmul.bf16.gmra.mxu3 %v2165_v60 }
 0x25b   : > { %v2109_v11 = vpop.f32.mrf.mxu3  ;;  %2818 = vmatpush.bf16.msra.mxu0 %v6385_v21 }
 0x25c   : > { %v2062_v24 = vpop.f32.mrf.mxu2  ;;  %v2110_v25 = vadd.f32 %v2109_v11, %v2061_v7  ;;  %v7291_v11 = vld [vmem:[%s9897_s10 + $0x14] sm:$0xf] }
 0x25d   : > { %v2013_v39 = vpop.f32.mrf.mxu1  ;;  %v2063_v47 = vadd.f32 %v2062_v24, %v8912_v22  ;;  %v7307_v24 = vld [vmem:[%s9897_s10 + $0x94] sm:$0xf] }
 0x25e   : > { %v2014_v59 = vadd.f32 %v2013_v39, %v1965_v3  ;;  %v1967_v63 = vpop.f32.mrf.mxu0  ;;  %v2145_v28 = vmax.f32 %v2110_v25, 0.0  ;;  %v6386_v3 = vld [vmem:[%s9897_s10 + $0x18] sm:$0xf0] }
 0x25f   : > { %v1968_v45 = vadd.f32 %v1967_v63, %v8903_v6  ;;  %v6450_v63 = vld [vmem:[%s9897_s10 + $0x98] sm:$0xf0] }
 0x260   : > { %v2146_v46 = vmax.f32 %v2014_v59, 0.0  ;;  %v6389_v59 = vor.u32 %v7291_v11, %v6386_v3 }
 0x262   : > { %v2166_v51 = vpack.c.bf16 %v2146_v46, %v2144_v26  ;;  %v6453_v46 = vor.u32 %v7307_v24, %v6450_v63  ;;  %2916 = vmatpush.bf16.msrb.mxu2 %v6389_v59  ;;  %v7289_v59 = vld [vmem:[%s9897_s10 + $0x4] sm:$0xf]  ;;  %v6378_v63 = vld [vmem:[%s9897_s10 + $0x8] sm:$0xf0] }
 0x263   : > { %v2111_v1 = vpop.f32.mrf.mxu3 }
 0x264   : > { %v2112_v30 = vadd.f32 %v2111_v1, %v2063_v47  ;;  %2403 = vmatmul.bf16.gmra.mxu0 %v2166_v51  ;;  %2501 = vmatmul.bf16.gmra.mxu2 %v2166_v51  ;;  %v2065_v54 = vpop.f32.mrf.mxu2 }
 0x265   : > { %v2016_v60 = vpop.f32.mrf.mxu1  ;;  %2965 = vmatpush.bf16.msrb.mxu3 %v6453_v46  ;;  %v2066_v25 = vadd.f32 %v2065_v54, %v8912_v22 }
 0x266   : > { %v2147_v0 = vmax.f32 %v2112_v30, 0.0  ;;  %v1969_v10 = vpop.f32.mrf.mxu0  ;;  %v2017_v34 = vadd.f32 %v2016_v60, %v1968_v45  ;;  %v6448_v30 = vld [vmem:[%s9897_s10 + $0x90] sm:$0xf]  ;;  %v7308_v60 = vld [vmem:[%s9897_s10 + $0x94] sm:$0xf0] }
 0x267   : > { %v1970_v26 = vadd.f32 %v1969_v10, %v8903_v6 }
 0x268   : > { %v2167_v62 = vpack.c.bf16 %v2147_v0, %v2145_v28  ;;  %v2148_v18 = vmax.f32 %v2017_v34, 0.0  ;;  %v6449_v0 = vor.u32 %v7308_v60, %v6448_v30  ;;  %v6381_v34 = vor.u32 %v7289_v59, %v6378_v63 }
 0x26a   : > { %2452 = vmatmul.bf16.gmra.mxu1 %v2167_v62  ;;  %2550 = vmatmul.bf16.gmra.mxu3 %v2167_v62 }
 0x26b   : > { %v2114_v39 = vpop.f32.mrf.mxu3  ;;  %2867 = vmatpush.bf16.msrb.mxu1 %v6449_v0  ;;  %2917 = vmatpush.bf16.msrb.mxu2 %v6381_v34 }
 0x26c   : > { %v2067_v7 = vpop.f32.mrf.mxu2  ;;  %v2115_v51 = vadd.f32 %v2114_v39, %v2066_v25 }
 0x26d   : > { %v2018_v33 = vpop.f32.mrf.mxu1  ;;  %v2068_v57 = vadd.f32 %v2067_v7, %v8912_v22 }
 0x26e   : > { %v2019_v29 = vadd.f32 %v2018_v33, %v1970_v26  ;;  %v1972_v12 = vpop.f32.mrf.mxu0  ;;  %v2149_v45 = vmax.f32 %v2115_v51, 0.0  ;;  %v6442_v26 = vld [vmem:[%s9897_s10 + $0x88] sm:$0xf0]  ;;  %v6376_v51 = vld [vmem:[%s9897_s10] sm:$0xf] }
 0x26f   : > { %v1973_v39 = vadd.f32 %v1972_v12, %v8903_v6  ;;  %v6445_v21 = vor.u32 %v7305_v15, %v6442_v26 }
 0x270   : > { %v2150_v47 = vmax.f32 %v2019_v29, 0.0 }
 0x271   : > { %2966 = vmatpush.bf16.msrb.mxu3 %v6445_v21 }
 0x272   : > { %v2168_v1 = vpack.c.bf16 %v2150_v47, %v2148_v18 }
 0x273   : > { %v2116_v28 = vpop.f32.mrf.mxu3 }
 0x274   : > { %v2117_v10 = vadd.f32 %v2116_v28, %v2068_v57  ;;  %2408 = vmatmul.bf16.gmra.mxu0 %v2168_v1  ;;  %2506 = vmatmul.bf16.gmra.mxu2 %v2168_v1  ;;  %v2070_v54 = vpop.f32.mrf.mxu2  ;;  %v7290_v57 = vld [vmem:[%s9897_s10 + $0x4] sm:$0xf0] }
 0x275   : > { %v2021_v62 = vpop.f32.mrf.mxu1  ;;  %v2071_v25 = vadd.f32 %v2070_v54, %v8912_v22  ;;  %v6377_v1 = vor.u32 %v7290_v57, %v6376_v51  ;;  %v7351_v51 = vld [vmem:[#allocation4 + $0xf4] sm:$0xf]  ;;  %v6626_v57 = vld [vmem:[#allocation4 + $0xf8] sm:$0xf0] }
 0x276   : > { %v2151_v11 = vmax.f32 %v2117_v10, 0.0  ;;  %v1974_v24 = vpop.f32.mrf.mxu0  ;;  %v2022_v7 = vadd.f32 %v2021_v62, %v1973_v39  ;;  %v6440_v10 = vld [vmem:[%s9897_s10 + $0x80] sm:$0xf]  ;;  %v7306_v62 = vld [vmem:[%s9897_s10 + $0x84] sm:$0xf0] }
 0x277   : > { %v1975_v46 = vadd.f32 %v1974_v24, %v8903_v6  ;;  %2819 = vmatpush.bf16.msra.mxu0 %v6377_v1  ;;  %v6441_v54 = vor.u32 %v7306_v62, %v6440_v10  ;;  %v2204_v24 = vld [vmem:[%s9896_s9] sm:$0x3]  ;;  %v6624_v62 = vld [vmem:[#allocation4 + $0xf0] sm:$0xf] }
 0x278   : > { %v2169_v3 = vpack.c.bf16 %v2151_v11, %v2149_v45  ;;  %v2152_v18 = vmax.f32 %v2022_v7, 0.0  ;;  %v9134_v63 = vperm.slane %v2204_v24, 0  ;;  %v9137_v7 = vperm.slane %v2204_v24, 1 }
 0x279   : > { %2868 = vmatpush.bf16.msrb.mxu1 %v6441_v54  ;;  %v7352_v54 = vld [vmem:[#allocation4 + $0xf4] sm:$0xf0] }
 0x27a   : > { %2457 = vmatmul.bf16.gmra.mxu1 %v2169_v3  ;;  %2555 = vmatmul.bf16.gmra.mxu3 %v2169_v3 }
 0x27b   : > { %v2119_v61 = vpop.f32.mrf.mxu3 }
 0x27c   : > { %v2072_v12 = vpop.f32.mrf.mxu2  ;;  %v2120_v6 = vadd.f32 %v2119_v61, %v2071_v25 }
 0x27d   : > { %v2023_v33 = vpop.f32.mrf.mxu1  ;;  %v2073_v30 = vadd.f32 %v2072_v12, %v8912_v22  ;;  %v7335_v12 = vld [vmem:[#allocation4 + $0x74] sm:$0xf] }
 0x27e   : > { %v2024_v29 = vadd.f32 %v2023_v33, %v1975_v46  ;;  %v2153_v45 = vmax.f32 %v2120_v6, 0.0 }
 0x280   : > { %v2154_v47 = vmax.f32 %v2024_v29, 0.0 }
 0x282   : > { %v2170_v60 = vpack.c.bf16 %v2154_v47, %v2152_v18  ;;  %v6562_v18 = vld [vmem:[#allocation4 + $0x78] sm:$0xf0] }
 0x283   : > { %v2121_v28 = vpop.f32.mrf.mxu3  ;;  %v6565_v47 = vor.u32 %v7335_v12, %v6562_v18 }
 0x284   : > { %v2122_v0 = vadd.f32 %v2121_v28, %v2073_v30  ;;  %2413 = vmatmul.bf16.gmra.mxu0 %v2170_v60  ;;  %2511 = vmatmul.bf16.gmra.mxu2 %v2170_v60  ;;  %v6629_v60 = vor.u32 %v7351_v51, %v6626_v57  ;;  %v6560_v28 = vld [vmem:[#allocation4 + $0x70] sm:$0xf]  ;;  %v7333_v57 = vld [vmem:[#allocation4 + $0x64] sm:$0xf] }
 0x285   : > { %3346 = vmatpush.bf16.msra.mxu2 %v6565_v47 }
 0x286   : > { %v2155_v11 = vmax.f32 %v2122_v0, 0.0  ;;  %v7336_v0 = vld [vmem:[#allocation4 + $0x74] sm:$0xf0]  ;;  %3395 = vmatpush.bf16.msra.mxu3 %v6629_v60  ;;  %v7349_v60 = vld [vmem:[#allocation4 + $0xe4] sm:$0xf] }
 0x287   : > { %v6561_v10 = vor.u32 %v7336_v0, %v6560_v28  ;;  %v6618_v28 = vld [vmem:[#allocation4 + $0xe8] sm:$0xf0] }
 0x288   : > { %v2171_v3 = vpack.c.bf16 %v2155_v11, %v2153_v45 }
 0x289   : > { %3248 = vmatpush.bf16.msrb.mxu0 %v6561_v10 }
 0x28a   : > { %2462 = vmatmul.bf16.gmra.mxu1 %v2171_v3  ;;  %2560 = vmatmul.bf16.gmra.mxu3 %v2171_v3 }
 0x291   : > { %v2379_v22 = vpop.f32.mrf.mxu0 }
 0x292   : > { %v2380_v61 = vadd.f32 %v2379_v22, %v9134_v63  ;;  %v6625_v22 = vor.u32 %v7352_v54, %v6624_v62  ;;  %v6552_v54 = vld [vmem:[#allocation4 + $0x60] sm:$0xf] }
 0x294   : > { %3297 = vmatpush.bf16.msra.mxu1 %v6625_v22  ;;  %v7350_v22 = vld [vmem:[#allocation4 + $0xe4] sm:$0xf0] }
 0x297   : > { %v2428_v39 = vpop.f32.mrf.mxu1  ;;  %v2477_v59 = vpop.f32.mrf.mxu2 }
 0x298   : > { %v2429_v26 = vadd.f32 %v2428_v39, %v2380_v61  ;;  %v2478_v6 = vadd.f32 %v2477_v59, %v9137_v7 }
 0x299   : > { %v2381_v15 = vpop.f32.mrf.mxu0 }
 0x29a   : > { %v2382_v46 = vadd.f32 %v2381_v15, %v9134_v63  ;;  %v2566_v1 = vmax.f32 %v2429_v26, 0.0 }
 0x29d   : > { %v2526_v34 = vpop.f32.mrf.mxu3 }
 0x29e   : > { %v2527_v45 = vadd.f32 %v2526_v34, %v2478_v6 }
 0x29f   : > { %v2430_v21 = vpop.f32.mrf.mxu1  ;;  %v2479_v33 = vpop.f32.mrf.mxu2 }
 0x2a0   : > { %v2431_v29 = vadd.f32 %v2430_v21, %v2382_v46  ;;  %v2480_v3 = vadd.f32 %v2479_v33, %v9137_v7  ;;  %v2567_v61 = vmax.f32 %v2527_v45, 0.0  ;;  %v7334_v45 = vld [vmem:[#allocation4 + $0x64] sm:$0xf0] }
 0x2a1   : > { %v2384_v25 = vpop.f32.mrf.mxu0 }
 0x2a2   : > { %v2568_v30 = vmax.f32 %v2431_v29, 0.0  ;;  %v2385_v29 = vadd.f32 %v2384_v25, %v9134_v63  ;;  %v6621_v25 = vor.u32 %v7349_v60, %v6618_v28  ;;  %v7331_v28 = vld [vmem:[#allocation4 + $0x54] sm:$0xf] }
 0x2a4   : > { %v2598_v11 = vpack.c.bf16 %v2568_v30, %v2566_v1  ;;  %v6554_v1 = vld [vmem:[#allocation4 + $0x68] sm:$0xf0]  ;;  %3396 = vmatpush.bf16.msra.mxu3 %v6621_v25  ;;  %v7347_v25 = vld [vmem:[#allocation4 + $0xd4] sm:$0xf] }
 0x2a5   : > { %v2528_v24 = vpop.f32.mrf.mxu3  ;;  %v6557_v30 = vor.u32 %v7333_v57, %v6554_v1 }
 0x2a6   : > { %v2529_v39 = vadd.f32 %v2528_v24, %v2480_v3  ;;  %2820 = vmatmul.bf16.vlgmr.msra.gmra.mxu0 %v2598_v11  ;;  %2918 = vmatmul.bf16.vlgmr.msrb.gmra.mxu2 %v2598_v11  ;;  %v6553_v11 = vor.u32 %v7334_v45, %v6552_v54  ;;  %v6616_v3 = vld [vmem:[#allocation4 + $0xe0] sm:$0xf]  ;;  %v6610_v54 = vld [vmem:[#allocation4 + $0xd8] sm:$0xf0] }
 0x2a7   : > { %v2433_v59 = vpop.f32.mrf.mxu1  ;;  %v2482_v15 = vpop.f32.mrf.mxu2  ;;  %3347 = vmatpush.bf16.msra.mxu2 %v6557_v30 }
 0x2a8   : > { %v2569_v26 = vmax.f32 %v2529_v39, 0.0  ;;  %v2434_v33 = vadd.f32 %v2433_v59, %v2385_v29  ;;  %v2483_v10 = vadd.f32 %v2482_v15, %v9137_v7  ;;  %3249 = vmatpush.bf16.msrb.mxu0 %v6553_v11 }
 0x2a9   : > { %v2386_v46 = vpop.f32.mrf.mxu0 }
 0x2aa   : > { %v2599_v21 = vpack.c.bf16 %v2569_v26, %v2567_v61  ;;  %v2387_v12 = vadd.f32 %v2386_v46, %v9134_v63  ;;  %v2570_v0 = vmax.f32 %v2434_v33, 0.0  ;;  %v6617_v61 = vor.u32 %v7350_v22, %v6616_v3  ;;  %v6544_v22 = vld [vmem:[#allocation4 + $0x50] sm:$0xf] }
 0x2ac   : > { %2869 = vmatmul.bf16.vlgmr.msrb.gmra.mxu1 %v2599_v21  ;;  %2967 = vmatmul.bf16.vlgmr.msrb.gmra.mxu3 %v2599_v21 }
 0x2ad   : > { %v2531_v34 = vpop.f32.mrf.mxu3  ;;  %3298 = vmatpush.bf16.msra.mxu1 %v6617_v61  ;;  %v7348_v61 = vld [vmem:[#allocation4 + $0xd4] sm:$0xf0] }
 0x2ae   : > { %v2532_v24 = vadd.f32 %v2531_v34, %v2483_v10 }
 0x2af   : > { %v2435_v18 = vpop.f32.mrf.mxu1  ;;  %v2484_v47 = vpop.f32.mrf.mxu2 }
 0x2b0   : > { %v2436_v51 = vadd.f32 %v2435_v18, %v2387_v12  ;;  %v2485_v39 = vadd.f32 %v2484_v47, %v9137_v7  ;;  %v2571_v29 = vmax.f32 %v2532_v24, 0.0  ;;  %v7332_v24 = vld [vmem:[#allocation4 + $0x54] sm:$0xf0] }
 0x2b1   : > { %v2389_v6 = vpop.f32.mrf.mxu0 }
 0x2b2   : > { %v2572_v62 = vmax.f32 %v2436_v51, 0.0  ;;  %v2390_v51 = vadd.f32 %v2389_v6, %v9134_v63  ;;  %v6613_v6 = vor.u32 %v7347_v25, %v6610_v54  ;;  %v7329_v54 = vld [vmem:[#allocation4 + $0x44] sm:$0xf] }
 0x2b4   : > { %v2600_v59 = vpack.c.bf16 %v2572_v62, %v2570_v0  ;;  %v6546_v0 = vld [vmem:[#allocation4 + $0x58] sm:$0xf0]  ;;  %3397 = vmatpush.bf16.msra.mxu3 %v6613_v6  ;;  %v7345_v6 = vld [vmem:[#allocation4 + $0xc4] sm:$0xf] }
 0x2b5   : > { %v2533_v26 = vpop.f32.mrf.mxu3  ;;  %v6549_v62 = vor.u32 %v7331_v28, %v6546_v0 }
 0x2b6   : > { %v2534_v46 = vadd.f32 %v2533_v26, %v2485_v39  ;;  %2825 = vmatmul.bf16.gmra.mxu0 %v2600_v59  ;;  %2923 = vmatmul.bf16.gmra.mxu2 %v2600_v59  ;;  %v6545_v39 = vor.u32 %v7332_v24, %v6544_v22  ;;  %v6608_v59 = vld [vmem:[#allocation4 + $0xd0] sm:$0xf]  ;;  %v6602_v22 = vld [vmem:[#allocation4 + $0xc8] sm:$0xf0] }
 0x2b7   : > { %v2438_v15 = vpop.f32.mrf.mxu1  ;;  %v2487_v21 = vpop.f32.mrf.mxu2  ;;  %3348 = vmatpush.bf16.msra.mxu2 %v6549_v62 }
 0x2b8   : > { %v2573_v33 = vmax.f32 %v2534_v46, 0.0  ;;  %v2439_v47 = vadd.f32 %v2438_v15, %v2390_v51  ;;  %v2488_v11 = vadd.f32 %v2487_v21, %v9137_v7  ;;  %3250 = vmatpush.bf16.msrb.mxu0 %v6545_v39 }
 0x2b9   : > { %v2391_v12 = vpop.f32.mrf.mxu0 }
 0x2ba   : > { %v2601_v18 = vpack.c.bf16 %v2573_v33, %v2571_v29  ;;  %v2392_v57 = vadd.f32 %v2391_v12, %v9134_v63  ;;  %v2574_v45 = vmax.f32 %v2439_v47, 0.0  ;;  %v6609_v29 = vor.u32 %v7348_v61, %v6608_v59  ;;  %v6536_v61 = vld [vmem:[#allocation4 + $0x40] sm:$0xf] }
 0x2bc   : > { %2874 = vmatmul.bf16.gmra.mxu1 %v2601_v18  ;;  %2972 = vmatmul.bf16.gmra.mxu3 %v2601_v18 }
 0x2bd   : > { %v2536_v34 = vpop.f32.mrf.mxu3  ;;  %3299 = vmatpush.bf16.msra.mxu1 %v6609_v29  ;;  %v7346_v29 = vld [vmem:[#allocation4 + $0xc4] sm:$0xf0] }
 0x2be   : > { %v2537_v26 = vadd.f32 %v2536_v34, %v2488_v11 }
 0x2bf   : > { %v2440_v1 = vpop.f32.mrf.mxu1  ;;  %v2489_v30 = vpop.f32.mrf.mxu2 }
 0x2c0   : > { %v2441_v60 = vadd.f32 %v2440_v1, %v2392_v57  ;;  %v2490_v46 = vadd.f32 %v2489_v30, %v9137_v7  ;;  %v2575_v51 = vmax.f32 %v2537_v26, 0.0  ;;  %v7330_v26 = vld [vmem:[#allocation4 + $0x44] sm:$0xf0] }
 0x2c1   : > { %v2394_v10 = vpop.f32.mrf.mxu0 }
 0x2c2   : > { %v2576_v3 = vmax.f32 %v2441_v60, 0.0  ;;  %v2395_v60 = vadd.f32 %v2394_v10, %v9134_v63  ;;  %v6605_v10 = vor.u32 %v7345_v6, %v6602_v22  ;;  %v7327_v22 = vld [vmem:[#allocation4 + $0x34] sm:$0xf] }
 0x2c4   : > { %v2602_v15 = vpack.c.bf16 %v2576_v3, %v2574_v45  ;;  %v6538_v45 = vld [vmem:[#allocation4 + $0x48] sm:$0xf0]  ;;  %3398 = vmatpush.bf16.msra.mxu3 %v6605_v10  ;;  %v7343_v10 = vld [vmem:[#allocation4 + $0xb4] sm:$0xf] }
 0x2c5   : > { %v2538_v33 = vpop.f32.mrf.mxu3  ;;  %v6541_v3 = vor.u32 %v7329_v54, %v6538_v45 }
 0x2c6   : > { %v2539_v12 = vadd.f32 %v2538_v33, %v2490_v46  ;;  %2830 = vmatmul.bf16.gmra.mxu0 %v2602_v15  ;;  %2928 = vmatmul.bf16.gmra.mxu2 %v2602_v15  ;;  %v6537_v46 = vor.u32 %v7330_v26, %v6536_v61  ;;  %v6600_v15 = vld [vmem:[#allocation4 + $0xc0] sm:$0xf]  ;;  %v6594_v61 = vld [vmem:[#allocation4 + $0xb8] sm:$0xf0] }
 0x2c7   : > { %v2443_v21 = vpop.f32.mrf.mxu1  ;;  %v2492_v18 = vpop.f32.mrf.mxu2  ;;  %3349 = vmatpush.bf16.msra.mxu2 %v6541_v3 }
 0x2c8   : > { %v2577_v47 = vmax.f32 %v2539_v12, 0.0  ;;  %v2444_v30 = vadd.f32 %v2443_v21, %v2395_v60  ;;  %v2493_v39 = vadd.f32 %v2492_v18, %v9137_v7  ;;  %3251 = vmatpush.bf16.msrb.mxu0 %v6537_v46 }
 0x2c9   : > { %v2396_v57 = vpop.f32.mrf.mxu0 }
 0x2ca   : > { %v2603_v1 = vpack.c.bf16 %v2577_v47, %v2575_v51  ;;  %v2397_v28 = vadd.f32 %v2396_v57, %v9134_v63  ;;  %v2578_v24 = vmax.f32 %v2444_v30, 0.0  ;;  %v6601_v51 = vor.u32 %v7346_v29, %v6600_v15  ;;  %v6528_v29 = vld [vmem:[#allocation4 + $0x30] sm:$0xf] }
 0x2cc   : > { %2879 = vmatmul.bf16.gmra.mxu1 %v2603_v1  ;;  %2977 = vmatmul.bf16.gmra.mxu3 %v2603_v1 }
 0x2cd   : > { %v2541_v34 = vpop.f32.mrf.mxu3  ;;  %3300 = vmatpush.bf16.msra.mxu1 %v6601_v51  ;;  %v7344_v51 = vld [vmem:[#allocation4 + $0xb4] sm:$0xf0] }
 0x2ce   : > { %v2542_v33 = vadd.f32 %v2541_v34, %v2493_v39 }
 0x2cf   : > { %v2445_v0 = vpop.f32.mrf.mxu1  ;;  %v2494_v62 = vpop.f32.mrf.mxu2 }
 0x2d0   : > { %v2446_v25 = vadd.f32 %v2445_v0, %v2397_v28  ;;  %v2495_v12 = vadd.f32 %v2494_v62, %v9137_v7  ;;  %v2579_v60 = vmax.f32 %v2542_v33, 0.0  ;;  %v7328_v33 = vld [vmem:[#allocation4 + $0x34] sm:$0xf0] }
 0x2d1   : > { %v2399_v11 = vpop.f32.mrf.mxu0 }
 0x2d2   : > { %v2580_v59 = vmax.f32 %v2446_v25, 0.0  ;;  %v2400_v25 = vadd.f32 %v2399_v11, %v9134_v63  ;;  %v6597_v11 = vor.u32 %v7343_v10, %v6594_v61  ;;  %v7325_v61 = vld [vmem:[#allocation4 + $0x24] sm:$0xf] }
 0x2d4   : > { %v2604_v21 = vpack.c.bf16 %v2580_v59, %v2578_v24  ;;  %v6530_v24 = vld [vmem:[#allocation4 + $0x38] sm:$0xf0]  ;;  %3399 = vmatpush.bf16.msra.mxu3 %v6597_v11  ;;  %v7341_v11 = vld [vmem:[#allocation4 + $0xa4] sm:$0xf] }
 0x2d5   : > { %v2543_v47 = vpop.f32.mrf.mxu3  ;;  %v6533_v59 = vor.u32 %v7327_v22, %v6530_v24 }
 0x2d6   : > { %v2544_v57 = vadd.f32 %v2543_v47, %v2495_v12  ;;  %2835 = vmatmul.bf16.gmra.mxu0 %v2604_v21  ;;  %2933 = vmatmul.bf16.gmra.mxu2 %v2604_v21  ;;  %v6529_v12 = vor.u32 %v7328_v33, %v6528_v29  ;;  %v6592_v21 = vld [vmem:[#allocation4 + $0xb0] sm:$0xf]  ;;  %v6586_v29 = vld [vmem:[#allocation4 + $0xa8] sm:$0xf0] }
 0x2d7   : > { %v2448_v18 = vpop.f32.mrf.mxu1  ;;  %v2497_v1 = vpop.f32.mrf.mxu2  ;;  %3350 = vmatpush.bf16.msra.mxu2 %v6533_v59 }
 0x2d8   : > { %v2581_v30 = vmax.f32 %v2544_v57, 0.0  ;;  %v2449_v62 = vadd.f32 %v2448_v18, %v2400_v25  ;;  %v2498_v46 = vadd.f32 %v2497_v1, %v9137_v7  ;;  %3252 = vmatpush.bf16.msrb.mxu0 %v6529_v12 }
 0x2d9   : > { %v2401_v28 = vpop.f32.mrf.mxu0 }
 0x2da   : > { %v2605_v0 = vpack.c.bf16 %v2581_v30, %v2579_v60  ;;  %v2402_v54 = vadd.f32 %v2401_v28, %v9134_v63  ;;  %v2582_v26 = vmax.f32 %v2449_v62, 0.0  ;;  %v6593_v60 = vor.u32 %v7344_v51, %v6592_v21  ;;  %v6520_v51 = vld [vmem:[#allocation4 + $0x20] sm:$0xf] }
 0x2dc   : > { %2884 = vmatmul.bf16.gmra.mxu1 %v2605_v0  ;;  %2982 = vmatmul.bf16.gmra.mxu3 %v2605_v0 }
 0x2dd   : > { %v2546_v34 = vpop.f32.mrf.mxu3  ;;  %3301 = vmatpush.bf16.msra.mxu1 %v6593_v60  ;;  %v7342_v60 = vld [vmem:[#allocation4 + $0xa4] sm:$0xf0] }
 0x2de   : > { %v2547_v47 = vadd.f32 %v2546_v34, %v2498_v46 }
 0x2df   : > { %v2450_v45 = vpop.f32.mrf.mxu1  ;;  %v2499_v3 = vpop.f32.mrf.mxu2 }
 0x2e0   : > { %v2451_v6 = vadd.f32 %v2450_v45, %v2402_v54  ;;  %v2500_v57 = vadd.f32 %v2499_v3, %v9137_v7  ;;  %v2583_v25 = vmax.f32 %v2547_v47, 0.0  ;;  %v7326_v47 = vld [vmem:[#allocation4 + $0x24] sm:$0xf0] }
 0x2e1   : > { %v2404_v39 = vpop.f32.mrf.mxu0 }
 0x2e2   : > { %v2584_v15 = vmax.f32 %v2451_v6, 0.0  ;;  %v2405_v6 = vadd.f32 %v2404_v39, %v9134_v63  ;;  %v6589_v39 = vor.u32 %v7341_v11, %v6586_v29  ;;  %v6578_v11 = vld [vmem:[#allocation4 + $0x98] sm:$0xf0]  ;;  %v6512_v29 = vld [vmem:[#allocation4 + $0x10] sm:$0xf] }
 0x2e4   : > { %v2606_v18 = vpack.c.bf16 %v2584_v15, %v2582_v26  ;;  %v6522_v26 = vld [vmem:[#allocation4 + $0x28] sm:$0xf0]  ;;  %3400 = vmatpush.bf16.msra.mxu3 %v6589_v39 }
 0x2e5   : > { %v2548_v30 = vpop.f32.mrf.mxu3  ;;  %v6525_v15 = vor.u32 %v7325_v61, %v6522_v26  ;;  %v7339_v61 = vld [vmem:[#allocation4 + $0x94] sm:$0xf] }
 0x2e6   : > { %v2549_v28 = vadd.f32 %v2548_v30, %v2500_v57  ;;  %2840 = vmatmul.bf16.gmra.mxu0 %v2606_v18  ;;  %2938 = vmatmul.bf16.gmra.mxu2 %v2606_v18  ;;  %v6521_v57 = vor.u32 %v7326_v47, %v6520_v51  ;;  %v6584_v18 = vld [vmem:[#allocation4 + $0xa0] sm:$0xf]  ;;  %v6581_v39 = vor.u32 %v7339_v61, %v6578_v11  ;;  %v6576_v47 = vld [vmem:[#allocation4 + $0x90] sm:$0xf] }
 0x2e7   : > { %v2453_v1 = vpop.f32.mrf.mxu1  ;;  %v2502_v0 = vpop.f32.mrf.mxu2  ;;  %3351 = vmatpush.bf16.msra.mxu2 %v6525_v15 }
 0x2e8   : > { %v2585_v62 = vmax.f32 %v2549_v28, 0.0  ;;  %v2454_v3 = vadd.f32 %v2453_v1, %v2405_v6  ;;  %v2503_v12 = vadd.f32 %v2502_v0, %v9137_v7  ;;  %3253 = vmatpush.bf16.msrb.mxu0 %v6521_v57  ;;  %v7340_v57 = vld [vmem:[#allocation4 + $0x94] sm:$0xf0]  ;;  %3401 = vmatpush.bf16.msra.mxu3 %v6581_v39 }
 0x2e9   : > { %v2406_v54 = vpop.f32.mrf.mxu0 }
 0x2ea   : > { %v2607_v45 = vpack.c.bf16 %v2585_v62, %v2583_v25  ;;  %v2407_v22 = vadd.f32 %v2406_v54, %v9134_v63  ;;  %v2586_v33 = vmax.f32 %v2454_v3, 0.0  ;;  %v6585_v25 = vor.u32 %v7342_v60, %v6584_v18 }
 0x2ec   : > { %2889 = vmatmul.bf16.gmra.mxu1 %v2607_v45  ;;  %2987 = vmatmul.bf16.gmra.mxu3 %v2607_v45 }
 0x2ed   : > { %v2551_v34 = vpop.f32.mrf.mxu3  ;;  %3302 = vmatpush.bf16.msra.mxu1 %v6585_v25 }
 0x2ee   : > { %v2552_v30 = vadd.f32 %v2551_v34, %v2503_v12  ;;  %v7323_v34 = vld [vmem:[#allocation4 + $0x14] sm:$0xf] }
 0x2ef   : > { %v2455_v24 = vpop.f32.mrf.mxu1  ;;  %v2504_v59 = vpop.f32.mrf.mxu2 }
 0x2f0   : > { %v2456_v10 = vadd.f32 %v2455_v24, %v2407_v22  ;;  %v2505_v28 = vadd.f32 %v2504_v59, %v9137_v7  ;;  %v2587_v6 = vmax.f32 %v2552_v30, 0.0  ;;  %v6514_v59 = vld [vmem:[#allocation4 + $0x18] sm:$0xf0] }
 0x2f1   : > { %v2409_v46 = vpop.f32.mrf.mxu0  ;;  %v6517_v15 = vor.u32 %v7323_v34, %v6514_v59 }
 0x2f2   : > { %v2588_v21 = vmax.f32 %v2456_v10, 0.0  ;;  %v2410_v10 = vadd.f32 %v2409_v46, %v9134_v63  ;;  %v6577_v46 = vor.u32 %v7340_v57, %v6576_v47 }
 0x2f3   : > { %3352 = vmatpush.bf16.msra.mxu2 %v6517_v15 }
 0x2f4   : > { %v2608_v1 = vpack.c.bf16 %v2588_v21, %v2586_v33  ;;  %v7324_v33 = vld [vmem:[#allocation4 + $0x14] sm:$0xf0]  ;;  %3303 = vmatpush.bf16.msra.mxu1 %v6577_v46 }
 0x2f5   : > { %v2553_v62 = vpop.f32.mrf.mxu3  ;;  %v6513_v51 = vor.u32 %v7324_v33, %v6512_v29  ;;  %v6506_v29 = vld [vmem:[#allocation4 + $0x8] sm:$0xf0] }
 0x2f6   : > { %v2554_v54 = vadd.f32 %v2553_v62, %v2505_v28  ;;  %2845 = vmatmul.bf16.gmra.mxu0 %v2608_v1  ;;  %2943 = vmatmul.bf16.gmra.mxu2 %v2608_v1 }
 0x2f7   : > { %v2458_v0 = vpop.f32.mrf.mxu1  ;;  %v2507_v45 = vpop.f32.mrf.mxu2  ;;  %3254 = vmatpush.bf16.msrb.mxu0 %v6513_v51 }
 0x2f8   : > { %v2589_v3 = vmax.f32 %v2554_v54, 0.0  ;;  %v2459_v12 = vadd.f32 %v2458_v0, %v2410_v10  ;;  %v2508_v25 = vadd.f32 %v2507_v45, %v9137_v7  ;;  %v7321_v45 = vld [vmem:[#allocation4 + $0x4] sm:$0xf] }
 0x2f9   : > { %v2411_v22 = vpop.f32.mrf.mxu0 }
 0x2fa   : > { %v2609_v24 = vpack.c.bf16 %v2589_v3, %v2587_v6  ;;  %v2412_v21 = vadd.f32 %v2411_v22, %v9134_v63  ;;  %v2590_v1 = vmax.f32 %v2459_v12, 0.0  ;;  %v6509_v12 = vor.u32 %v7321_v45, %v6506_v29 }
 0x2fc   : > { %2894 = vmatmul.bf16.gmra.mxu1 %v2609_v24  ;;  %2992 = vmatmul.bf16.gmra.mxu3 %v2609_v24 }
 0x2fd   : > { %v2556_v26 = vpop.f32.mrf.mxu3  ;;  %3353 = vmatpush.bf16.msra.mxu2 %v6509_v12 }
 0x2fe   : > { %v2557_v54 = vadd.f32 %v2556_v26, %v2508_v25  ;;  %v7337_v26 = vld [vmem:[#allocation4 + $0x84] sm:$0xf]  ;;  %v7322_v25 = vld [vmem:[#allocation4 + $0x4] sm:$0xf0] }
 0x2ff   : > { %v2460_v18 = vpop.f32.mrf.mxu1  ;;  %v2509_v60 = vpop.f32.mrf.mxu2 }
 0x300   : > { %v2461_v30 = vadd.f32 %v2460_v18, %v2412_v21  ;;  %v2510_v0 = vadd.f32 %v2509_v60, %v9137_v7  ;;  %v2591_v34 = vmax.f32 %v2557_v54, 0.0  ;;  %v6570_v21 = vld [vmem:[#allocation4 + $0x88] sm:$0xf0] }
 0x301   : > { %v2414_v28 = vpop.f32.mrf.mxu0  ;;  %v6573_v47 = vor.u32 %v7337_v26, %v6570_v21 }
 0x302   : > { %v2592_v62 = vmax.f32 %v2461_v30, 0.0  ;;  %v2415_v11 = vadd.f32 %v2414_v28, %v9134_v63 }
 0x303   : > { %3402 = vmatpush.bf16.msra.mxu3 %v6573_v47 }
 0x304   : > { %v2610_v6 = vpack.c.bf16 %v2592_v62, %v2590_v1  ;;  %v6504_v1 = vld [vmem:[#allocation4] sm:$0xf] }
 0x305   : > { %v2558_v3 = vpop.f32.mrf.mxu3  ;;  %v6505_v62 = vor.u32 %v7322_v25, %v6504_v1 }
 0x306   : > { %v2559_v22 = vadd.f32 %v2558_v3, %v2510_v0  ;;  %2850 = vmatmul.bf16.gmra.mxu0 %v2610_v6  ;;  %2948 = vmatmul.bf16.gmra.mxu2 %v2610_v6 }
 0x307   : > { %v2463_v24 = vpop.f32.mrf.mxu1  ;;  %v2512_v10 = vpop.f32.mrf.mxu2  ;;  %3255 = vmatpush.bf16.msrb.mxu0 %v6505_v62 }
 0x308   : > { %v2593_v59 = vmax.f32 %v2559_v22, 0.0  ;;  %v2464_v39 = vadd.f32 %v2463_v24, %v2415_v11  ;;  %v2513_v30 = vadd.f32 %v2512_v10, %v9137_v7  ;;  %v6568_v22 = vld [vmem:[#allocation4 + $0x80] sm:$0xf]  ;;  %v7338_v24 = vld [vmem:[#allocation4 + $0x84] sm:$0xf0] }
 0x309   : > { %v2416_v15 = vpop.f32.mrf.mxu0 }
 0x30a   : > { %v2611_v61 = vpack.c.bf16 %v2593_v59, %v2591_v34  ;;  %v2417_v51 = vadd.f32 %v2416_v15, %v9134_v63  ;;  %v2594_v46 = vmax.f32 %v2464_v39, 0.0  ;;  %v6569_v34 = vor.u32 %v7338_v24, %v6568_v22  ;;  %v6752_v22 = vld [vmem:[#allocation6 + $0xf0] sm:$0xf] }
 0x30c   : > { %2899 = vmatmul.bf16.gmra.mxu1 %v2611_v61  ;;  %2997 = vmatmul.bf16.gmra.mxu3 %v2611_v61 }
 0x30d   : > { %v2561_v33 = vpop.f32.mrf.mxu3  ;;  %3304 = vmatpush.bf16.msra.mxu1 %v6569_v34 }
 0x30e   : > { %v2562_v54 = vadd.f32 %v2561_v33, %v2513_v30 }
 0x30f   : > { %v2465_v57 = vpop.f32.mrf.mxu1  ;;  %v2514_v60 = vpop.f32.mrf.mxu2 }
 0x310   : > { %v2466_v18 = vadd.f32 %v2465_v57, %v2417_v51  ;;  %v2515_v0 = vadd.f32 %v2514_v60, %v9137_v7  ;;  %v2595_v59 = vmax.f32 %v2562_v54, 0.0  ;;  %v2646_v7 = vld [vmem:[%s9898_s11] sm:$0x3]  ;;  %v7367_v60 = vld [vmem:[#allocation6 + $0x74] sm:$0xf] }
 0x311   : > { %v9173_v29 = vperm.slane %v2646_v7, 0  ;;  %v9176_v39 = vperm.slane %v2646_v7, 1  ;;  %v7383_v54 = vld [vmem:[#allocation6 + $0xf4] sm:$0xf] }
 0x312   : > { %v2596_v28 = vmax.f32 %v2466_v18, 0.0 }
 0x314   : > { %v2612_v6 = vpack.c.bf16 %v2596_v28, %v2594_v46  ;;  %v6690_v46 = vld [vmem:[#allocation6 + $0x78] sm:$0xf0] }
 0x315   : > { %v2563_v3 = vpop.f32.mrf.mxu3  ;;  %v6693_v28 = vor.u32 %v7367_v60, %v6690_v46 }
 0x316   : > { %v2564_v63 = vadd.f32 %v2563_v3, %v2515_v0  ;;  %2855 = vmatmul.bf16.gmra.mxu0 %v2612_v6  ;;  %2953 = vmatmul.bf16.gmra.mxu2 %v2612_v6  ;;  %v6754_v0 = vld [vmem:[#allocation6 + $0xf8] sm:$0xf0]  ;;  %v6688_v3 = vld [vmem:[#allocation6 + $0x70] sm:$0xf] }
 0x317   : > { %3826 = vmatpush.bf16.msrb.mxu2 %v6693_v28  ;;  %v6757_v6 = vor.u32 %v7383_v54, %v6754_v0 }
 0x318   : > { %v2597_v61 = vmax.f32 %v2564_v63, 0.0  ;;  %v7368_v63 = vld [vmem:[#allocation6 + $0x74] sm:$0xf0] }
 0x319   : > { %3875 = vmatpush.bf16.msrb.mxu3 %v6757_v6 }
 0x31a   : > { %v2613_v10 = vpack.c.bf16 %v2597_v61, %v2595_v59  ;;  %v6689_v61 = vor.u32 %v7368_v63, %v6688_v3 }
 0x31c   : > { %2904 = vmatmul.bf16.gmra.mxu1 %v2613_v10  ;;  %3002 = vmatmul.bf16.gmra.mxu3 %v2613_v10  ;;  %v7384_v10 = vld [vmem:[#allocation6 + $0xf4] sm:$0xf0] }
 0x31d   : > { %v6753_v7 = vor.u32 %v7384_v10, %v6752_v22  ;;  %3728 = vmatpush.bf16.msra.mxu0 %v6689_v61  ;;  %v7381_v22 = vld [vmem:[#allocation6 + $0xe4] sm:$0xf]  ;;  %v6744_v61 = vld [vmem:[#allocation6 + $0xe0] sm:$0xf] }
 0x31f   : > { %3777 = vmatpush.bf16.msrb.mxu1 %v6753_v7 }
 0x323   : > { %v2821_v15 = vpop.f32.mrf.mxu0 }
 0x324   : > { %v2822_v33 = vadd.f32 %v2821_v15, %v9173_v29 }
 0x329   : > { %v2870_v11 = vpop.f32.mrf.mxu1  ;;  %v2919_v45 = vpop.f32.mrf.mxu2 }
 0x32a   : > { %v2871_v21 = vadd.f32 %v2870_v11, %v2822_v33  ;;  %v2920_v25 = vadd.f32 %v2919_v45, %v9176_v39 }
 0x32b   : > { %v2823_v26 = vpop.f32.mrf.mxu0 }
 0x32c   : > { %v2824_v51 = vadd.f32 %v2823_v26, %v9173_v29  ;;  %v3008_v1 = vmax.f32 %v2871_v21, 0.0 }
 0x32f   : > { %v2968_v12 = vpop.f32.mrf.mxu3 }
 0x330   : > { %v2969_v24 = vadd.f32 %v2968_v12, %v2920_v25  ;;  %v7365_v25 = vld [vmem:[#allocation6 + $0x64] sm:$0xf] }
 0x331   : > { %v2872_v47 = vpop.f32.mrf.mxu1  ;;  %v2921_v57 = vpop.f32.mrf.mxu2 }
 0x332   : > { %v2873_v18 = vadd.f32 %v2872_v47, %v2824_v51  ;;  %v2922_v59 = vadd.f32 %v2921_v57, %v9176_v39  ;;  %v3009_v33 = vmax.f32 %v2969_v24, 0.0  ;;  %v6746_v24 = vld [vmem:[#allocation6 + $0xe8] sm:$0xf0] }
 0x333   : > { %v2826_v30 = vpop.f32.mrf.mxu0 }
 0x334   : > { %v3010_v62 = vmax.f32 %v2873_v18, 0.0  ;;  %v2827_v12 = vadd.f32 %v2826_v30, %v9173_v29  ;;  %v6749_v30 = vor.u32 %v7381_v22, %v6746_v24 }
 0x336   : > { %v3040_v34 = vpack.c.bf16 %v3010_v62, %v3008_v1  ;;  %v6682_v62 = vld [vmem:[#allocation6 + $0x68] sm:$0xf0]  ;;  %3876 = vmatpush.bf16.msrb.mxu3 %v6749_v30 }
 0x337   : > { %v2970_v15 = vpop.f32.mrf.mxu3  ;;  %v6685_v0 = vor.u32 %v7365_v25, %v6682_v62 }
 0x338   : > { %v2971_v11 = vadd.f32 %v2970_v15, %v2922_v59  ;;  %3256 = vmatmul.bf16.vlgmr.msrb.gmra.mxu0 %v3040_v34  ;;  %3354 = vmatmul.bf16.vlgmr.msra.gmra.mxu2 %v3040_v34  ;;  %v6680_v34 = vld [vmem:[#allocation6 + $0x60] sm:$0xf]  ;;  %v7366_v59 = vld [vmem:[#allocation6 + $0x64] sm:$0xf0] }
 0x339   : > { %v2875_v45 = vpop.f32.mrf.mxu1  ;;  %v2924_v26 = vpop.f32.mrf.mxu2  ;;  %3827 = vmatpush.bf16.msrb.mxu2 %v6685_v0 }
 0x33a   : > { %v3011_v21 = vmax.f32 %v2971_v11, 0.0  ;;  %v2876_v18 = vadd.f32 %v2875_v45, %v2827_v12  ;;  %v2925_v3 = vadd.f32 %v2924_v26, %v9176_v39  ;;  %v6681_v11 = vor.u32 %v7366_v59, %v6680_v34  ;;  %v7382_v45 = vld [vmem:[#allocation6 + $0xe4] sm:$0xf0] }
 0x33b   : > { %v2828_v51 = vpop.f32.mrf.mxu0 }
 0x33c   : > { %v3041_v47 = vpack.c.bf16 %v3011_v21, %v3009_v33  ;;  %v2829_v60 = vadd.f32 %v2828_v51, %v9173_v29  ;;  %v3012_v6 = vmax.f32 %v2876_v18, 0.0  ;;  %v6745_v21 = vor.u32 %v7382_v45, %v6744_v61  ;;  %3729 = vmatpush.bf16.msra.mxu0 %v6681_v11  ;;  %v7379_v61 = vld [vmem:[#allocation6 + $0xd4] sm:$0xf]  ;;  %v6736_v11 = vld [vmem:[#allocation6 + $0xd0] sm:$0xf] }
 0x33e   : > { %3305 = vmatmul.bf16.vlgmr.msra.gmra.mxu1 %v3041_v47  ;;  %3403 = vmatmul.bf16.vlgmr.msra.gmra.mxu3 %v3041_v47 }
 0x33f   : > { %v2973_v57 = vpop.f32.mrf.mxu3  ;;  %3778 = vmatpush.bf16.msrb.mxu1 %v6745_v21 }
 0x340   : > { %v2974_v10 = vadd.f32 %v2973_v57, %v2925_v3  ;;  %v7363_v3 = vld [vmem:[#allocation6 + $0x54] sm:$0xf] }
 0x341   : > { %v2877_v46 = vpop.f32.mrf.mxu1  ;;  %v2926_v28 = vpop.f32.mrf.mxu2 }
 0x342   : > { %v2878_v1 = vadd.f32 %v2877_v46, %v2829_v60  ;;  %v2927_v15 = vadd.f32 %v2926_v28, %v9176_v39  ;;  %v3013_v12 = vmax.f32 %v2974_v10, 0.0  ;;  %v6738_v10 = vld [vmem:[#allocation6 + $0xd8] sm:$0xf0] }
 0x343   : > { %v2831_v54 = vpop.f32.mrf.mxu0 }
 0x344   : > { %v3014_v63 = vmax.f32 %v2878_v1, 0.0  ;;  %v2832_v57 = vadd.f32 %v2831_v54, %v9173_v29  ;;  %v6741_v54 = vor.u32 %v7379_v61, %v6738_v10 }
 0x346   : > { %v3042_v7 = vpack.c.bf16 %v3014_v63, %v3012_v6  ;;  %v6674_v63 = vld [vmem:[#allocation6 + $0x58] sm:$0xf0]  ;;  %3877 = vmatpush.bf16.msrb.mxu3 %v6741_v54 }
 0x347   : > { %v2975_v33 = vpop.f32.mrf.mxu3  ;;  %v6677_v24 = vor.u32 %v7363_v3, %v6674_v63 }
 0x348   : > { %v2976_v51 = vadd.f32 %v2975_v33, %v2927_v15  ;;  %3261 = vmatmul.bf16.gmra.mxu0 %v3042_v7  ;;  %3359 = vmatmul.bf16.gmra.mxu2 %v3042_v7  ;;  %v6672_v15 = vld [vmem:[#allocation6 + $0x50] sm:$0xf]  ;;  %v7364_v7 = vld [vmem:[#allocation6 + $0x54] sm:$0xf0] }
 0x349   : > { %v2880_v26 = vpop.f32.mrf.mxu1  ;;  %v2929_v47 = vpop.f32.mrf.mxu2  ;;  %3828 = vmatpush.bf16.msrb.mxu2 %v6677_v24 }
 0x34a   : > { %v3015_v18 = vmax.f32 %v2976_v51, 0.0  ;;  %v2881_v1 = vadd.f32 %v2880_v26, %v2832_v57  ;;  %v2930_v34 = vadd.f32 %v2929_v47, %v9176_v39  ;;  %v6673_v51 = vor.u32 %v7364_v7, %v6672_v15  ;;  %v7380_v26 = vld [vmem:[#allocation6 + $0xd4] sm:$0xf0] }
 0x34b   : > { %v2833_v60 = vpop.f32.mrf.mxu0 }
 0x34c   : > { %v3043_v46 = vpack.c.bf16 %v3015_v18, %v3013_v12  ;;  %v2834_v25 = vadd.f32 %v2833_v60, %v9173_v29  ;;  %v3016_v30 = vmax.f32 %v2881_v1, 0.0  ;;  %v6737_v18 = vor.u32 %v7380_v26, %v6736_v11  ;;  %3730 = vmatpush.bf16.msra.mxu0 %v6673_v51  ;;  %v7377_v11 = vld [vmem:[#allocation6 + $0xc4] sm:$0xf]  ;;  %v6728_v51 = vld [vmem:[#allocation6 + $0xc0] sm:$0xf] }
 0x34e   : > { %3310 = vmatmul.bf16.gmra.mxu1 %v3043_v46  ;;  %3408 = vmatmul.bf16.gmra.mxu3 %v3043_v46 }
 0x34f   : > { %v2978_v28 = vpop.f32.mrf.mxu3  ;;  %3779 = vmatpush.bf16.msrb.mxu1 %v6737_v18 }
 0x350   : > { %v2979_v45 = vadd.f32 %v2978_v28, %v2930_v34  ;;  %v7361_v34 = vld [vmem:[#allocation6 + $0x44] sm:$0xf] }
 0x351   : > { %v2882_v62 = vpop.f32.mrf.mxu1  ;;  %v2931_v0 = vpop.f32.mrf.mxu2 }
 0x352   : > { %v2883_v6 = vadd.f32 %v2882_v62, %v2834_v25  ;;  %v2932_v33 = vadd.f32 %v2931_v0, %v9176_v39  ;;  %v3017_v57 = vmax.f32 %v2979_v45, 0.0  ;;  %v6730_v45 = vld [vmem:[#allocation6 + $0xc8] sm:$0xf0] }
 0x353   : > { %v2836_v22 = vpop.f32.mrf.mxu0 }
 0x354   : > { %v3018_v59 = vmax.f32 %v2883_v6, 0.0  ;;  %v2837_v28 = vadd.f32 %v2836_v22, %v9173_v29  ;;  %v6733_v22 = vor.u32 %v7377_v11, %v6730_v45 }
 0x356   : > { %v3044_v21 = vpack.c.bf16 %v3018_v59, %v3016_v30  ;;  %v6666_v59 = vld [vmem:[#allocation6 + $0x48] sm:$0xf0]  ;;  %3878 = vmatpush.bf16.msrb.mxu3 %v6733_v22 }
 0x357   : > { %v2980_v12 = vpop.f32.mrf.mxu3  ;;  %v6669_v10 = vor.u32 %v7361_v34, %v6666_v59 }
 0x358   : > { %v2981_v60 = vadd.f32 %v2980_v12, %v2932_v33  ;;  %3266 = vmatmul.bf16.gmra.mxu0 %v3044_v21  ;;  %3364 = vmatmul.bf16.gmra.mxu2 %v3044_v21  ;;  %v6664_v33 = vld [vmem:[#allocation6 + $0x40] sm:$0xf]  ;;  %v7362_v21 = vld [vmem:[#allocation6 + $0x44] sm:$0xf0] }
 0x359   : > { %v2885_v47 = vpop.f32.mrf.mxu1  ;;  %v2934_v46 = vpop.f32.mrf.mxu2  ;;  %3829 = vmatpush.bf16.msrb.mxu2 %v6669_v10 }
 0x35a   : > { %v3019_v1 = vmax.f32 %v2981_v60, 0.0  ;;  %v2886_v6 = vadd.f32 %v2885_v47, %v2837_v28  ;;  %v2935_v15 = vadd.f32 %v2934_v46, %v9176_v39  ;;  %v6665_v60 = vor.u32 %v7362_v21, %v6664_v33  ;;  %v7378_v47 = vld [vmem:[#allocation6 + $0xc4] sm:$0xf0] }
 0x35b   : > { %v2838_v25 = vpop.f32.mrf.mxu0 }
 0x35c   : > { %v3045_v62 = vpack.c.bf16 %v3019_v1, %v3017_v57  ;;  %v2839_v3 = vadd.f32 %v2838_v25, %v9173_v29  ;;  %v3020_v54 = vmax.f32 %v2886_v6, 0.0  ;;  %v6729_v1 = vor.u32 %v7378_v47, %v6728_v51  ;;  %3731 = vmatpush.bf16.msra.mxu0 %v6665_v60  ;;  %v7375_v51 = vld [vmem:[#allocation6 + $0xb4] sm:$0xf]  ;;  %v6720_v60 = vld [vmem:[#allocation6 + $0xb0] sm:$0xf] }
 0x35e   : > { %3315 = vmatmul.bf16.gmra.mxu1 %v3045_v62  ;;  %3413 = vmatmul.bf16.gmra.mxu3 %v3045_v62 }
 0x35f   : > { %v2983_v0 = vpop.f32.mrf.mxu3  ;;  %3780 = vmatpush.bf16.msrb.mxu1 %v6729_v1 }
 0x360   : > { %v2984_v26 = vadd.f32 %v2983_v0, %v2935_v15  ;;  %v7359_v15 = vld [vmem:[#allocation6 + $0x34] sm:$0xf] }
 0x361   : > { %v2887_v63 = vpop.f32.mrf.mxu1  ;;  %v2936_v24 = vpop.f32.mrf.mxu2 }
 0x362   : > { %v2888_v30 = vadd.f32 %v2887_v63, %v2839_v3  ;;  %v2937_v12 = vadd.f32 %v2936_v24, %v9176_v39  ;;  %v3021_v28 = vmax.f32 %v2984_v26, 0.0  ;;  %v6722_v26 = vld [vmem:[#allocation6 + $0xb8] sm:$0xf0] }
 0x363   : > { %v2841_v61 = vpop.f32.mrf.mxu0 }
 0x364   : > { %v3022_v7 = vmax.f32 %v2888_v30, 0.0  ;;  %v2842_v0 = vadd.f32 %v2841_v61, %v9173_v29  ;;  %v6725_v61 = vor.u32 %v7375_v51, %v6722_v26 }
 0x366   : > { %v3046_v18 = vpack.c.bf16 %v3022_v7, %v3020_v54  ;;  %v6658_v7 = vld [vmem:[#allocation6 + $0x38] sm:$0xf0]  ;;  %3879 = vmatpush.bf16.msrb.mxu3 %v6725_v61 }
 0x367   : > { %v2985_v57 = vpop.f32.mrf.mxu3  ;;  %v6661_v45 = vor.u32 %v7359_v15, %v6658_v7 }
 0x368   : > { %v2986_v25 = vadd.f32 %v2985_v57, %v2937_v12  ;;  %3271 = vmatmul.bf16.gmra.mxu0 %v3046_v18  ;;  %3369 = vmatmul.bf16.gmra.mxu2 %v3046_v18  ;;  %v6656_v12 = vld [vmem:[#allocation6 + $0x30] sm:$0xf]  ;;  %v7360_v18 = vld [vmem:[#allocation6 + $0x34] sm:$0xf0] }
 0x369   : > { %v2890_v46 = vpop.f32.mrf.mxu1  ;;  %v2939_v62 = vpop.f32.mrf.mxu2  ;;  %3830 = vmatpush.bf16.msrb.mxu2 %v6661_v45 }
 0x36a   : > { %v3023_v6 = vmax.f32 %v2986_v25, 0.0  ;;  %v2891_v30 = vadd.f32 %v2890_v46, %v2842_v0  ;;  %v2940_v33 = vadd.f32 %v2939_v62, %v9176_v39  ;;  %v6657_v25 = vor.u32 %v7360_v18, %v6656_v12  ;;  %v7376_v46 = vld [vmem:[#allocation6 + $0xb4] sm:$0xf0] }
 0x36b   : > { %v2843_v3 = vpop.f32.mrf.mxu0 }
 0x36c   : > { %v3047_v63 = vpack.c.bf16 %v3023_v6, %v3021_v28  ;;  %v2844_v34 = vadd.f32 %v2843_v3, %v9173_v29  ;;  %v3024_v22 = vmax.f32 %v2891_v30, 0.0  ;;  %v6721_v6 = vor.u32 %v7376_v46, %v6720_v60  ;;  %3732 = vmatpush.bf16.msra.mxu0 %v6657_v25  ;;  %v7373_v60 = vld [vmem:[#allocation6 + $0xa4] sm:$0xf]  ;;  %v6712_v25 = vld [vmem:[#allocation6 + $0xa0] sm:$0xf] }
 0x36e   : > { %3320 = vmatmul.bf16.gmra.mxu1 %v3047_v63  ;;  %3418 = vmatmul.bf16.gmra.mxu3 %v3047_v63 }
 0x36f   : > { %v2988_v24 = vpop.f32.mrf.mxu3  ;;  %3781 = vmatpush.bf16.msrb.mxu1 %v6721_v6 }
 0x370   : > { %v2989_v47 = vadd.f32 %v2988_v24, %v2940_v33  ;;  %v7357_v33 = vld [vmem:[#allocation6 + $0x24] sm:$0xf] }
 0x371   : > { %v2892_v59 = vpop.f32.mrf.mxu1  ;;  %v2941_v10 = vpop.f32.mrf.mxu2 }
 0x372   : > { %v2893_v54 = vadd.f32 %v2892_v59, %v2844_v34  ;;  %v2942_v57 = vadd.f32 %v2941_v10, %v9176_v39  ;;  %v3025_v0 = vmax.f32 %v2989_v47, 0.0  ;;  %v6714_v47 = vld [vmem:[#allocation6 + $0xa8] sm:$0xf0] }
 0x373   : > { %v2846_v11 = vpop.f32.mrf.mxu0 }
 0x374   : > { %v3026_v21 = vmax.f32 %v2893_v54, 0.0  ;;  %v2847_v24 = vadd.f32 %v2846_v11, %v9173_v29  ;;  %v6717_v11 = vor.u32 %v7373_v60, %v6714_v47 }
 0x376   : > { %v3048_v1 = vpack.c.bf16 %v3026_v21, %v3024_v22  ;;  %v6650_v21 = vld [vmem:[#allocation6 + $0x28] sm:$0xf0]  ;;  %3880 = vmatpush.bf16.msrb.mxu3 %v6717_v11 }
 0x377   : > { %v2990_v28 = vpop.f32.mrf.mxu3  ;;  %v6653_v26 = vor.u32 %v7357_v33, %v6650_v21  ;;  %v7371_v33 = vld [vmem:[#allocation6 + $0x94] sm:$0xf] }
 0x378   : > { %v2991_v3 = vadd.f32 %v2990_v28, %v2942_v57  ;;  %3276 = vmatmul.bf16.gmra.mxu0 %v3048_v1  ;;  %3374 = vmatmul.bf16.gmra.mxu2 %v3048_v1  ;;  %v6648_v57 = vld [vmem:[#allocation6 + $0x20] sm:$0xf]  ;;  %v7358_v1 = vld [vmem:[#allocation6 + $0x24] sm:$0xf0] }
 0x379   : > { %v2895_v62 = vpop.f32.mrf.mxu1  ;;  %v2944_v63 = vpop.f32.mrf.mxu2  ;;  %3831 = vmatpush.bf16.msrb.mxu2 %v6653_v26 }
 0x37a   : > { %v3027_v30 = vmax.f32 %v2991_v3, 0.0  ;;  %v2896_v54 = vadd.f32 %v2895_v62, %v2847_v24  ;;  %v2945_v12 = vadd.f32 %v2944_v63, %v9176_v39  ;;  %v6649_v3 = vor.u32 %v7358_v1, %v6648_v57  ;;  %v7374_v62 = vld [vmem:[#allocation6 + $0xa4] sm:$0xf0] }
 0x37b   : > { %v2848_v34 = vpop.f32.mrf.mxu0 }
 0x37c   : > { %v3049_v59 = vpack.c.bf16 %v3027_v30, %v3025_v0  ;;  %v2849_v15 = vadd.f32 %v2848_v34, %v9173_v29  ;;  %v3028_v61 = vmax.f32 %v2896_v54, 0.0  ;;  %v6713_v30 = vor.u32 %v7374_v62, %v6712_v25  ;;  %3733 = vmatpush.bf16.msra.mxu0 %v6649_v3  ;;  %v6704_v62 = vld [vmem:[#allocation6 + $0x90] sm:$0xf] }
 0x37e   : > { %3325 = vmatmul.bf16.gmra.mxu1 %v3049_v59  ;;  %3423 = vmatmul.bf16.gmra.mxu3 %v3049_v59 }
 0x37f   : > { %v2993_v10 = vpop.f32.mrf.mxu3  ;;  %3782 = vmatpush.bf16.msrb.mxu1 %v6713_v30 }
 0x380   : > { %v2994_v46 = vadd.f32 %v2993_v10, %v2945_v12  ;;  %v6640_v12 = vld [vmem:[#allocation6 + $0x10] sm:$0xf] }
 0x381   : > { %v2897_v7 = vpop.f32.mrf.mxu1  ;;  %v2946_v45 = vpop.f32.mrf.mxu2 }
 0x382   : > { %v2898_v22 = vadd.f32 %v2897_v7, %v2849_v15  ;;  %v2947_v28 = vadd.f32 %v2946_v45, %v9176_v39  ;;  %v3029_v24 = vmax.f32 %v2994_v46, 0.0  ;;  %v7355_v45 = vld [vmem:[#allocation6 + $0x14] sm:$0xf] }
 0x383   : > { %v2851_v51 = vpop.f32.mrf.mxu0 }
 0x384   : > { %v3030_v18 = vmax.f32 %v2898_v22, 0.0  ;;  %v2852_v10 = vadd.f32 %v2851_v51, %v9173_v29  ;;  %v6642_v22 = vld [vmem:[#allocation6 + $0x18] sm:$0xf0] }
 0x385   : > { %v6645_v26 = vor.u32 %v7355_v45, %v6642_v22 }
 0x386   : > { %v3050_v6 = vpack.c.bf16 %v3030_v18, %v3028_v61  ;;  %v6706_v61 = vld [vmem:[#allocation6 + $0x98] sm:$0xf0]  ;;  %v7356_v18 = vld [vmem:[#allocation6 + $0x14] sm:$0xf0] }
 0x387   : > { %v2995_v0 = vpop.f32.mrf.mxu3  ;;  %v6709_v11 = vor.u32 %v7371_v33, %v6706_v61  ;;  %v6641_v57 = vor.u32 %v7356_v18, %v6640_v12  ;;  %3832 = vmatpush.bf16.msrb.mxu2 %v6645_v26  ;;  %v7353_v18 = vld [vmem:[#allocation6 + $0x4] sm:$0xf] }
 0x388   : > { %v2996_v34 = vadd.f32 %v2995_v0, %v2947_v28  ;;  %3281 = vmatmul.bf16.gmra.mxu0 %v3050_v6  ;;  %3379 = vmatmul.bf16.gmra.mxu2 %v3050_v6  ;;  %v7372_v0 = vld [vmem:[#allocation6 + $0x94] sm:$0xf0] }
 0x389   : > { %v2900_v63 = vpop.f32.mrf.mxu1  ;;  %v2949_v59 = vpop.f32.mrf.mxu2  ;;  %3881 = vmatpush.bf16.msrb.mxu3 %v6709_v11  ;;  %3734 = vmatpush.bf16.msra.mxu0 %v6641_v57 }
 0x38a   : > { %v3031_v54 = vmax.f32 %v2996_v34, 0.0  ;;  %v2901_v60 = vadd.f32 %v2900_v63, %v2852_v10  ;;  %v2950_v6 = vadd.f32 %v2949_v59, %v9176_v39 }
 0x38b   : > { %v2853_v15 = vpop.f32.mrf.mxu0 }
 0x38c   : > { %v3051_v7 = vpack.c.bf16 %v3031_v54, %v3029_v24  ;;  %v2854_v47 = vadd.f32 %v2853_v15, %v9173_v29  ;;  %v3032_v28 = vmax.f32 %v2901_v60, 0.0  ;;  %v6705_v24 = vor.u32 %v7372_v0, %v6704_v62  ;;  %v6634_v60 = vld [vmem:[#allocation6 + $0x8] sm:$0xf0]  ;;  %v7369_v62 = vld [vmem:[#allocation6 + $0x84] sm:$0xf] }
 0x38d   : > { %v6637_v11 = vor.u32 %v7353_v18, %v6634_v60  ;;  %v6698_v0 = vld [vmem:[#allocation6 + $0x88] sm:$0xf0] }
 0x38e   : > { %3330 = vmatmul.bf16.gmra.mxu1 %v3051_v7  ;;  %3428 = vmatmul.bf16.gmra.mxu3 %v3051_v7 }
 0x38f   : > { %v2998_v21 = vpop.f32.mrf.mxu3  ;;  %3783 = vmatpush.bf16.msrb.mxu1 %v6705_v24  ;;  %3833 = vmatpush.bf16.msrb.mxu2 %v6637_v11 }
 0x390   : > { %v2999_v30 = vadd.f32 %v2998_v21, %v2950_v6 }
 0x391   : > { %v2902_v1 = vpop.f32.mrf.mxu1  ;;  %v2951_v25 = vpop.f32.mrf.mxu2 }
 0x392   : > { %v2903_v46 = vadd.f32 %v2902_v1, %v2854_v47  ;;  %v2952_v34 = vadd.f32 %v2951_v25, %v9176_v39  ;;  %v3033_v45 = vmax.f32 %v2999_v30, 0.0  ;;  %v6632_v30 = vld [vmem:[#allocation6] sm:$0xf] }
 0x393   : > { %v2856_v51 = vpop.f32.mrf.mxu0 }
 0x394   : > { %v3034_v3 = vmax.f32 %v2903_v46, 0.0  ;;  %v2857_v59 = vadd.f32 %v2856_v51, %v9173_v29 }
 0x396   : > { %v3052_v63 = vpack.c.bf16 %v3034_v3, %v3032_v28 }
 0x397   : > { %v3000_v54 = vpop.f32.mrf.mxu3 }
 0x398   : > { %v3001_v15 = vadd.f32 %v3000_v54, %v2952_v34  ;;  %3286 = vmatmul.bf16.gmra.mxu0 %v3052_v63  ;;  %3384 = vmatmul.bf16.gmra.mxu2 %v3052_v63  ;;  %v7354_v63 = vld [vmem:[#allocation6 + $0x4] sm:$0xf0] }
 0x399   : > { %v2905_v7 = vpop.f32.mrf.mxu1  ;;  %v2954_v10 = vpop.f32.mrf.mxu2  ;;  %v6633_v54 = vor.u32 %v7354_v63, %v6632_v30  ;;  %v6880_v30 = vld [vmem:[#allocation7 + $0xf0] sm:$0xf] }
 0x39a   : > { %v3035_v22 = vmax.f32 %v3001_v15, 0.0  ;;  %v2906_v61 = vadd.f32 %v2905_v7, %v2857_v59  ;;  %v2955_v46 = vadd.f32 %v2954_v10, %v9176_v39  ;;  %v6696_v10 = vld [vmem:[#allocation6 + $0x80] sm:$0xf] }
 0x39b   : > { %v2858_v26 = vpop.f32.mrf.mxu0  ;;  %3735 = vmatpush.bf16.msra.mxu0 %v6633_v54 }
 0x39c   : > { %v3053_v33 = vpack.c.bf16 %v3035_v22, %v3033_v45  ;;  %v2859_v12 = vadd.f32 %v2858_v26, %v9173_v29  ;;  %v3036_v25 = vmax.f32 %v2906_v61, 0.0  ;;  %v6701_v29 = vor.u32 %v7369_v62, %v6698_v0  ;;  %v7370_v45 = vld [vmem:[#allocation6 + $0x84] sm:$0xf0] }
 0x39d   : > { %v6697_v22 = vor.u32 %v7370_v45, %v6696_v10 }
 0x39e   : > { %3335 = vmatmul.bf16.gmra.mxu1 %v3053_v33  ;;  %3433 = vmatmul.bf16.gmra.mxu3 %v3053_v33 }
 0x39f   : > { %v3003_v21 = vpop.f32.mrf.mxu3  ;;  %3882 = vmatpush.bf16.msrb.mxu3 %v6701_v29  ;;  %3784 = vmatpush.bf16.msrb.mxu1 %v6697_v22 }
 0x3a0   : > { %v3004_v6 = vadd.f32 %v3003_v21, %v2955_v46 }
 0x3a1   : > { %v2907_v47 = vpop.f32.mrf.mxu1  ;;  %v2956_v1 = vpop.f32.mrf.mxu2 }
 0x3a2   : > { %v2908_v57 = vadd.f32 %v2907_v47, %v2859_v12  ;;  %v2957_v51 = vadd.f32 %v2956_v1, %v9176_v39  ;;  %v3037_v15 = vmax.f32 %v3004_v6, 0.0  ;;  %v3476_v12 = vld [vmem:[%s9900_s13] sm:$0x3]  ;;  %v6816_v6 = vld [vmem:[#allocation7 + $0x70] sm:$0xf] }
 0x3a4   : > { %v3038_v28 = vmax.f32 %v2908_v57, 0.0  ;;  %v9213_v57 = vperm.slane %v3476_v12, 0 }
 0x3a6   : > { %v3054_v3 = vpack.c.bf16 %v3038_v28, %v3036_v25 }
 0x3a7   : > { %v3005_v34 = vpop.f32.mrf.mxu3 }
 0x3a8   : > { %v3006_v24 = vadd.f32 %v3005_v34, %v2957_v51  ;;  %3291 = vmatmul.bf16.gmra.mxu0 %v3054_v3  ;;  %3389 = vmatmul.bf16.gmra.mxu2 %v3054_v3  ;;  %v7400_v51 = vld [vmem:[#allocation7 + $0x74] sm:$0xf0] }
 0x3a9   : > { %v6817_v3 = vor.u32 %v7400_v51, %v6816_v6  ;;  %v7416_v34 = vld [vmem:[#allocation7 + $0xf4] sm:$0xf0]  ;;  %v7414_v6 = vld [vmem:[#allocation7 + $0xe4] sm:$0xf0] }
 0x3aa   : > { %v3039_v7 = vmax.f32 %v3006_v24, 0.0  ;;  %v6881_v63 = vor.u32 %v7416_v34, %v6880_v30  ;;  %v9219_v24 = vperm.slane %v3476_v12, 1 }
 0x3ab   : > { %4170 = vmatpush.bf16.msrb.mxu0 %v6817_v3 }
 0x3ac   : > { %v3055_v33 = vpack.c.bf16 %v3039_v7, %v3037_v15  ;;  %4219 = vmatpush.bf16.msra.mxu1 %v6881_v63 }
 0x3ae   : > { %3340 = vmatmul.bf16.gmra.mxu1 %v3055_v33  ;;  %3438 = vmatmul.bf16.gmra.mxu3 %v3055_v33 }
 0x3b5   : > { %v3257_v39 = vpop.f32.mrf.mxu0 }
 0x3bb   : > { %v3306_v26 = vpop.f32.mrf.mxu1  ;;  %v3355_v59 = vpop.f32.mrf.mxu2 }
 0x3bc   : > { %v3307_v61 = vadd.f32 %v3306_v26, %v3257_v39 }
 0x3bd   : > { %v3259_v21 = vpop.f32.mrf.mxu0 }
 0x3be   : > { %v3444_v11 = vadd.f32 %v3307_v61, %v8400_v37 }
 0x3c0   : > { %v3482_v62 = vadd.f32 %v9213_v57, %v3444_v11  ;;  %v7398_v11 = vld [vmem:[#allocation7 + $0x64] sm:$0xf0] }
 0x3c1   : > { %v3404_v18 = vpop.f32.mrf.mxu3 }
 0x3c2   : > { %v3405_v46 = vadd.f32 %v3404_v18, %v3355_v59 }
 0x3c3   : > { %v3308_v60 = vpop.f32.mrf.mxu1  ;;  %v3357_v47 = vpop.f32.mrf.mxu2 }
 0x3c4   : > { %v3309_v1 = vadd.f32 %v3308_v60, %v3259_v21  ;;  %v3445_v37 = vadd.f32 %v3405_v46, %v8403_v41 }
 0x3c5   : > { %v3262_v25 = vpop.f32.mrf.mxu0 }
 0x3c6   : > { %v3446_v28 = vadd.f32 %v3309_v1, %v8405_v48  ;;  %v3483_v22 = vadd.f32 %v9219_v24, %v3445_v37 }
 0x3c8   : > { %v3484_v0 = vadd.f32 %v9213_v57, %v3446_v28 }
 0x3c9   : > { %v3406_v29 = vpop.f32.mrf.mxu3 }
 0x3ca   : > { %v3514_v54 = vpack.c.bf16 %v3484_v0, %v3482_v62  ;;  %v3407_v15 = vadd.f32 %v3406_v29, %v3357_v47  ;;  %v6808_v47 = vld [vmem:[#allocation7 + $0x60] sm:$0xf] }
 0x3cb   : > { %v3311_v7 = vpop.f32.mrf.mxu1  ;;  %v3360_v48 = vpop.f32.mrf.mxu2  ;;  %v6809_v1 = vor.u32 %v7398_v11, %v6808_v47 }
 0x3cc   : > { %v3447_v10 = vadd.f32 %v3407_v15, %v8413_v31  ;;  %3736 = vmatmul.bf16.vlgmr.msra.gmra.mxu0 %v3514_v54  ;;  %3834 = vmatmul.bf16.vlgmr.msrb.gmra.mxu2 %v3514_v54  ;;  %v3312_v26 = vadd.f32 %v3311_v7, %v3262_v25  ;;  %v6872_v25 = vld [vmem:[#allocation7 + $0xe0] sm:$0xf] }
 0x3cd   : > { %v3264_v45 = vpop.f32.mrf.mxu0  ;;  %4171 = vmatpush.bf16.msrb.mxu0 %v6809_v1  ;;  %v6873_v3 = vor.u32 %v7414_v6, %v6872_v25 }
 0x3ce   : > { %v3485_v33 = vadd.f32 %v9219_v24, %v3447_v10  ;;  %v3448_v61 = vadd.f32 %v3312_v26, %v8438_v5  ;;  %v7396_v26 = vld [vmem:[#allocation7 + $0x54] sm:$0xf0] }
 0x3cf   : > { %4220 = vmatpush.bf16.msra.mxu1 %v6873_v3 }
 0x3d0   : > { %v3515_v39 = vpack.c.bf16 %v3485_v33, %v3483_v22  ;;  %v3486_v46 = vadd.f32 %v9213_v57, %v3448_v61  ;;  %v6864_v61 = vld [vmem:[#allocation7 + $0xd0] sm:$0xf] }
 0x3d1   : > { %v3409_v59 = vpop.f32.mrf.mxu3 }
 0x3d2   : > { %3785 = vmatmul.bf16.vlgmr.msrb.gmra.mxu1 %v3515_v39  ;;  %3883 = vmatmul.bf16.vlgmr.msrb.gmra.mxu3 %v3515_v39  ;;  %v3410_v60 = vadd.f32 %v3409_v59, %v3360_v48  ;;  %v6800_v39 = vld [vmem:[#allocation7 + $0x50] sm:$0xf] }
 0x3d3   : > { %v3313_v41 = vpop.f32.mrf.mxu1  ;;  %v3362_v21 = vpop.f32.mrf.mxu2  ;;  %v6801_v59 = vor.u32 %v7396_v26, %v6800_v39 }
 0x3d4   : > { %v3314_v12 = vadd.f32 %v3313_v41, %v3264_v45  ;;  %v3449_v62 = vadd.f32 %v3410_v60, %v8441_v8 }
 0x3d5   : > { %v3267_v18 = vpop.f32.mrf.mxu0  ;;  %4172 = vmatpush.bf16.msrb.mxu0 %v6801_v59 }
 0x3d6   : > { %v3450_v31 = vadd.f32 %v3314_v12, %v8443_v16  ;;  %v3487_v63 = vadd.f32 %v9219_v24, %v3449_v62  ;;  %v7412_v12 = vld [vmem:[#allocation7 + $0xd4] sm:$0xf0] }
 0x3d7   : > { %v6865_v60 = vor.u32 %v7412_v12, %v6864_v61 }
 0x3d8   : > { %v3488_v28 = vadd.f32 %v9213_v57, %v3450_v31 }
 0x3d9   : > { %v3411_v51 = vpop.f32.mrf.mxu3  ;;  %4221 = vmatpush.bf16.msra.mxu1 %v6865_v60 }
 0x3da   : > { %v3412_v5 = vadd.f32 %v3411_v51, %v3362_v21  ;;  %v3516_v0 = vpack.c.bf16 %v3488_v28, %v3486_v46 }
 0x3db   : > { %v3316_v30 = vpop.f32.mrf.mxu1  ;;  %v3365_v34 = vpop.f32.mrf.mxu2 }
 0x3dc   : > { %v3451_v16 = vadd.f32 %v3412_v5, %v8451_v19  ;;  %3741 = vmatmul.bf16.gmra.mxu0 %v3516_v0  ;;  %3839 = vmatmul.bf16.gmra.mxu2 %v3516_v0  ;;  %v3317_v54 = vadd.f32 %v3316_v30, %v3267_v18 }
 0x3dd   : > { %v3269_v29 = vpop.f32.mrf.mxu0 }
 0x3de   : > { %v3489_v37 = vadd.f32 %v9219_v24, %v3451_v16  ;;  %v3452_v10 = vadd.f32 %v3317_v54, %v8476_v38  ;;  %v6792_v16 = vld [vmem:[#allocation7 + $0x40] sm:$0xf] }
 0x3e0   : > { %v3517_v15 = vpack.c.bf16 %v3489_v37, %v3487_v63  ;;  %v3490_v41 = vadd.f32 %v9213_v57, %v3452_v10 }
 0x3e1   : > { %v3414_v7 = vpop.f32.mrf.mxu3 }
 0x3e2   : > { %3790 = vmatmul.bf16.gmra.mxu1 %v3517_v15  ;;  %3888 = vmatmul.bf16.gmra.mxu3 %v3517_v15  ;;  %v3415_v33 = vadd.f32 %v3414_v7, %v3365_v34  ;;  %v6856_v15 = vld [vmem:[#allocation7 + $0xc0] sm:$0xf]  ;;  %v7410_v7 = vld [vmem:[#allocation7 + $0xc4] sm:$0xf0] }
 0x3e3   : > { %v3318_v8 = vpop.f32.mrf.mxu1  ;;  %v3367_v48 = vpop.f32.mrf.mxu2 }
 0x3e4   : > { %v3319_v45 = vadd.f32 %v3318_v8, %v3269_v29  ;;  %v3453_v31 = vadd.f32 %v3415_v33, %v8479_v43  ;;  %v7394_v29 = vld [vmem:[#allocation7 + $0x44] sm:$0xf0] }
 0x3e5   : > { %v3272_v22 = vpop.f32.mrf.mxu0  ;;  %v6793_v63 = vor.u32 %v7394_v29, %v6792_v16 }
 0x3e6   : > { %v3454_v19 = vadd.f32 %v3319_v45, %v8481_v42  ;;  %v3491_v28 = vadd.f32 %v9219_v24, %v3453_v31 }
 0x3e7   : > { %4173 = vmatpush.bf16.msrb.mxu0 %v6793_v63 }
 0x3e8   : > { %v3492_v21 = vadd.f32 %v9213_v57, %v3454_v19 }
 0x3e9   : > { %v3416_v18 = vpop.f32.mrf.mxu3 }
 0x3ea   : > { %v3417_v38 = vadd.f32 %v3416_v18, %v3367_v48  ;;  %v3518_v47 = vpack.c.bf16 %v3492_v21, %v3490_v41  ;;  %v6857_v48 = vor.u32 %v7410_v7, %v6856_v15  ;;  %v6776_v7 = vld [vmem:[#allocation7 + $0x20] sm:$0xf] }
 0x3eb   : > { %v3321_v11 = vpop.f32.mrf.mxu1  ;;  %v3370_v1 = vpop.f32.mrf.mxu2 }
 0x3ec   : > { %v3455_v42 = vadd.f32 %v3417_v38, %v8489_v53  ;;  %3746 = vmatmul.bf16.gmra.mxu0 %v3518_v47  ;;  %3844 = vmatmul.bf16.gmra.mxu2 %v3518_v47  ;;  %v3322_v6 = vadd.f32 %v3321_v11, %v3272_v22  ;;  %v6784_v38 = vld [vmem:[#allocation7 + $0x30] sm:$0xf]  ;;  %v7392_v47 = vld [vmem:[#allocation7 + $0x34] sm:$0xf0] }
 0x3ed   : > { %v3274_v46 = vpop.f32.mrf.mxu0  ;;  %4222 = vmatpush.bf16.msra.mxu1 %v6857_v48  ;;  %v6785_v11 = vor.u32 %v7392_v47, %v6784_v38 }
 0x3ee   : > { %v3493_v25 = vadd.f32 %v9219_v24, %v3455_v42  ;;  %v3456_v5 = vadd.f32 %v3322_v6, %v8514_v4 }
 0x3ef   : > { %4174 = vmatpush.bf16.msrb.mxu0 %v6785_v11  ;;  %v7388_v11 = vld [vmem:[#allocation7 + $0x14] sm:$0xf0] }
 0x3f0   : > { %v3519_v51 = vpack.c.bf16 %v3493_v25, %v3491_v28  ;;  %v3494_v37 = vadd.f32 %v9213_v57, %v3456_v5  ;;  %v7408_v28 = vld [vmem:[#allocation7 + $0xb4] sm:$0xf0] }
 0x3f1   : > { %v3419_v3 = vpop.f32.mrf.mxu3 }
 0x3f2   : > { %3795 = vmatmul.bf16.gmra.mxu1 %v3519_v51  ;;  %3893 = vmatmul.bf16.gmra.mxu3 %v3519_v51  ;;  %v3420_v34 = vadd.f32 %v3419_v3, %v3370_v1 }
 0x3f3   : > { %v3323_v43 = vpop.f32.mrf.mxu1  ;;  %v3372_v62 = vpop.f32.mrf.mxu2 }
 0x3f4   : > { %v3324_v0 = vadd.f32 %v3323_v43, %v3274_v46  ;;  %v3457_v10 = vadd.f32 %v3420_v34, %v8517_v13  ;;  %v6848_v46 = vld [vmem:[#allocation7 + $0xb0] sm:$0xf] }
 0x3f5   : > { %v3277_v30 = vpop.f32.mrf.mxu0  ;;  %v6849_v6 = vor.u32 %v7408_v28, %v6848_v46  ;;  %v7404_v28 = vld [vmem:[#allocation7 + $0x94] sm:$0xf0] }
 0x3f6   : > { %v3458_v53 = vadd.f32 %v3324_v0, %v8519_v17  ;;  %v3495_v39 = vadd.f32 %v9219_v24, %v3457_v10 }
 0x3f7   : > { %4223 = vmatpush.bf16.msra.mxu1 %v6849_v6  ;;  %v6882_v6 = vld [vmem:[#allocation7 + $0xf8] sm:$0xf0] }
 0x3f8   : > { %v3496_v54 = vadd.f32 %v9213_v57, %v3458_v53 }
 0x3f9   : > { %v3421_v8 = vpop.f32.mrf.mxu3 }
 0x3fa   : > { %v3422_v4 = vadd.f32 %v3421_v8, %v3372_v62  ;;  %v3520_v45 = vpack.c.bf16 %v3496_v54, %v3494_v37  ;;  %v7390_v8 = vld [vmem:[#allocation7 + $0x24] sm:$0xf0] }
 0x3fb   : > { %v3326_v22 = vpop.f32.mrf.mxu1  ;;  %v3375_v33 = vpop.f32.mrf.mxu2  ;;  %v6777_v48 = vor.u32 %v7390_v8, %v6776_v7 }
 0x3fc   : > { %v3459_v17 = vadd.f32 %v3422_v4, %v8527_v23  ;;  %3751 = vmatmul.bf16.gmra.mxu0 %v3520_v45  ;;  %3849 = vmatmul.bf16.gmra.mxu2 %v3520_v45  ;;  %v3327_v59 = vadd.f32 %v3326_v22, %v3277_v30  ;;  %v6840_v45 = vld [vmem:[#allocation7 + $0xa0] sm:$0xf]  ;;  %v7406_v22 = vld [vmem:[#allocation7 + $0xa4] sm:$0xf0] }
 0x3fd   : > { %v3279_v19 = vpop.f32.mrf.mxu0  ;;  %4175 = vmatpush.bf16.msrb.mxu0 %v6777_v48 }
 0x3fe   : > { %v3497_v26 = vadd.f32 %v9219_v24, %v3459_v17  ;;  %v3460_v12 = vadd.f32 %v3327_v59, %v8548_v40  ;;  %v6841_v17 = vor.u32 %v7406_v22, %v6840_v45 }
 0x400   : > { %v3521_v41 = vpack.c.bf16 %v3497_v26, %v3495_v39  ;;  %v3498_v1 = vadd.f32 %v9213_v57, %v3460_v12  ;;  %4224 = vmatpush.bf16.msra.mxu1 %v6841_v17  ;;  %v6786_v17 = vld [vmem:[#allocation7 + $0x38] sm:$0xf0] }
 0x401   : > { %v3424_v21 = vpop.f32.mrf.mxu3 }
 0x402   : > { %3800 = vmatmul.bf16.gmra.mxu1 %v3521_v41  ;;  %3898 = vmatmul.bf16.gmra.mxu3 %v3521_v41  ;;  %v3425_v31 = vadd.f32 %v3424_v21, %v3375_v33  ;;  %v7399_v41 = vld [vmem:[#allocation7 + $0x74] sm:$0xf]  ;;  %v6818_v21 = vld [vmem:[#allocation7 + $0x78] sm:$0xf0] }
 0x403   : > { %v3328_v13 = vpop.f32.mrf.mxu1  ;;  %v3377_v61 = vpop.f32.mrf.mxu2 }
 0x404   : > { %v3329_v18 = vadd.f32 %v3328_v13, %v3279_v19  ;;  %v3461_v51 = vadd.f32 %v3425_v31, %v8551_v58  ;;  %v6821_v13 = vor.u32 %v7399_v41, %v6818_v21  ;;  %v7397_v31 = vld [vmem:[#allocation7 + $0x64] sm:$0xf] }
 0x405   : > { %v3282_v60 = vpop.f32.mrf.mxu0 }
 0x406   : > { %v3462_v23 = vadd.f32 %v3329_v18, %v8553_v49  ;;  %v3499_v0 = vadd.f32 %v9219_v24, %v3461_v51  ;;  %4268 = vmatpush.bf16.msra.mxu2 %v6821_v13  ;;  %v7389_v13 = vld [vmem:[#allocation7 + $0x24] sm:$0xf] }
 0x408   : > { %v3500_v42 = vadd.f32 %v9213_v57, %v3462_v23  ;;  %v6810_v23 = vld [vmem:[#allocation7 + $0x68] sm:$0xf0] }
 0x409   : > { %v3426_v25 = vpop.f32.mrf.mxu3  ;;  %v6813_v47 = vor.u32 %v7397_v31, %v6810_v23 }
 0x40a   : > { %v3427_v40 = vadd.f32 %v3426_v25, %v3377_v61  ;;  %v3522_v3 = vpack.c.bf16 %v3500_v42, %v3498_v1  ;;  %v6832_v1 = vld [vmem:[#allocation7 + $0x90] sm:$0xf]  ;;  %v7415_v25 = vld [vmem:[#allocation7 + $0xf4] sm:$0xf] }
 0x40b   : > { %v3331_v43 = vpop.f32.mrf.mxu1  ;;  %v3380_v62 = vpop.f32.mrf.mxu2  ;;  %4269 = vmatpush.bf16.msra.mxu2 %v6813_v47  ;;  %v7402_v47 = vld [vmem:[#allocation7 + $0x84] sm:$0xf0] }
 0x40c   : > { %v3463_v49 = vadd.f32 %v3427_v40, %v8562_v55  ;;  %3756 = vmatmul.bf16.gmra.mxu0 %v3522_v3  ;;  %3854 = vmatmul.bf16.gmra.mxu2 %v3522_v3  ;;  %v3332_v34 = vadd.f32 %v3331_v43, %v3282_v60  ;;  %v6833_v3 = vor.u32 %v7404_v28, %v6832_v1 }
 0x40d   : > { %v3284_v5 = vpop.f32.mrf.mxu0  ;;  %v6885_v43 = vor.u32 %v7415_v25, %v6882_v6  ;;  %v7387_v25 = vld [vmem:[#allocation7 + $0x14] sm:$0xf]  ;;  %v6770_v6 = vld [vmem:[#allocation7 + $0x18] sm:$0xf0] }
 0x40e   : > { %v3501_v30 = vadd.f32 %v9219_v24, %v3463_v49  ;;  %v3464_v63 = vadd.f32 %v3332_v34, %v8583_v9  ;;  %v6802_v49 = vld [vmem:[#allocation7 + $0x58] sm:$0xf0]  ;;  %4225 = vmatpush.bf16.msra.mxu1 %v6833_v3 }
 0x40f   : > { %4317 = vmatpush.bf16.msra.mxu3 %v6885_v43  ;;  %v7405_v43 = vld [vmem:[#allocation7 + $0xa4] sm:$0xf] }
 0x410   : > { %v3523_v53 = vpack.c.bf16 %v3501_v30, %v3499_v0  ;;  %v3502_v10 = vadd.f32 %v9213_v57, %v3464_v63  ;;  %v7393_v63 = vld [vmem:[#allocation7 + $0x44] sm:$0xf] }
 0x411   : > { %v3429_v16 = vpop.f32.mrf.mxu3 }
 0x412   : > { %3805 = vmatmul.bf16.gmra.mxu1 %v3523_v53  ;;  %3903 = vmatmul.bf16.gmra.mxu3 %v3523_v53  ;;  %v3430_v15 = vadd.f32 %v3429_v16, %v3380_v62  ;;  %v7395_v62 = vld [vmem:[#allocation7 + $0x54] sm:$0xf]  ;;  %v7413_v53 = vld [vmem:[#allocation7 + $0xe4] sm:$0xf]  ;;  %v6874_v16 = vld [vmem:[#allocation7 + $0xe8] sm:$0xf0] }
 0x413   : > { %v3333_v58 = vpop.f32.mrf.mxu1  ;;  %v3382_v29 = vpop.f32.mrf.mxu2  ;;  %v6805_v0 = vor.u32 %v7395_v62, %v6802_v49  ;;  %v6842_v62 = vld [vmem:[#allocation7 + $0xa8] sm:$0xf0] }
 0x414   : > { %v3334_v37 = vadd.f32 %v3333_v58, %v3284_v5  ;;  %v3465_v19 = vadd.f32 %v3430_v15, %v8586_v2  ;;  %v6877_v58 = vor.u32 %v7413_v53, %v6874_v16  ;;  %v6845_v49 = vor.u32 %v7405_v43, %v6842_v62 }
 0x415   : > { %v3287_v54 = vpop.f32.mrf.mxu0  ;;  %4270 = vmatpush.bf16.msra.mxu2 %v6805_v0  ;;  %v7385_v0 = vld [vmem:[#allocation7 + $0x4] sm:$0xf] }
 0x416   : > { %v3466_v55 = vadd.f32 %v3334_v37, %v8588_v36  ;;  %v3503_v61 = vadd.f32 %v9219_v24, %v3465_v19  ;;  %v6794_v37 = vld [vmem:[#allocation7 + $0x48] sm:$0xf0]  ;;  %4318 = vmatpush.bf16.msra.mxu3 %v6877_v58 }
 0x418   : > { %v3504_v4 = vadd.f32 %v9213_v57, %v3466_v55  ;;  %v6797_v55 = vor.u32 %v7393_v63, %v6794_v37  ;;  %v6834_v63 = vld [vmem:[#allocation7 + $0x98] sm:$0xf0] }
 0x419   : > { %v3431_v33 = vpop.f32.mrf.mxu3 }
 0x41a   : > { %v3432_v9 = vadd.f32 %v3431_v33, %v3382_v29  ;;  %v3524_v39 = vpack.c.bf16 %v3504_v4, %v3502_v10  ;;  %v6866_v10 = vld [vmem:[#allocation7 + $0xd8] sm:$0xf0]  ;;  %4271 = vmatpush.bf16.msra.mxu2 %v6797_v55  ;;  %v7391_v33 = vld [vmem:[#allocation7 + $0x34] sm:$0xf]  ;;  %v7401_v55 = vld [vmem:[#allocation7 + $0x84] sm:$0xf] }
 0x41b   : > { %v3336_v26 = vpop.f32.mrf.mxu1  ;;  %v3385_v59 = vpop.f32.mrf.mxu2  ;;  %v6789_v19 = vor.u32 %v7391_v33, %v6786_v17 }
 0x41c   : > { %v3467_v36 = vadd.f32 %v3432_v9, %v8609_v32  ;;  %3761 = vmatmul.bf16.gmra.mxu0 %v3524_v39  ;;  %3859 = vmatmul.bf16.gmra.mxu2 %v3524_v39  ;;  %v3337_v60 = vadd.f32 %v3336_v26, %v3287_v54  ;;  %v6768_v32 = vld [vmem:[#allocation7 + $0x10] sm:$0xf]  ;;  %v6858_v26 = vld [vmem:[#allocation7 + $0xc8] sm:$0xf0] }
 0x41d   : > { %v3289_v18 = vpop.f32.mrf.mxu0  ;;  %v6769_v46 = vor.u32 %v7388_v11, %v6768_v32  ;;  %v7407_v32 = vld [vmem:[#allocation7 + $0xb4] sm:$0xf]  ;;  %v6850_v11 = vld [vmem:[#allocation7 + $0xb8] sm:$0xf0] }
 0x41e   : > { %v3505_v12 = vadd.f32 %v9219_v24, %v3467_v36  ;;  %v3468_v51 = vadd.f32 %v3337_v60, %v8619_v50  ;;  %4272 = vmatpush.bf16.msra.mxu2 %v6789_v19  ;;  %v7386_v60 = vld [vmem:[#allocation7 + $0x4] sm:$0xf0]  ;;  %v6853_v28 = vor.u32 %v7407_v32, %v6850_v11  ;;  %v6960_v32 = vld [vmem:[%s9905_s18 + $0x90] sm:$0xf]  ;;  %v7436_v11 = vld [vmem:[%s9905_s18 + $0x98] sm:$0xf0] }
 0x41f   : > { %4176 = vmatpush.bf16.msrb.mxu0 %v6769_v46 }
 0x420   : > { %v3525_v2 = vpack.c.bf16 %v3505_v12, %v3503_v61  ;;  %v3506_v29 = vadd.f32 %v9213_v57, %v3468_v51  ;;  %v6778_v61 = vld [vmem:[#allocation7 + $0x28] sm:$0xf0]  ;;  %v6773_v51 = vor.u32 %v7387_v25, %v6770_v6 }
 0x421   : > { %v3434_v38 = vpop.f32.mrf.mxu3  ;;  %v6781_v12 = vor.u32 %v7389_v13, %v6778_v61 }
 0x422   : > { %3810 = vmatmul.bf16.gmra.mxu1 %v3525_v2  ;;  %3908 = vmatmul.bf16.gmra.mxu3 %v3525_v2  ;;  %v3435_v30 = vadd.f32 %v3434_v38, %v3385_v59  ;;  %v6824_v2 = vld [vmem:[#allocation7 + $0x80] sm:$0xf] }
 0x423   : > { %v3338_v42 = vpop.f32.mrf.mxu1  ;;  %v3387_v5 = vpop.f32.mrf.mxu2  ;;  %4273 = vmatpush.bf16.msra.mxu2 %v6781_v12  ;;  %v6825_v46 = vor.u32 %v7402_v47, %v6824_v2 }
 0x424   : > { %v3339_v40 = vadd.f32 %v3338_v42, %v3289_v18  ;;  %v3469_v7 = vadd.f32 %v3435_v30, %v8622_v52  ;;  %v7409_v52 = vld [vmem:[#allocation7 + $0xc4] sm:$0xf]  ;;  %v6760_v18 = vld [vmem:[#allocation7] sm:$0xf]  ;;  %v6762_v30 = vld [vmem:[#allocation7 + $0x8] sm:$0xf0] }
 0x425   : > { %v3292_v54 = vpop.f32.mrf.mxu0  ;;  %v6861_v36 = vor.u32 %v7409_v52, %v6858_v26  ;;  %v6761_v38 = vor.u32 %v7386_v60, %v6760_v18  ;;  %4226 = vmatpush.bf16.msra.mxu1 %v6825_v46  ;;  %v6765_v16 = vor.u32 %v7385_v0, %v6762_v30 }
 0x426   : > { %v3470_v34 = vadd.f32 %v3339_v40, %v8624_v56  ;;  %v7411_v56 = vld [vmem:[#allocation7 + $0xd4] sm:$0xf]  ;;  %v3507_v9 = vadd.f32 %v9219_v24, %v3469_v7  ;;  %v6826_v7 = vld [vmem:[#allocation7 + $0x88] sm:$0xf0] }
 0x427   : > { %v6869_v45 = vor.u32 %v7411_v56, %v6866_v10  ;;  %4177 = vmatpush.bf16.msrb.mxu0 %v6761_v38  ;;  %4274 = vmatpush.bf16.msra.mxu2 %v6773_v51  ;;  %v3562_v56 = vld [vmem:[%s9902_s15] sm:$0x3] }
 0x428   : > { %v3508_v50 = vadd.f32 %v9213_v57, %v3470_v34 }
 0x429   : > { %v3436_v15 = vpop.f32.mrf.mxu3  ;;  %4319 = vmatpush.bf16.msra.mxu3 %v6869_v45  ;;  %v7439_v45 = vld [vmem:[%s9905_s18 + $0xb0] sm:$0xf0] }
 0x42a   : > { %v3437_v8 = vadd.f32 %v3436_v15, %v3387_v5  ;;  %v3526_v48 = vpack.c.bf16 %v3508_v50, %v3506_v29 }
 0x42b   : > { %v3341_v4 = vpop.f32.mrf.mxu1  ;;  %v3390_v59 = vpop.f32.mrf.mxu2  ;;  %4275 = vmatpush.bf16.msra.mxu2 %v6765_v16 }
 0x42c   : > { %v3471_v22 = vadd.f32 %v3437_v8, %v8646_v14  ;;  %3766 = vmatmul.bf16.gmra.mxu0 %v3526_v48  ;;  %3864 = vmatmul.bf16.gmra.mxu2 %v3526_v48  ;;  %v3342_v41 = vadd.f32 %v3341_v4, %v3292_v54  ;;  %v6829_v8 = vor.u32 %v7401_v55, %v6826_v7  ;;  %v9283_v4 = vperm.slane %v3562_v56, 0 }
 0x42d   : > { %v3294_v31 = vpop.f32.mrf.mxu0  ;;  %4320 = vmatpush.bf16.msra.mxu3 %v6861_v36 }
 0x42e   : > { %v3509_v39 = vadd.f32 %v9219_v24, %v3471_v22  ;;  %v3472_v1 = vadd.f32 %v3342_v41, %v8648_v44 }
 0x430   : > { %v3527_v21 = vpack.c.bf16 %v3509_v39, %v3507_v9  ;;  %v3510_v5 = vadd.f32 %v9213_v57, %v3472_v1  ;;  %v9292_v39 = vperm.slane %v3562_v56, 1 }
 0x431   : > { %v3439_v14 = vpop.f32.mrf.mxu3  ;;  %4321 = vmatpush.bf16.msra.mxu3 %v6853_v28 }
 0x432   : > { %3815 = vmatmul.bf16.gmra.mxu1 %v3527_v21  ;;  %3913 = vmatmul.bf16.gmra.mxu3 %v3527_v21  ;;  %v3440_v40 = vadd.f32 %v3439_v14, %v3390_v59 }
 0x433   : > { %v3343_v23 = vpop.f32.mrf.mxu1  ;;  %v3392_v34 = vpop.f32.mrf.mxu2 }
 0x434   : > { %v3344_v42 = vadd.f32 %v3343_v23, %v3294_v31  ;;  %v3473_v58 = vadd.f32 %v3440_v40, %v8659_v20 }
 0x435   : > { %4322 = vmatpush.bf16.msra.mxu3 %v6845_v49 }
 0x436   : > { %v3474_v3 = vadd.f32 %v3344_v42, %v8657_v27  ;;  %v7403_v27 = vld [vmem:[#allocation7 + $0x94] sm:$0xf]  ;;  %v6961_v42 = vor.u32 %v7436_v11, %v6960_v32 }
 0x437   : > { %v6837_v37 = vor.u32 %v7403_v27, %v6834_v63  ;;  %v6948_v63 = vld [vmem:[%s9905_s18 + $0x78] sm:$0xf] }
 0x438   : > { %v3512_v44 = vadd.f32 %v9213_v57, %v3474_v3  ;;  %v3511_v57 = vadd.f32 %v9219_v24, %v3473_v58 }
 0x439   : > { %v3441_v53 = vpop.f32.mrf.mxu3  ;;  %4323 = vmatpush.bf16.msra.mxu3 %v6837_v37  ;;  %v7433_v37 = vld [vmem:[%s9905_s18 + $0x80] sm:$0xf0] }
 0x43a   : > { %v3442_v29 = vadd.f32 %v3441_v53, %v3392_v34  ;;  %v3528_v50 = vpack.c.bf16 %v3512_v44, %v3510_v5 }
 0x43c   : > { %v3475_v54 = vadd.f32 %v3442_v29, %v8664_v35  ;;  %3771 = vmatmul.bf16.gmra.mxu0 %v3528_v50  ;;  %3869 = vmatmul.bf16.gmra.mxu2 %v3528_v50 }
 0x43d   : > { %4324 = vmatpush.bf16.msra.mxu3 %v6829_v8 }
 0x43e   : > { %v3513_v15 = vadd.f32 %v9219_v24, %v3475_v54  ;;  %v6972_v24 = vld [vmem:[%s9905_s18 + $0xa8] sm:$0xf] }
 0x43f   : > { %v6973_v33 = vor.u32 %v7439_v45, %v6972_v24 }
 0x440   : > { %v3529_v20 = vpack.c.bf16 %v3513_v15, %v3511_v57  ;;  %v6949_v57 = vor.u32 %v7433_v37, %v6948_v63 }
 0x441   : > { %4710 = vmatpush.bf16.msra.mxu0 %v6973_v33 }
 0x442   : > { %3820 = vmatmul.bf16.gmra.mxu1 %v3529_v20  ;;  %3918 = vmatmul.bf16.gmra.mxu3 %v3529_v20 }
 0x445   : > { %4711 = vmatpush.bf16.msra.mxu0 %v6961_v42 }
 0x449   : > { %v3737_v48 = vpop.f32.mrf.mxu0  ;;  %4712 = vmatpush.bf16.msra.mxu0 %v6949_v57 }
 0x44a   : > { %v3738_v17 = vadd.f32 %v3737_v48, %v9283_v4 }
 0x44f   : > { %v3786_v35 = vpop.f32.mrf.mxu1  ;;  %v3835_v10 = vpop.f32.mrf.mxu2 }
 0x450   : > { %v3787_v9 = vadd.f32 %v3786_v35, %v3738_v17  ;;  %v3836_v13 = vadd.f32 %v3835_v10, %v9292_v39 }
 0x451   : > { %v3739_v22 = vpop.f32.mrf.mxu0 }
 0x452   : > { %v3740_v52 = vadd.f32 %v3739_v22, %v9283_v4  ;;  %v3924_v21 = vmax.f32 %v3787_v9, 0.0 }
 0x455   : > { %v3884_v19 = vpop.f32.mrf.mxu3 }
 0x456   : > { %v3885_v14 = vadd.f32 %v3884_v19, %v3836_v13  ;;  %v7430_v13 = vld [vmem:[%s9905_s18 + $0x68] sm:$0xf0] }
 0x457   : > { %v3788_v26 = vpop.f32.mrf.mxu1  ;;  %v3837_v59 = vpop.f32.mrf.mxu2 }
 0x458   : > { %v3789_v36 = vadd.f32 %v3788_v26, %v3740_v52  ;;  %v3838_v18 = vadd.f32 %v3837_v59, %v9292_v39  ;;  %v3925_v38 = vmax.f32 %v3885_v14, 0.0 }
 0x459   : > { %v3742_v41 = vpop.f32.mrf.mxu0 }
 0x45a   : > { %v3926_v61 = vmax.f32 %v3789_v36, 0.0  ;;  %v3743_v28 = vadd.f32 %v3742_v41, %v9283_v4 }
 0x45c   : > { %v3956_v12 = vpack.c.bf16 %v3926_v61, %v3924_v21  ;;  %v6936_v21 = vld [vmem:[%s9905_s18 + $0x60] sm:$0xf] }
 0x45d   : > { %v3886_v60 = vpop.f32.mrf.mxu3  ;;  %v6937_v14 = vor.u32 %v7430_v13, %v6936_v21 }
 0x45e   : > { %v3887_v2 = vadd.f32 %v3886_v60, %v3838_v18  ;;  %4178 = vmatmul.bf16.vlgmr.msrb.gmra.mxu0 %v3956_v12  ;;  %4276 = vmatmul.bf16.vlgmr.msra.gmra.mxu2 %v3956_v12 }
 0x45f   : > { %v3791_v31 = vpop.f32.mrf.mxu1  ;;  %v3840_v23 = vpop.f32.mrf.mxu2  ;;  %4713 = vmatpush.bf16.msra.mxu0 %v6937_v14 }
 0x460   : > { %v3927_v47 = vmax.f32 %v3887_v2, 0.0  ;;  %v3792_v6 = vadd.f32 %v3791_v31, %v3743_v28  ;;  %v3841_v5 = vadd.f32 %v3840_v23, %v9292_v39 }
 0x461   : > { %v3744_v1 = vpop.f32.mrf.mxu0 }
 0x462   : > { %v3957_v46 = vpack.c.bf16 %v3927_v47, %v3925_v38  ;;  %v3745_v51 = vadd.f32 %v3744_v1, %v9283_v4  ;;  %v3928_v49 = vmax.f32 %v3792_v6, 0.0 }
 0x464   : > { %4227 = vmatmul.bf16.vlgmr.msra.gmra.mxu1 %v3957_v46  ;;  %4325 = vmatmul.bf16.vlgmr.msra.gmra.mxu3 %v3957_v46 }
 0x465   : > { %v3889_v25 = vpop.f32.mrf.mxu3 }
 0x466   : > { %v3890_v0 = vadd.f32 %v3889_v25, %v3841_v5  ;;  %v7427_v5 = vld [vmem:[%s9905_s18 + $0x50] sm:$0xf0] }
 0x467   : > { %v3793_v40 = vpop.f32.mrf.mxu1  ;;  %v3842_v3 = vpop.f32.mrf.mxu2 }
 0x468   : > { %v3794_v43 = vadd.f32 %v3793_v40, %v3745_v51  ;;  %v3843_v30 = vadd.f32 %v3842_v3, %v9292_v39  ;;  %v3929_v50 = vmax.f32 %v3890_v0, 0.0 }
 0x469   : > { %v3747_v62 = vpop.f32.mrf.mxu0 }
 0x46a   : > { %v3930_v44 = vmax.f32 %v3794_v43, 0.0  ;;  %v3748_v55 = vadd.f32 %v3747_v62, %v9283_v4 }
 0x46c   : > { %v3958_v34 = vpack.c.bf16 %v3930_v44, %v3928_v49  ;;  %v6924_v49 = vld [vmem:[%s9905_s18 + $0x48] sm:$0xf] }
 0x46d   : > { %v3891_v53 = vpop.f32.mrf.mxu3  ;;  %v6925_v0 = vor.u32 %v7427_v5, %v6924_v49  ;;  %v7070_v49 = vld [vmem:[%s9905_s18 + $0x174] sm:$0xf0] }
 0x46e   : > { %v3892_v16 = vadd.f32 %v3891_v53, %v3843_v30  ;;  %4183 = vmatmul.bf16.gmra.mxu0 %v3958_v34  ;;  %4281 = vmatmul.bf16.gmra.mxu2 %v3958_v34 }
 0x46f   : > { %v3796_v58 = vpop.f32.mrf.mxu1  ;;  %v3845_v29 = vpop.f32.mrf.mxu2  ;;  %4714 = vmatpush.bf16.msra.mxu0 %v6925_v0  ;;  %v7463_v0 = vld [vmem:[%s9905_s18 + $0x170] sm:$0xf0] }
 0x470   : > { %v3931_v27 = vmax.f32 %v3892_v16, 0.0  ;;  %v3797_v8 = vadd.f32 %v3796_v58, %v3748_v55  ;;  %v3846_v45 = vadd.f32 %v3845_v29, %v9292_v39 }
 0x471   : > { %v3749_v54 = vpop.f32.mrf.mxu0 }
 0x472   : > { %v3959_v15 = vpack.c.bf16 %v3931_v27, %v3929_v50  ;;  %v3750_v20 = vadd.f32 %v3749_v54, %v9283_v4  ;;  %v3932_v24 = vmax.f32 %v3797_v8, 0.0 }
 0x474   : > { %4232 = vmatmul.bf16.gmra.mxu1 %v3959_v15  ;;  %4330 = vmatmul.bf16.gmra.mxu3 %v3959_v15 }
 0x475   : > { %v3894_v7 = vpop.f32.mrf.mxu3 }
 0x476   : > { %v3895_v33 = vadd.f32 %v3894_v7, %v3846_v45  ;;  %v7424_v45 = vld [vmem:[%s9905_s18 + $0x38] sm:$0xf0] }
 0x477   : > { %v3798_v48 = vpop.f32.mrf.mxu1  ;;  %v3847_v56 = vpop.f32.mrf.mxu2 }
 0x478   : > { %v3799_v35 = vadd.f32 %v3798_v48, %v3750_v20  ;;  %v3848_v17 = vadd.f32 %v3847_v56, %v9292_v39  ;;  %v3933_v36 = vmax.f32 %v3895_v33, 0.0 }
 0x479   : > { %v3752_v10 = vpop.f32.mrf.mxu0 }
 0x47a   : > { %v3934_v22 = vmax.f32 %v3799_v35, 0.0  ;;  %v3753_v18 = vadd.f32 %v3752_v10, %v9283_v4 }
 0x47c   : > { %v3960_v19 = vpack.c.bf16 %v3934_v22, %v3932_v24  ;;  %v6912_v24 = vld [vmem:[%s9905_s18 + $0x30] sm:$0xf] }
 0x47d   : > { %v3896_v9 = vpop.f32.mrf.mxu3  ;;  %v6913_v33 = vor.u32 %v7424_v45, %v6912_v24 }
 0x47e   : > { %v3897_v52 = vadd.f32 %v3896_v9, %v3848_v17  ;;  %4188 = vmatmul.bf16.gmra.mxu0 %v3960_v19  ;;  %4286 = vmatmul.bf16.gmra.mxu2 %v3960_v19 }
 0x47f   : > { %v3801_v26 = vpop.f32.mrf.mxu1  ;;  %v3850_v59 = vpop.f32.mrf.mxu2  ;;  %4715 = vmatpush.bf16.msra.mxu0 %v6913_v33  ;;  %v7044_v33 = vld [vmem:[%s9905_s18 + $0x138] sm:$0xf] }
 0x480   : > { %v3935_v41 = vmax.f32 %v3897_v52, 0.0  ;;  %v3802_v2 = vadd.f32 %v3801_v26, %v3753_v18  ;;  %v3851_v1 = vadd.f32 %v3850_v59, %v9292_v39 }
 0x481   : > { %v3754_v61 = vpop.f32.mrf.mxu0 }
 0x482   : > { %v3961_v12 = vpack.c.bf16 %v3935_v41, %v3933_v36  ;;  %v3755_v31 = vadd.f32 %v3754_v61, %v9283_v4  ;;  %v3936_v11 = vmax.f32 %v3802_v2, 0.0  ;;  %v7438_v2 = vld [vmem:[%s9905_s18 + $0xac] sm:$0xf] }
 0x484   : > { %4237 = vmatmul.bf16.gmra.mxu1 %v3961_v12  ;;  %4335 = vmatmul.bf16.gmra.mxu3 %v3961_v12 }
 0x485   : > { %v3899_v60 = vpop.f32.mrf.mxu3 }
 0x486   : > { %v3900_v46 = vadd.f32 %v3899_v60, %v3851_v1 }
 0x487   : > { %v3803_v23 = vpop.f32.mrf.mxu1  ;;  %v3852_v38 = vpop.f32.mrf.mxu2 }
 0x488   : > { %v3804_v47 = vadd.f32 %v3803_v23, %v3755_v31  ;;  %v3853_v28 = vadd.f32 %v3852_v38, %v9292_v39  ;;  %v3937_v43 = vmax.f32 %v3900_v46, 0.0  ;;  %v6974_v31 = vld [vmem:[%s9905_s18 + $0xb4] sm:$0xf0] }
 0x489   : > { %v3757_v32 = vpop.f32.mrf.mxu0  ;;  %v6977_v38 = vor.u32 %v7438_v2, %v6974_v31  ;;  %v6900_v46 = vld [vmem:[%s9905_s18 + $0x18] sm:$0xf]  ;;  %v7032_v31 = vld [vmem:[%s9905_s18 + $0x120] sm:$0xf] }
 0x48a   : > { %v3938_v42 = vmax.f32 %v3804_v47, 0.0  ;;  %v3758_v34 = vadd.f32 %v3757_v32, %v9283_v4 }
 0x48b   : > { %4808 = vmatpush.bf16.msrb.mxu2 %v6977_v38  ;;  %v7453_v38 = vld [vmem:[%s9905_s18 + $0x124] sm:$0xf] }
 0x48c   : > { %v3962_v25 = vpack.c.bf16 %v3938_v42, %v3936_v11 }
 0x48d   : > { %v3901_v6 = vpop.f32.mrf.mxu3 }
 0x48e   : > { %v3902_v51 = vadd.f32 %v3901_v6, %v3853_v28  ;;  %4193 = vmatmul.bf16.gmra.mxu0 %v3962_v25  ;;  %4291 = vmatmul.bf16.gmra.mxu2 %v3962_v25  ;;  %v7421_v28 = vld [vmem:[%s9905_s18 + $0x20] sm:$0xf0] }
 0x48f   : > { %v3806_v40 = vpop.f32.mrf.mxu1  ;;  %v3855_v3 = vpop.f32.mrf.mxu2  ;;  %v6901_v6 = vor.u32 %v7421_v28, %v6900_v46  ;;  %v7423_v28 = vld [vmem:[%s9905_s18 + $0x34] sm:$0xf] }
 0x490   : > { %v3939_v62 = vmax.f32 %v3902_v51, 0.0  ;;  %v3807_v16 = vadd.f32 %v3806_v40, %v3758_v34  ;;  %v3856_v54 = vadd.f32 %v3855_v3, %v9292_v39  ;;  %v7435_v51 = vld [vmem:[%s9905_s18 + $0x94] sm:$0xf]  ;;  %v6962_v40 = vld [vmem:[%s9905_s18 + $0x9c] sm:$0xf0] }
 0x491   : > { %v3759_v44 = vpop.f32.mrf.mxu0  ;;  %4716 = vmatpush.bf16.msra.mxu0 %v6901_v6 }
 0x492   : > { %v3963_v30 = vpack.c.bf16 %v3939_v62, %v3937_v43  ;;  %v3760_v58 = vadd.f32 %v3759_v44, %v9283_v4  ;;  %v3940_v37 = vmax.f32 %v3807_v16, 0.0  ;;  %v6965_v43 = vor.u32 %v7435_v51, %v6962_v40  ;;  %v7462_v62 = vld [vmem:[%s9905_s18 + $0x16c] sm:$0xf]  ;;  %v7068_v44 = vld [vmem:[%s9905_s18 + $0x168] sm:$0xf] }
 0x493   : > { %v7073_v5 = vor.u32 %v7462_v62, %v7070_v49  ;;  %v7069_v34 = vor.u32 %v7463_v0, %v7068_v44  ;;  %v6950_v16 = vld [vmem:[%s9905_s18 + $0x84] sm:$0xf0]  ;;  %v7022_v44 = vld [vmem:[%s9905_s18 + $0x114] sm:$0xf0] }
 0x494   : > { %4242 = vmatmul.bf16.gmra.mxu1 %v3963_v30  ;;  %4340 = vmatmul.bf16.gmra.mxu3 %v3963_v30 }
 0x495   : > { %v3904_v53 = vpop.f32.mrf.mxu3  ;;  %4809 = vmatpush.bf16.msrb.mxu2 %v6965_v43  ;;  %4857 = vmatpush.bf16.msrb.mxu3 %v7073_v5  ;;  %v7451_v43 = vld [vmem:[%s9905_s18 + $0x110] sm:$0xf0]  ;;  %v7450_v5 = vld [vmem:[%s9905_s18 + $0x10c] sm:$0xf] }
 0x496   : > { %v3905_v15 = vadd.f32 %v3904_v53, %v3856_v54  ;;  %v7432_v53 = vld [vmem:[%s9905_s18 + $0x7c] sm:$0xf]  ;;  %4759 = vmatpush.bf16.msrb.mxu1 %v7069_v34 }
 0x497   : > { %v3808_v29 = vpop.f32.mrf.mxu1  ;;  %v3857_v50 = vpop.f32.mrf.mxu2  ;;  %v7420_v34 = vld [vmem:[%s9905_s18 + $0x1c] sm:$0xf] }
 0x498   : > { %v3809_v27 = vadd.f32 %v3808_v29, %v3760_v58  ;;  %v3858_v55 = vadd.f32 %v3857_v50, %v9292_v39  ;;  %v3941_v35 = vmax.f32 %v3905_v15, 0.0  ;;  %v7056_v58 = vld [vmem:[%s9905_s18 + $0x150] sm:$0xf]  ;;  %v6953_v50 = vor.u32 %v7432_v53, %v6950_v16  ;;  %v6902_v53 = vld [vmem:[%s9905_s18 + $0x24] sm:$0xf0] }
 0x499   : > { %v3762_v63 = vpop.f32.mrf.mxu0 }
 0x49a   : > { %v3942_v57 = vmax.f32 %v3809_v27, 0.0  ;;  %v3763_v19 = vadd.f32 %v3762_v63, %v9283_v4  ;;  %v7460_v27 = vld [vmem:[%s9905_s18 + $0x158] sm:$0xf0]  ;;  %v7459_v63 = vld [vmem:[%s9905_s18 + $0x154] sm:$0xf]  ;;  %4810 = vmatpush.bf16.msrb.mxu2 %v6953_v50 }
 0x49b   : > { %v7057_v15 = vor.u32 %v7460_v27, %v7056_v58  ;;  %v6905_v58 = vor.u32 %v7420_v34, %v6902_v53  ;;  %v7008_v27 = vld [vmem:[%s9905_s18 + $0xf0] sm:$0xf]  ;;  %v6956_v53 = vld [vmem:[%s9905_s18 + $0x80] sm:$0xf] }
 0x49c   : > { %v3964_v7 = vpack.c.bf16 %v3942_v57, %v3940_v37  ;;  %v7058_v37 = vld [vmem:[%s9905_s18 + $0x15c] sm:$0xf0] }
 0x49d   : > { %v3906_v8 = vpop.f32.mrf.mxu3  ;;  %4760 = vmatpush.bf16.msrb.mxu1 %v7057_v15 }
 0x49e   : > { %v3907_v20 = vadd.f32 %v3906_v8, %v3858_v55  ;;  %4198 = vmatmul.bf16.gmra.mxu0 %v3964_v7  ;;  %4296 = vmatmul.bf16.gmra.mxu2 %v3964_v7  ;;  %v7061_v55 = vor.u32 %v7459_v63, %v7058_v37  ;;  %v7448_v63 = vld [vmem:[%s9905_s18 + $0xf8] sm:$0xf0]  ;;  %v7447_v37 = vld [vmem:[%s9905_s18 + $0xf4] sm:$0xf] }
 0x49f   : > { %v3811_v48 = vpop.f32.mrf.mxu1  ;;  %v3860_v56 = vpop.f32.mrf.mxu2 }
 0x4a0   : > { %v3943_v10 = vmax.f32 %v3907_v20, 0.0  ;;  %v3812_v52 = vadd.f32 %v3811_v48, %v3763_v19  ;;  %v3861_v61 = vadd.f32 %v3860_v56, %v9292_v39  ;;  %v7429_v48 = vld [vmem:[%s9905_s18 + $0x64] sm:$0xf]  ;;  %v6938_v56 = vld [vmem:[%s9905_s18 + $0x6c] sm:$0xf0]  ;;  %4858 = vmatpush.bf16.msrb.mxu3 %v7061_v55 }
 0x4a1   : > { %v3764_v22 = vpop.f32.mrf.mxu0 }
 0x4a2   : > { %v3965_v17 = vpack.c.bf16 %v3943_v10, %v3941_v35  ;;  %v3765_v26 = vadd.f32 %v3764_v22, %v9283_v4  ;;  %v3944_v13 = vmax.f32 %v3812_v52, 0.0  ;;  %v6941_v10 = vor.u32 %v7429_v48, %v6938_v56  ;;  %v7046_v52 = vld [vmem:[%s9905_s18 + $0x144] sm:$0xf0] }
 0x4a4   : > { %4247 = vmatmul.bf16.gmra.mxu1 %v3965_v17  ;;  %4345 = vmatmul.bf16.gmra.mxu3 %v3965_v17  ;;  %v7457_v17 = vld [vmem:[%s9905_s18 + $0x140] sm:$0xf0] }
 0x4a5   : > { %v3909_v9 = vpop.f32.mrf.mxu3  ;;  %v7045_v19 = vor.u32 %v7457_v17, %v7044_v33  ;;  %4811 = vmatpush.bf16.msrb.mxu2 %v6941_v10  ;;  %v7444_v33 = vld [vmem:[%s9905_s18 + $0xdc] sm:$0xf]  ;;  %v6998_v17 = vld [vmem:[%s9905_s18 + $0xe4] sm:$0xf0] }
 0x4a6   : > { %v3910_v12 = vadd.f32 %v3909_v9, %v3861_v61  ;;  %v7456_v9 = vld [vmem:[%s9905_s18 + $0x13c] sm:$0xf]  ;;  %v7426_v61 = vld [vmem:[%s9905_s18 + $0x4c] sm:$0xf] }
 0x4a7   : > { %v3813_v59 = vpop.f32.mrf.mxu1  ;;  %v3862_v36 = vpop.f32.mrf.mxu2  ;;  %4761 = vmatpush.bf16.msrb.mxu1 %v7045_v19 }
 0x4a8   : > { %v3814_v41 = vadd.f32 %v3813_v59, %v3765_v26  ;;  %v3863_v18 = vadd.f32 %v3862_v36, %v9292_v39  ;;  %v3945_v1 = vmax.f32 %v3910_v12, 0.0 }
 0x4a9   : > { %v3767_v21 = vpop.f32.mrf.mxu0 }
 0x4aa   : > { %v3946_v14 = vmax.f32 %v3814_v41, 0.0  ;;  %v3768_v30 = vadd.f32 %v3767_v21, %v9283_v4  ;;  %v7049_v41 = vor.u32 %v7456_v9, %v7046_v52  ;;  %v6888_v21 = vld [vmem:[%s9905_s18] sm:$0xf] }
 0x4ac   : > { %v3966_v60 = vpack.c.bf16 %v3946_v14, %v3944_v13  ;;  %v7418_v13 = vld [vmem:[%s9905_s18 + $0x8] sm:$0xf0]  ;;  %4859 = vmatpush.bf16.msrb.mxu3 %v7049_v41  ;;  %v6980_v41 = vld [vmem:[%s9905_s18 + $0xb0] sm:$0xf] }
 0x4ad   : > { %v3911_v23 = vpop.f32.mrf.mxu3  ;;  %v6889_v12 = vor.u32 %v7418_v13, %v6888_v21  ;;  %v7440_v21 = vld [vmem:[%s9905_s18 + $0xb8] sm:$0xf0]  ;;  %v6984_v13 = vld [vmem:[%s9905_s18 + $0xc0] sm:$0xf] }
 0x4ae   : > { %v3912_v47 = vadd.f32 %v3911_v23, %v3863_v18  ;;  %4203 = vmatmul.bf16.gmra.mxu0 %v3966_v60  ;;  %4301 = vmatmul.bf16.gmra.mxu2 %v3966_v60  ;;  %v6926_v18 = vld [vmem:[%s9905_s18 + $0x54] sm:$0xf0]  ;;  %v7454_v23 = vld [vmem:[%s9905_s18 + $0x128] sm:$0xf0] }
 0x4af   : > { %v3816_v32 = vpop.f32.mrf.mxu1  ;;  %v3865_v11 = vpop.f32.mrf.mxu2  ;;  %v6929_v2 = vor.u32 %v7426_v61, %v6926_v18  ;;  %4717 = vmatpush.bf16.msra.mxu0 %v6889_v12  ;;  %v7442_v61 = vld [vmem:[%s9905_s18 + $0xc8] sm:$0xf0]  ;;  %v6986_v12 = vld [vmem:[%s9905_s18 + $0xcc] sm:$0xf0] }
 0x4b0   : > { %v3947_v42 = vmax.f32 %v3912_v47, 0.0  ;;  %v3817_v54 = vadd.f32 %v3816_v32, %v3768_v30  ;;  %v3866_v45 = vadd.f32 %v3865_v11, %v9292_v39  ;;  %v7033_v11 = vor.u32 %v7454_v23, %v7032_v31 }
 0x4b1   : > { %v3769_v25 = vpop.f32.mrf.mxu0  ;;  %4812 = vmatpush.bf16.msrb.mxu2 %v6929_v2  ;;  %v7025_v30 = vor.u32 %v7450_v5, %v7022_v44  ;;  %v6985_v2 = vor.u32 %v7442_v61, %v6984_v13 }
 0x4b2   : > { %v3967_v3 = vpack.c.bf16 %v3947_v42, %v3945_v1  ;;  %v3770_v57 = vadd.f32 %v3769_v25, %v9283_v4  ;;  %v3948_v24 = vmax.f32 %v3817_v54, 0.0  ;;  %v7034_v1 = vld [vmem:[%s9905_s18 + $0x12c] sm:$0xf0]  ;;  %v6914_v25 = vld [vmem:[%s9905_s18 + $0x3c] sm:$0xf0]  ;;  %4762 = vmatpush.bf16.msrb.mxu1 %v7033_v11 }
 0x4b3   : > { %v7037_v6 = vor.u32 %v7453_v38, %v7034_v1  ;;  %v6917_v51 = vor.u32 %v7423_v28, %v6914_v25  ;;  %v4004_v1 = vld [vmem:[#allocation9] sm:$0x3] }
 0x4b4   : > { %4252 = vmatmul.bf16.gmra.mxu1 %v3967_v3  ;;  %4350 = vmatmul.bf16.gmra.mxu3 %v3967_v3  ;;  %v7020_v3 = vld [vmem:[%s9905_s18 + $0x108] sm:$0xf]  ;;  %v9523_v25 = vperm.slane %v4004_v1, 0 }
 0x4b5   : > { %v3914_v29 = vpop.f32.mrf.mxu3  ;;  %4860 = vmatpush.bf16.msrb.mxu3 %v7037_v6  ;;  %v7021_v49 = vor.u32 %v7451_v43, %v7020_v3  ;;  %4813 = vmatpush.bf16.msrb.mxu2 %v6917_v51 }
 0x4b6   : > { %v3915_v26 = vadd.f32 %v3914_v29, %v3866_v45  ;;  %v7445_v45 = vld [vmem:[%s9905_s18 + $0xe0] sm:$0xf0] }
 0x4b7   : > { %v3818_v7 = vpop.f32.mrf.mxu1  ;;  %v3867_v8 = vpop.f32.mrf.mxu2  ;;  %4763 = vmatpush.bf16.msrb.mxu1 %v7021_v49  ;;  %v9527_v49 = vperm.slane %v4004_v1, 1 }
 0x4b8   : > { %v3819_v20 = vadd.f32 %v3818_v7, %v3770_v57  ;;  %v3868_v59 = vadd.f32 %v3867_v8, %v9292_v39  ;;  %v3949_v42 = vmax.f32 %v3915_v26, 0.0  ;;  %v7009_v57 = vor.u32 %v7448_v63, %v7008_v27  ;;  %v7417_v7 = vld [vmem:[%s9905_s18 + $0x4] sm:$0xf]  ;;  %v6890_v8 = vld [vmem:[%s9905_s18 + $0xc] sm:$0xf0] }
 0x4b9   : > { %v3772_v35 = vpop.f32.mrf.mxu0  ;;  %4861 = vmatpush.bf16.msrb.mxu3 %v7025_v30  ;;  %4814 = vmatpush.bf16.msrb.mxu2 %v6905_v58  ;;  %v6893_v48 = vor.u32 %v7417_v7, %v6890_v8  ;;  %v7001_v26 = vor.u32 %v7444_v33, %v6998_v17 }
 0x4ba   : > { %v3950_v22 = vmax.f32 %v3819_v20, 0.0  ;;  %v3773_v0 = vadd.f32 %v3772_v35, %v9283_v4 }
 0x4bb   : > { %4764 = vmatpush.bf16.msrb.mxu1 %v7009_v57 }
 0x4bc   : > { %v3968_v36 = vpack.c.bf16 %v3950_v22, %v3948_v24  ;;  %v6996_v24 = vld [vmem:[%s9905_s18 + $0xd8] sm:$0xf] }
 0x4bd   : > { %v3916_v14 = vpop.f32.mrf.mxu3  ;;  %v6997_v22 = vor.u32 %v7445_v45, %v6996_v24  ;;  %4815 = vmatpush.bf16.msrb.mxu2 %v6893_v48  ;;  %v6944_v45 = vld [vmem:[%s9905_s18 + $0x68] sm:$0xf] }
 0x4be   : > { %v3917_v60 = vadd.f32 %v3916_v14, %v3868_v59  ;;  %4208 = vmatmul.bf16.gmra.mxu0 %v3968_v36  ;;  %4306 = vmatmul.bf16.gmra.mxu2 %v3968_v36  ;;  %v7441_v14 = vld [vmem:[%s9905_s18 + $0xc4] sm:$0xf] }
 0x4bf   : > { %v3821_v47 = vpop.f32.mrf.mxu1  ;;  %v3870_v32 = vpop.f32.mrf.mxu2  ;;  %4765 = vmatpush.bf16.msrb.mxu1 %v6997_v22  ;;  %v6989_v31 = vor.u32 %v7441_v14, %v6986_v12  ;;  %v7431_v22 = vld [vmem:[%s9905_s18 + $0x70] sm:$0xf0] }
 0x4c0   : > { %v3951_v46 = vmax.f32 %v3917_v60, 0.0  ;;  %v3822_v29 = vadd.f32 %v3821_v47, %v3773_v0  ;;  %v3871_v35 = vadd.f32 %v3870_v32, %v9292_v39  ;;  %v6968_v47 = vld [vmem:[%s9905_s18 + $0x98] sm:$0xf]  ;;  %v7437_v32 = vld [vmem:[%s9905_s18 + $0xa0] sm:$0xf0]  ;;  %v6945_v17 = vor.u32 %v7431_v22, %v6944_v45 }
 0x4c1   : > { %v3774_v62 = vpop.f32.mrf.mxu0  ;;  %v6969_v11 = vor.u32 %v7437_v32, %v6968_v47 }
 0x4c2   : > { %v3969_v40 = vpack.c.bf16 %v3951_v46, %v3949_v42  ;;  %v3775_v50 = vadd.f32 %v3774_v62, %v9283_v4  ;;  %v7010_v4 = vld [vmem:[%s9905_s18 + $0xfc] sm:$0xf0]  ;;  %v3952_v56 = vmax.f32 %v3822_v29, 0.0 }
 0x4c3   : > { %v7013_v55 = vor.u32 %v7447_v37, %v7010_v4  ;;  %4766 = vmatpush.bf16.msrb.mxu1 %v6985_v2 }
 0x4c4   : > { %4257 = vmatmul.bf16.gmra.mxu1 %v3969_v40  ;;  %4355 = vmatmul.bf16.gmra.mxu3 %v3969_v40 }
 0x4c5   : > { %v3919_v16 = vpop.f32.mrf.mxu3  ;;  %4862 = vmatpush.bf16.msrb.mxu3 %v7013_v55 }
 0x4c6   : > { %v3920_v19 = vadd.f32 %v3919_v16, %v3871_v35  ;;  %v7434_v16 = vld [vmem:[%s9905_s18 + $0x88] sm:$0xf0] }
 0x4c7   : > { %v3823_v54 = vpop.f32.mrf.mxu1  ;;  %v3872_v20 = vpop.f32.mrf.mxu2  ;;  %v6957_v29 = vor.u32 %v7434_v16, %v6956_v53 }
 0x4c8   : > { %v3824_v15 = vadd.f32 %v3823_v54, %v3775_v50  ;;  %v3873_v9 = vadd.f32 %v3872_v20, %v9292_v39  ;;  %v6981_v39 = vor.u32 %v7440_v21, %v6980_v41  ;;  %v3953_v18 = vmax.f32 %v3920_v19, 0.0 }
 0x4c9   : > { %4863 = vmatpush.bf16.msrb.mxu3 %v7001_v26 }
 0x4ca   : > { %v3954_v10 = vmax.f32 %v3824_v15, 0.0  ;;  %4906 = vmatpush.bf16.msrb.mxu0 %v6981_v39 }
 0x4cc   : > { %v3970_v52 = vpack.c.bf16 %v3954_v10, %v3952_v56 }
 0x4cd   : > { %v3921_v59 = vpop.f32.mrf.mxu3  ;;  %4864 = vmatpush.bf16.msrb.mxu3 %v6989_v31 }
 0x4ce   : > { %v3922_v36 = vadd.f32 %v3921_v59, %v3873_v9  ;;  %4213 = vmatmul.bf16.gmra.mxu0 %v3970_v52  ;;  %4311 = vmatmul.bf16.gmra.mxu2 %v3970_v52 }
 0x4cf   : > { %4907 = vmatpush.bf16.msrb.mxu0 %v6969_v11 }
 0x4d0   : > { %v3955_v60 = vmax.f32 %v3922_v36, 0.0 }
 0x4d2   : > { %v3971_v23 = vpack.c.bf16 %v3955_v60, %v3953_v18 }
 0x4d3   : > { %4908 = vmatpush.bf16.msrb.mxu0 %v6957_v29  ;;  %v7425_v29 = vld [vmem:[%s9905_s18 + $0x40] sm:$0xf0] }
 0x4d4   : > { %4262 = vmatmul.bf16.gmra.mxu1 %v3971_v23  ;;  %4360 = vmatmul.bf16.gmra.mxu3 %v3971_v23  ;;  %v6932_v23 = vld [vmem:[%s9905_s18 + $0x50] sm:$0xf] }
 0x4d7   : > { %4909 = vmatpush.bf16.msrb.mxu0 %v6945_v17 }
 0x4db   : > { %v4179_v38 = vpop.f32.mrf.mxu0 }
 0x4dc   : > { %v4180_v51 = vadd.f32 %v4179_v38, %v9523_v25  ;;  %v7428_v38 = vld [vmem:[%s9905_s18 + $0x58] sm:$0xf0] }
 0x4dd   : > { %v6933_v32 = vor.u32 %v7428_v38, %v6932_v23 }
 0x4df   : > { %4910 = vmatpush.bf16.msrb.mxu0 %v6933_v32 }
 0x4e1   : > { %v4228_v42 = vpop.f32.mrf.mxu1  ;;  %v4277_v46 = vpop.f32.mrf.mxu2 }
 0x4e2   : > { %v4229_v62 = vadd.f32 %v4228_v42, %v4180_v51  ;;  %v4278_v30 = vadd.f32 %v4277_v46, %v9527_v49 }
 0x4e3   : > { %v4181_v28 = vpop.f32.mrf.mxu0 }
 0x4e4   : > { %v4182_v40 = vadd.f32 %v4181_v28, %v9523_v25 }
 0x4e7   : > { %v4326_v6 = vpop.f32.mrf.mxu3 }
 0x4e8   : > { %v4327_v50 = vadd.f32 %v4326_v6, %v4278_v30 }
 0x4e9   : > { %v4230_v3 = vpop.f32.mrf.mxu1  ;;  %v4279_v43 = vpop.f32.mrf.mxu2 }
 0x4ea   : > { %v4231_v5 = vadd.f32 %v4230_v3, %v4182_v40  ;;  %v4280_v34 = vadd.f32 %v4279_v43, %v9527_v49 }
 0x4eb   : > { %v4184_v44 = vpop.f32.mrf.mxu0 }
 0x4ec   : > { %v9529_v0 = vpack.c.bf16 %v4231_v5, %v4229_v62  ;;  %v4185_v15 = vadd.f32 %v4184_v44, %v9523_v25 }
 0x4ee   : > { %4718 = vmatmul.bf16.vlgmr.msra.gmra.mxu0 %v9529_v0  ;;  %4816 = vmatmul.bf16.vlgmr.msrb.gmra.mxu2 %v9529_v0 }
 0x4ef   : > { %v4328_v58 = vpop.f32.mrf.mxu3 }
 0x4f0   : > { %v4329_v27 = vadd.f32 %v4328_v58, %v4280_v34  ;;  %v6920_v58 = vld [vmem:[%s9905_s18 + $0x38] sm:$0xf] }
 0x4f1   : > { %v4233_v63 = vpop.f32.mrf.mxu1  ;;  %v4282_v37 = vpop.f32.mrf.mxu2 }
 0x4f2   : > { %v9541_v54 = vpack.c.bf16 %v4329_v27, %v4327_v50  ;;  %v4234_v20 = vadd.f32 %v4233_v63, %v4185_v15  ;;  %v4283_v10 = vadd.f32 %v4282_v37, %v9527_v49  ;;  %v6921_v27 = vor.u32 %v7425_v29, %v6920_v58  ;;  %v7455_v29 = vld [vmem:[%s9905_s18 + $0x130] sm:$0xf0] }
 0x4f3   : > { %v4186_v57 = vpop.f32.mrf.mxu0 }
 0x4f4   : > { %4767 = vmatmul.bf16.vlgmr.msrb.gmra.mxu1 %v9541_v54  ;;  %4865 = vmatmul.bf16.vlgmr.msrb.gmra.mxu3 %v9541_v54  ;;  %v4187_v55 = vadd.f32 %v4186_v57, %v9523_v25 }
 0x4f5   : > { %4911 = vmatpush.bf16.msrb.mxu0 %v6921_v27 }
 0x4f7   : > { %v4331_v4 = vpop.f32.mrf.mxu3 }
 0x4f8   : > { %v4332_v19 = vadd.f32 %v4331_v4, %v4283_v10 }
 0x4f9   : > { %v4235_v7 = vpop.f32.mrf.mxu1  ;;  %v4284_v8 = vpop.f32.mrf.mxu2 }
 0x4fa   : > { %v4236_v48 = vadd.f32 %v4235_v7, %v4187_v55  ;;  %v4285_v24 = vadd.f32 %v4284_v8, %v9527_v49 }
 0x4fb   : > { %v4189_v56 = vpop.f32.mrf.mxu0 }
 0x4fc   : > { %v9547_v35 = vpack.c.bf16 %v4236_v48, %v4234_v20  ;;  %v4190_v21 = vadd.f32 %v4189_v56, %v9523_v25 }
 0x4fe   : > { %4723 = vmatmul.bf16.gmra.mxu0 %v9547_v35  ;;  %4821 = vmatmul.bf16.gmra.mxu2 %v9547_v35 }
 0x4ff   : > { %v4333_v33 = vpop.f32.mrf.mxu3 }
 0x500   : > { %v4334_v9 = vadd.f32 %v4333_v33, %v4285_v24 }
 0x501   : > { %v4238_v52 = vpop.f32.mrf.mxu1  ;;  %v4287_v26 = vpop.f32.mrf.mxu2 }
 0x502   : > { %v9559_v59 = vpack.c.bf16 %v4334_v9, %v4332_v19  ;;  %v4239_v14 = vadd.f32 %v4238_v52, %v4190_v21  ;;  %v4288_v2 = vadd.f32 %v4287_v26, %v9527_v49  ;;  %v6908_v19 = vld [vmem:[%s9905_s18 + $0x20] sm:$0xf]  ;;  %v7422_v9 = vld [vmem:[%s9905_s18 + $0x28] sm:$0xf0] }
 0x503   : > { %v4191_v36 = vpop.f32.mrf.mxu0  ;;  %v6909_v26 = vor.u32 %v7422_v9, %v6908_v19 }
 0x504   : > { %4772 = vmatmul.bf16.gmra.mxu1 %v9559_v59  ;;  %4870 = vmatmul.bf16.gmra.mxu3 %v9559_v59  ;;  %v4192_v13 = vadd.f32 %v4191_v36, %v9523_v25 }
 0x505   : > { %4912 = vmatpush.bf16.msrb.mxu0 %v6909_v26 }
 0x507   : > { %v4336_v41 = vpop.f32.mrf.mxu3 }
 0x508   : > { %v4337_v11 = vadd.f32 %v4336_v41, %v4288_v2  ;;  %v7064_v2 = vld [vmem:[%s9905_s18 + $0x158] sm:$0xf] }
 0x509   : > { %v4240_v39 = vpop.f32.mrf.mxu1  ;;  %v4289_v61 = vpop.f32.mrf.mxu2 }
 0x50a   : > { %v4241_v12 = vadd.f32 %v4240_v39, %v4192_v13  ;;  %v4290_v31 = vadd.f32 %v4289_v61, %v9527_v49  ;;  %v7076_v61 = vld [vmem:[%s9905_s18 + $0x170] sm:$0xf] }
 0x50b   : > { %v4194_v18 = vpop.f32.mrf.mxu0 }
 0x50c   : > { %v9565_v60 = vpack.c.bf16 %v4241_v12, %v4239_v14  ;;  %v4195_v40 = vadd.f32 %v4194_v18, %v9523_v25  ;;  %v7464_v14 = vld [vmem:[%s9905_s18 + $0x178] sm:$0xf0] }
 0x50d   : > { %v7077_v18 = vor.u32 %v7464_v14, %v7076_v61  ;;  %v7004_v61 = vld [vmem:[%s9905_s18 + $0xe0] sm:$0xf]  ;;  %v7446_v14 = vld [vmem:[%s9905_s18 + $0xe8] sm:$0xf0] }
 0x50e   : > { %4728 = vmatmul.bf16.gmra.mxu0 %v9565_v60  ;;  %4826 = vmatmul.bf16.gmra.mxu2 %v9565_v60 }
 0x50f   : > { %v4338_v47 = vpop.f32.mrf.mxu3  ;;  %4955 = vmatpush.bf16.msra.mxu1 %v7077_v18  ;;  %v7005_v18 = vor.u32 %v7446_v14, %v7004_v61 }
 0x510   : > { %v4339_v1 = vadd.f32 %v4338_v47, %v4290_v31  ;;  %v7461_v31 = vld [vmem:[%s9905_s18 + $0x160] sm:$0xf0] }
 0x511   : > { %v4243_v42 = vpop.f32.mrf.mxu1  ;;  %v4292_v46 = vpop.f32.mrf.mxu2  ;;  %v7065_v38 = vor.u32 %v7461_v31, %v7064_v2  ;;  %v7471_v2 = vld [vmem:[#allocation10 + $0x20] sm:$0xff] }
 0x512   : > { %v9577_v28 = vpack.c.bf16 %v4339_v1, %v4337_v11  ;;  %v4244_v5 = vadd.f32 %v4243_v42, %v4195_v40  ;;  %v4293_v53 = vadd.f32 %v4292_v46, %v9527_v49 }
 0x513   : > { %v4196_v6 = vpop.f32.mrf.mxu0  ;;  %4956 = vmatpush.bf16.msra.mxu1 %v7065_v38 }
 0x514   : > { %4777 = vmatmul.bf16.gmra.mxu1 %v9577_v28  ;;  %4875 = vmatmul.bf16.gmra.mxu3 %v9577_v28  ;;  %v4197_v3 = vadd.f32 %v4196_v6, %v9523_v25  ;;  %v7052_v6 = vld [vmem:[%s9905_s18 + $0x140] sm:$0xf] }
 0x517   : > { %v4341_v51 = vpop.f32.mrf.mxu3 }
 0x518   : > { %v4342_v63 = vadd.f32 %v4341_v51, %v4293_v53  ;;  %v7458_v51 = vld [vmem:[%s9905_s18 + $0x148] sm:$0xf0]  ;;  %v7040_v53 = vld [vmem:[%s9905_s18 + $0x128] sm:$0xf] }
 0x519   : > { %v4245_v43 = vpop.f32.mrf.mxu1  ;;  %v4294_v62 = vpop.f32.mrf.mxu2 }
 0x51a   : > { %v4246_v44 = vadd.f32 %v4245_v43, %v4197_v3  ;;  %v4295_v16 = vadd.f32 %v4294_v62, %v9527_v49  ;;  %v7053_v3 = vor.u32 %v7458_v51, %v7052_v6  ;;  %v7470_v6 = vld [vmem:[#allocation10 + $0x18] sm:$0xff] }
 0x51b   : > { %v4199_v30 = vpop.f32.mrf.mxu0 }
 0x51c   : > { %v9583_v34 = vpack.c.bf16 %v4246_v44, %v4244_v5  ;;  %v4200_v8 = vadd.f32 %v4199_v30, %v9523_v25  ;;  %4957 = vmatpush.bf16.msra.mxu1 %v7053_v3  ;;  %v6896_v44 = vld [vmem:[%s9905_s18 + $0x8] sm:$0xf]  ;;  %v7419_v30 = vld [vmem:[%s9905_s18 + $0x10] sm:$0xf0] }
 0x51d   : > { %v6897_v58 = vor.u32 %v7419_v30, %v6896_v44  ;;  %v7469_v30 = vld [vmem:[#allocation10 + $0x10] sm:$0xff] }
 0x51e   : > { %4733 = vmatmul.bf16.gmra.mxu0 %v9583_v34  ;;  %4831 = vmatmul.bf16.gmra.mxu2 %v9583_v34 }
 0x51f   : > { %v4343_v50 = vpop.f32.mrf.mxu3  ;;  %4913 = vmatpush.bf16.msrb.mxu0 %v6897_v58 }
 0x520   : > { %v4344_v37 = vadd.f32 %v4343_v50, %v4295_v16  ;;  %v7474_v50 = vld [vmem:[#allocation10 + $0x38] sm:$0xff] }
 0x521   : > { %v4248_v57 = vpop.f32.mrf.mxu1  ;;  %v4297_v4 = vpop.f32.mrf.mxu2  ;;  %5200 = vmatpush.bf16.msra.mxu2 %v7474_v50 }
 0x522   : > { %v9595_v15 = vpack.c.bf16 %v4344_v37, %v4342_v63  ;;  %v4249_v10 = vadd.f32 %v4248_v57, %v4200_v8  ;;  %v4298_v33 = vadd.f32 %v4297_v4, %v9527_v49  ;;  %v7041_v37 = vor.u32 %v7455_v29, %v7040_v53  ;;  %v7452_v8 = vld [vmem:[%s9905_s18 + $0x118] sm:$0xf0]  ;;  %v7468_v29 = vld [vmem:[#allocation10 + $0x8] sm:$0xff] }
 0x523   : > { %v4201_v55 = vpop.f32.mrf.mxu0 }
 0x524   : > { %4782 = vmatmul.bf16.gmra.mxu1 %v9595_v15  ;;  %4880 = vmatmul.bf16.gmra.mxu3 %v9595_v15  ;;  %v4202_v20 = vadd.f32 %v4201_v55, %v9523_v25 }
 0x525   : > { %4958 = vmatpush.bf16.msra.mxu1 %v7041_v37  ;;  %v7477_v37 = vld [vmem:[#allocation10 + $0x50] sm:$0xff] }
 0x527   : > { %v4346_v7 = vpop.f32.mrf.mxu3 }
 0x528   : > { %v4347_v36 = vadd.f32 %v4346_v7, %v4298_v33  ;;  %v7028_v7 = vld [vmem:[%s9905_s18 + $0x110] sm:$0xf] }
 0x529   : > { %v4250_v48 = vpop.f32.mrf.mxu1  ;;  %v4299_v56 = vpop.f32.mrf.mxu2  ;;  %v7472_v33 = vld [vmem:[#allocation10 + $0x28] sm:$0xff] }
 0x52a   : > { %v4251_v24 = vadd.f32 %v4250_v48, %v4202_v20  ;;  %v4300_v17 = vadd.f32 %v4299_v56, %v9527_v49  ;;  %v7029_v48 = vor.u32 %v7452_v8, %v7028_v7  ;;  %v7473_v56 = vld [vmem:[#allocation10 + $0x30] sm:$0xff]  ;;  %v7467_v8 = vld [vmem:[#allocation10] sm:$0xff] }
 0x52b   : > { %v4204_v45 = vpop.f32.mrf.mxu0  ;;  %5201 = vmatpush.bf16.msra.mxu2 %v7473_v56 }
 0x52c   : > { %v9601_v22 = vpack.c.bf16 %v4251_v24, %v4249_v10  ;;  %v4205_v47 = vadd.f32 %v4204_v45, %v9523_v25  ;;  %v7482_v10 = vld [vmem:[#allocation10 + $0x78] sm:$0xff]  ;;  %v7449_v45 = vld [vmem:[%s9905_s18 + $0x100] sm:$0xf0]  ;;  %4959 = vmatpush.bf16.msra.mxu1 %v7029_v48  ;;  %v7476_v48 = vld [vmem:[#allocation10 + $0x48] sm:$0xff] }
 0x52d   : > { %v7016_v24 = vld [vmem:[%s9905_s18 + $0xf8] sm:$0xf]  ;;  %5249 = vmatpush.bf16.msra.mxu3 %v7482_v10 }
 0x52e   : > { %4738 = vmatmul.bf16.gmra.mxu0 %v9601_v22  ;;  %4836 = vmatmul.bf16.gmra.mxu2 %v9601_v22 }
 0x52f   : > { %v4348_v52 = vpop.f32.mrf.mxu3  ;;  %5202 = vmatpush.bf16.msra.mxu2 %v7472_v33  ;;  %v7475_v33 = vld [vmem:[#allocation10 + $0x40] sm:$0xff] }
 0x530   : > { %v4349_v41 = vadd.f32 %v4348_v52, %v4300_v17  ;;  %v7017_v17 = vor.u32 %v7449_v45, %v7016_v24 }
 0x531   : > { %v4253_v21 = vpop.f32.mrf.mxu1  ;;  %v4302_v13 = vpop.f32.mrf.mxu2 }
 0x532   : > { %v9613_v39 = vpack.c.bf16 %v4349_v41, %v4347_v36  ;;  %v4254_v42 = vadd.f32 %v4253_v21, %v4205_v47  ;;  %v4303_v62 = vadd.f32 %v4302_v13, %v9527_v49  ;;  %v7481_v41 = vld [vmem:[#allocation10 + $0x70] sm:$0xff]  ;;  %4960 = vmatpush.bf16.msra.mxu1 %v7017_v17 }
 0x533   : > { %v4206_v12 = vpop.f32.mrf.mxu0  ;;  %5250 = vmatpush.bf16.msra.mxu3 %v7481_v41  ;;  %5203 = vmatpush.bf16.msra.mxu2 %v7471_v2 }
 0x534   : > { %4787 = vmatmul.bf16.gmra.mxu1 %v9613_v39  ;;  %4885 = vmatmul.bf16.gmra.mxu3 %v9613_v39  ;;  %v4207_v32 = vadd.f32 %v4206_v12, %v9523_v25 }
 0x536   : > { %4961 = vmatpush.bf16.msra.mxu1 %v7005_v18 }
 0x537   : > { %v4351_v23 = vpop.f32.mrf.mxu3  ;;  %5204 = vmatpush.bf16.msra.mxu2 %v7470_v6 }
 0x538   : > { %v4352_v27 = vadd.f32 %v4351_v23, %v4303_v62  ;;  %v7480_v23 = vld [vmem:[#allocation10 + $0x68] sm:$0xff] }
 0x539   : > { %v4255_v11 = vpop.f32.mrf.mxu1  ;;  %v4304_v1 = vpop.f32.mrf.mxu2  ;;  %5251 = vmatpush.bf16.msra.mxu3 %v7480_v23 }
 0x53a   : > { %v4256_v46 = vadd.f32 %v4255_v11, %v4207_v32  ;;  %v4305_v5 = vadd.f32 %v4304_v1, %v9527_v49  ;;  %v7466_v32 = vld [vmem:[%s9942_s5 + $0x8] sm:$0xff]  ;;  %v7443_v1 = vld [vmem:[%s9905_s18 + $0xd0] sm:$0xf0] }
 0x53b   : > { %v4209_v40 = vpop.f32.mrf.mxu0  ;;  %v6992_v11 = vld [vmem:[%s9905_s18 + $0xc8] sm:$0xf]  ;;  %5341 = vmatpush.bf16.msra.mxu0 %v7466_v32  ;;  %5205 = vmatpush.bf16.msra.mxu2 %v7469_v30 }
 0x53c   : > { %v9637_v43 = vpack.c.bf16 %v4256_v46, %v4254_v42  ;;  %v4210_v9 = vadd.f32 %v4209_v40, %v9523_v25  ;;  %v6993_v46 = vor.u32 %v7443_v1, %v6992_v11 }
 0x53e   : > { %4743 = vmatmul.bf16.gmra.mxu0 %v9637_v43  ;;  %4841 = vmatmul.bf16.gmra.mxu2 %v9637_v43 }
 0x53f   : > { %v4353_v16 = vpop.f32.mrf.mxu3  ;;  %4962 = vmatpush.bf16.msra.mxu1 %v6993_v46  ;;  %5206 = vmatpush.bf16.msra.mxu2 %v7468_v29 }
 0x540   : > { %v4354_v63 = vadd.f32 %v4353_v16, %v4305_v5  ;;  %v7479_v5 = vld [vmem:[#allocation10 + $0x60] sm:$0xff]  ;;  %v7478_v16 = vld [vmem:[#allocation10 + $0x58] sm:$0xff] }
 0x541   : > { %v4258_v57 = vpop.f32.mrf.mxu1  ;;  %v4307_v4 = vpop.f32.mrf.mxu2  ;;  %5252 = vmatpush.bf16.msra.mxu3 %v7479_v5 }
 0x542   : > { %v9655_v55 = vpack.c.bf16 %v4354_v63, %v4352_v27  ;;  %v4259_v21 = vadd.f32 %v4258_v57, %v4210_v9  ;;  %v4308_v38 = vadd.f32 %v4307_v4, %v9527_v49 }
 0x543   : > { %v4211_v20 = vpop.f32.mrf.mxu0  ;;  %5207 = vmatpush.bf16.msra.mxu2 %v7467_v8 }
 0x544   : > { %4792 = vmatmul.bf16.gmra.mxu1 %v9655_v55  ;;  %4890 = vmatmul.bf16.gmra.mxu3 %v9655_v55  ;;  %v4212_v52 = vadd.f32 %v4211_v20, %v9523_v25 }
 0x545   : > { %5253 = vmatpush.bf16.msra.mxu3 %v7478_v16 }
 0x547   : > { %v4356_v19 = vpop.f32.mrf.mxu3 }
 0x548   : > { %v4357_v51 = vadd.f32 %v4356_v19, %v4308_v38 }
 0x549   : > { %v4260_v26 = vpop.f32.mrf.mxu1  ;;  %v4309_v36 = vpop.f32.mrf.mxu2  ;;  %5254 = vmatpush.bf16.msra.mxu3 %v7477_v37 }
 0x54a   : > { %v4261_v13 = vadd.f32 %v4260_v26, %v4212_v52  ;;  %v4310_v47 = vadd.f32 %v4309_v36, %v9527_v49 }
 0x54b   : > { %v4214_v12 = vpop.f32.mrf.mxu0 }
 0x54c   : > { %v9679_v31 = vpack.c.bf16 %v4261_v13, %v4259_v21  ;;  %v4215_v50 = vadd.f32 %v4214_v12, %v9523_v25 }
 0x54d   : > { %5255 = vmatpush.bf16.msra.mxu3 %v7476_v48 }
 0x54e   : > { %4748 = vmatmul.bf16.gmra.mxu0 %v9679_v31  ;;  %4846 = vmatmul.bf16.gmra.mxu2 %v9679_v31 }
 0x54f   : > { %v4358_v42 = vpop.f32.mrf.mxu3 }
 0x550   : > { %v4359_v40 = vadd.f32 %v4358_v42, %v4310_v47 }
 0x551   : > { %v4263_v3 = vpop.f32.mrf.mxu1  ;;  %v4312_v62 = vpop.f32.mrf.mxu2  ;;  %5256 = vmatpush.bf16.msra.mxu3 %v7475_v33 }
 0x552   : > { %v9694_v44 = vpack.c.bf16 %v4359_v40, %v4357_v51  ;;  %v4264_v57 = vadd.f32 %v4263_v3, %v4215_v50  ;;  %v4313_v56 = vadd.f32 %v4312_v62, %v9527_v49 }
 0x553   : > { %v4216_v53 = vpop.f32.mrf.mxu0 }
 0x554   : > { %4797 = vmatmul.bf16.gmra.mxu1 %v9694_v44  ;;  %4895 = vmatmul.bf16.gmra.mxu3 %v9694_v44  ;;  %v4217_v27 = vadd.f32 %v4216_v53, %v9523_v25 }
 0x557   : > { %v4361_v58 = vpop.f32.mrf.mxu3 }
 0x558   : > { %v4362_v24 = vadd.f32 %v4361_v58, %v4313_v56 }
 0x559   : > { %v4265_v63 = vpop.f32.mrf.mxu1  ;;  %v4314_v7 = vpop.f32.mrf.mxu2 }
 0x55a   : > { %v4266_v4 = vadd.f32 %v4265_v63, %v4217_v27  ;;  %v4315_v10 = vadd.f32 %v4314_v7, %v9527_v49  ;;  %v9714_v49 = vld [vmem:[%s9943_s29] sm:$0x7] }
 0x55b   : > { %v9717_v26 = vperm.slane %v9714_v49, 0  ;;  %v9722_v61 = vperm.slane %v9714_v49, 1  ;;  %v7465_v7 = vld [vmem:[%s9942_s5] sm:$0xff] }
 0x55c   : > { %v9700_v20 = vpack.c.bf16 %v4266_v4, %v4264_v57  ;;  %5342 = vmatpush.bf16.msra.mxu0 %v7465_v7 }
 0x55e   : > { %4753 = vmatmul.bf16.gmra.mxu0 %v9700_v20  ;;  %4851 = vmatmul.bf16.gmra.mxu2 %v9700_v20 }
 0x55f   : > { %v4363_v25 = vpop.f32.mrf.mxu3 }
 0x560   : > { %v4364_v45 = vadd.f32 %v4363_v25, %v4315_v10 }
 0x562   : > { %v9706_v17 = vpack.c.bf16 %v4364_v45, %v4362_v24 }
 0x564   : > { %4802 = vmatmul.bf16.gmra.mxu1 %v9706_v17  ;;  %4900 = vmatmul.bf16.gmra.mxu3 %v9706_v17 }
 0x56b   : > { %v4719_v19 = vpop.f32.mrf.mxu0 }
 0x56c   : > { %v4720_v41 = vadd.f32 %v4719_v19, %v9717_v26 }
 0x56e   : > { %4914 = vmatmul.bf16.vlgmr.msrb.gmra.mxu0 %v9529_v0 }
 0x571   : > { %v4768_v9 = vpop.f32.mrf.mxu1  ;;  %v4817_v52 = vpop.f32.mrf.mxu2 }
 0x572   : > { %v4769_v13 = vadd.f32 %v4768_v9, %v4720_v41  ;;  %v4818_v38 = vadd.f32 %v4817_v52, %v9722_v61 }
 0x573   : > { %v4721_v36 = vpop.f32.mrf.mxu0 }
 0x574   : > { %4963 = vmatmul.bf16.vlgmr.msra.gmra.mxu1 %v9541_v54  ;;  %v4722_v0 = vadd.f32 %v4721_v36, %v9717_v26  ;;  %v5004_v23 = vmax.f32 %v4769_v13, 0.0 }
 0x577   : > { %v4866_v21 = vpop.f32.mrf.mxu3 }
 0x578   : > { %v4867_v32 = vadd.f32 %v4866_v21, %v4818_v38 }
 0x579   : > { %v4770_v14 = vpop.f32.mrf.mxu1  ;;  %v4819_v12 = vpop.f32.mrf.mxu2 }
 0x57a   : > { %v4771_v18 = vadd.f32 %v4770_v14, %v4722_v0  ;;  %v4820_v54 = vadd.f32 %v4819_v12, %v9722_v61  ;;  %v5005_v51 = vmax.f32 %v4867_v32, 0.0 }
 0x57b   : > { %v4724_v2 = vpop.f32.mrf.mxu0 }
 0x57c   : > { %v5007_v47 = vmax.f32 %v4771_v18, 0.0  ;;  %v4725_v5 = vadd.f32 %v4724_v2, %v9717_v26 }
 0x57e   : > { %v5056_v11 = vpack.c.bf16 %v5007_v47, %v5004_v23  ;;  %4919 = vmatmul.bf16.gmra.mxu0 %v9547_v35 }
 0x57f   : > { %v4868_v1 = vpop.f32.mrf.mxu3 }
 0x580   : > { %v4869_v42 = vadd.f32 %v4868_v1, %v4820_v54  ;;  %5208 = vmatmul.bf16.vlgmr.msra.gmra.mxu2 %v5056_v11 }
 0x581   : > { %v4773_v46 = vpop.f32.mrf.mxu1  ;;  %v4822_v6 = vpop.f32.mrf.mxu2 }
 0x582   : > { %v5008_v40 = vmax.f32 %v4869_v42, 0.0  ;;  %v4774_v53 = vadd.f32 %v4773_v46, %v4725_v5  ;;  %v4823_v63 = vadd.f32 %v4822_v6, %v9722_v61 }
 0x583   : > { %v4726_v3 = vpop.f32.mrf.mxu0 }
 0x584   : > { %v5057_v62 = vpack.c.bf16 %v5008_v40, %v5005_v51  ;;  %4968 = vmatmul.bf16.gmra.mxu1 %v9559_v59  ;;  %v4727_v16 = vadd.f32 %v4726_v3, %v9717_v26  ;;  %v5010_v27 = vmax.f32 %v4774_v53, 0.0 }
 0x586   : > { %5257 = vmatmul.bf16.vlgmr.msra.gmra.mxu3 %v5057_v62 }
 0x587   : > { %v4871_v30 = vpop.f32.mrf.mxu3 }
 0x588   : > { %v4872_v57 = vadd.f32 %v4871_v30, %v4823_v63 }
 0x589   : > { %v4775_v58 = vpop.f32.mrf.mxu1  ;;  %v4824_v35 = vpop.f32.mrf.mxu2 }
 0x58a   : > { %v4776_v29 = vadd.f32 %v4775_v58, %v4727_v16  ;;  %v4825_v4 = vadd.f32 %v4824_v35, %v9722_v61  ;;  %v5011_v25 = vmax.f32 %v4872_v57, 0.0 }
 0x58b   : > { %v4729_v50 = vpop.f32.mrf.mxu0 }
 0x58c   : > { %v5013_v37 = vmax.f32 %v4776_v29, 0.0  ;;  %v4730_v19 = vadd.f32 %v4729_v50, %v9717_v26 }
 0x58e   : > { %4924 = vmatmul.bf16.gmra.mxu0 %v9565_v60  ;;  %v5058_v59 = vpack.c.bf16 %v5013_v37, %v5010_v27 }
 0x58f   : > { %v4873_v8 = vpop.f32.mrf.mxu3 }
 0x590   : > { %v4874_v48 = vadd.f32 %v4873_v8, %v4825_v4  ;;  %5213 = vmatmul.bf16.gmra.mxu2 %v5058_v59 }
 0x591   : > { %v4778_v56 = vpop.f32.mrf.mxu1  ;;  %v4827_v10 = vpop.f32.mrf.mxu2 }
 0x592   : > { %v5014_v24 = vmax.f32 %v4874_v48, 0.0  ;;  %v4779_v9 = vadd.f32 %v4778_v56, %v4730_v19  ;;  %v4828_v14 = vadd.f32 %v4827_v10, %v9722_v61 }
 0x593   : > { %v4731_v45 = vpop.f32.mrf.mxu0 }
 0x594   : > { %4973 = vmatmul.bf16.gmra.mxu1 %v9577_v28  ;;  %v5059_v33 = vpack.c.bf16 %v5014_v24, %v5011_v25  ;;  %v4732_v52 = vadd.f32 %v4731_v45, %v9717_v26  ;;  %v5016_v0 = vmax.f32 %v4779_v9, 0.0 }
 0x596   : > { %5262 = vmatmul.bf16.gmra.mxu3 %v5059_v33 }
 0x597   : > { %v4876_v60 = vpop.f32.mrf.mxu3 }
 0x598   : > { %v4877_v18 = vadd.f32 %v4876_v60, %v4828_v14 }
 0x599   : > { %v4780_v36 = vpop.f32.mrf.mxu1  ;;  %v4829_v41 = vpop.f32.mrf.mxu2 }
 0x59a   : > { %v4781_v21 = vadd.f32 %v4780_v36, %v4732_v52  ;;  %v4830_v2 = vadd.f32 %v4829_v41, %v9722_v61  ;;  %v5017_v11 = vmax.f32 %v4877_v18, 0.0 }
 0x59b   : > { %v4734_v13 = vpop.f32.mrf.mxu0 }
 0x59c   : > { %v5019_v12 = vmax.f32 %v4781_v21, 0.0  ;;  %v4735_v46 = vadd.f32 %v4734_v13, %v9717_v26 }
 0x59e   : > { %4929 = vmatmul.bf16.gmra.mxu0 %v9583_v34  ;;  %v5060_v28 = vpack.c.bf16 %v5019_v12, %v5016_v0 }
 0x59f   : > { %v4878_v23 = vpop.f32.mrf.mxu3 }
 0x5a0   : > { %v4879_v38 = vadd.f32 %v4878_v23, %v4830_v2  ;;  %5218 = vmatmul.bf16.gmra.mxu2 %v5060_v28 }
 0x5a1   : > { %v4783_v47 = vpop.f32.mrf.mxu1  ;;  %v4832_v32 = vpop.f32.mrf.mxu2 }
 0x5a2   : > { %v5020_v54 = vmax.f32 %v4879_v38, 0.0  ;;  %v4784_v51 = vadd.f32 %v4783_v47, %v4735_v46  ;;  %v4833_v53 = vadd.f32 %v4832_v32, %v9722_v61 }
 0x5a3   : > { %v4736_v1 = vpop.f32.mrf.mxu0 }
 0x5a4   : > { %4978 = vmatmul.bf16.gmra.mxu1 %v9595_v15  ;;  %v5061_v42 = vpack.c.bf16 %v5020_v54, %v5017_v11  ;;  %v4737_v40 = vadd.f32 %v4736_v1, %v9717_v26  ;;  %v5022_v30 = vmax.f32 %v4784_v51, 0.0 }
 0x5a6   : > { %5267 = vmatmul.bf16.gmra.mxu3 %v5061_v42 }
 0x5a7   : > { %v4881_v6 = vpop.f32.mrf.mxu3 }
 0x5a8   : > { %v4882_v58 = vadd.f32 %v4881_v6, %v4833_v53 }
 0x5a9   : > { %v4785_v34 = vpop.f32.mrf.mxu1  ;;  %v4834_v3 = vpop.f32.mrf.mxu2 }
 0x5aa   : > { %v4786_v62 = vadd.f32 %v4785_v34, %v4737_v40  ;;  %v4835_v35 = vadd.f32 %v4834_v3, %v9722_v61  ;;  %v5023_v37 = vmax.f32 %v4882_v58, 0.0 }
 0x5ab   : > { %v4739_v5 = vpop.f32.mrf.mxu0 }
 0x5ac   : > { %v5025_v16 = vmax.f32 %v4786_v62, 0.0  ;;  %v4740_v7 = vadd.f32 %v4739_v5, %v9717_v26 }
 0x5ae   : > { %4934 = vmatmul.bf16.gmra.mxu0 %v9601_v22  ;;  %v5062_v15 = vpack.c.bf16 %v5025_v16, %v5022_v30 }
 0x5af   : > { %v4883_v29 = vpop.f32.mrf.mxu3 }
 0x5b0   : > { %v4884_v50 = vadd.f32 %v4883_v29, %v4835_v35  ;;  %5223 = vmatmul.bf16.gmra.mxu2 %v5062_v15 }
 0x5b1   : > { %v4788_v27 = vpop.f32.mrf.mxu1  ;;  %v4837_v63 = vpop.f32.mrf.mxu2 }
 0x5b2   : > { %v5026_v57 = vmax.f32 %v4884_v50, 0.0  ;;  %v4789_v48 = vadd.f32 %v4788_v27, %v4740_v7  ;;  %v4838_v33 = vadd.f32 %v4837_v63, %v9722_v61 }
 0x5b3   : > { %v4741_v4 = vpop.f32.mrf.mxu0 }
 0x5b4   : > { %4983 = vmatmul.bf16.gmra.mxu1 %v9613_v39  ;;  %v5063_v59 = vpack.c.bf16 %v5026_v57, %v5023_v37  ;;  %v4742_v56 = vadd.f32 %v4741_v4, %v9717_v26  ;;  %v5028_v45 = vmax.f32 %v4789_v48, 0.0 }
 0x5b6   : > { %5272 = vmatmul.bf16.gmra.mxu3 %v5063_v59 }
 0x5b7   : > { %v4886_v8 = vpop.f32.mrf.mxu3 }
 0x5b8   : > { %v4887_v60 = vadd.f32 %v4886_v8, %v4838_v33  ;;  %v862_v33 = vld [vmem:[%s9772_s27 + $0x8] sm:$0xff] }
 0x5b9   : > { %v4790_v22 = vpop.f32.mrf.mxu1  ;;  %v4839_v10 = vpop.f32.mrf.mxu2 }
 0x5ba   : > { %v4791_v25 = vadd.f32 %v4790_v22, %v4742_v56  ;;  %v4840_v39 = vadd.f32 %v4839_v10, %v9722_v61  ;;  %v5029_v13 = vmax.f32 %v4887_v60, 0.0 }
 0x5bb   : > { %v4744_v24 = vpop.f32.mrf.mxu0 }
 0x5bc   : > { %v5031_v19 = vmax.f32 %v4791_v25, 0.0  ;;  %v4745_v18 = vadd.f32 %v4744_v24, %v9717_v26 }
 0x5be   : > { %v5064_v9 = vpack.c.bf16 %v5031_v19, %v5028_v45  ;;  %4939 = vmatmul.bf16.gmra.mxu0 %v9637_v43  ;;  %v861_v45 = vld [vmem:[%s9772_s27] sm:$0xff] }
 0x5bf   : > { %v4888_v52 = vpop.f32.mrf.mxu3 }
 0x5c0   : > { %v4889_v36 = vadd.f32 %v4888_v52, %v4840_v39  ;;  %5228 = vmatmul.bf16.gmra.mxu2 %v5064_v9  ;;  %v877_v52 = vpack.c.bf16 %v862_v33, %v861_v45  ;;  %v869_v33 = vld [vmem:[%s9772_s27 + $0x40] sm:$0xff] }
 0x5c1   : > { %v4793_v41 = vpop.f32.mrf.mxu1  ;;  %v4842_v21 = vpop.f32.mrf.mxu2 }
 0x5c2   : > { %v5032_v0 = vmax.f32 %v4889_v36, 0.0  ;;  %v4794_v28 = vadd.f32 %v4793_v41, %v4745_v18  ;;  %v4843_v54 = vadd.f32 %v4842_v21, %v9722_v61 }
 0x5c3   : > { %v4746_v14 = vpop.f32.mrf.mxu0 }
 0x5c4   : > { %v5065_v12 = vpack.c.bf16 %v5032_v0, %v5029_v13  ;;  %4988 = vmatmul.bf16.gmra.mxu1 %v9655_v55  ;;  %v4747_v23 = vadd.f32 %v4746_v14, %v9717_v26  ;;  %v5034_v11 = vmax.f32 %v4794_v28, 0.0  ;;  %v9781_v0 = vperm.slane %v9714_v49, 2 }
 0x5c6   : > { %5277 = vmatmul.bf16.gmra.mxu3 %v5065_v12 }
 0x5c7   : > { %v4891_v2 = vpop.f32.mrf.mxu3 }
 0x5c8   : > { %v4892_v42 = vadd.f32 %v4891_v2, %v4843_v54  ;;  %v864_v54 = vld [vmem:[%s9772_s27 + $0x18] sm:$0xff] }
 0x5c9   : > { %v4795_v38 = vpop.f32.mrf.mxu1  ;;  %v4844_v43 = vpop.f32.mrf.mxu2 }
 0x5ca   : > { %v4796_v47 = vadd.f32 %v4795_v38, %v4747_v23  ;;  %v4845_v6 = vadd.f32 %v4844_v43, %v9722_v61  ;;  %v5035_v3 = vmax.f32 %v4892_v42, 0.0 }
 0x5cb   : > { %v4749_v32 = vpop.f32.mrf.mxu0 }
 0x5cc   : > { %v5037_v1 = vmax.f32 %v4796_v47, 0.0  ;;  %v4750_v53 = vadd.f32 %v4749_v32, %v9717_v26 }
 0x5ce   : > { %v5066_v46 = vpack.c.bf16 %v5037_v1, %v5034_v11  ;;  %4944 = vmatmul.bf16.gmra.mxu0 %v9679_v31  ;;  %v863_v11 = vld [vmem:[%s9772_s27 + $0x10] sm:$0xff] }
 0x5cf   : > { %v4893_v55 = vpop.f32.mrf.mxu3 }
 0x5d0   : > { %v4894_v51 = vadd.f32 %v4893_v55, %v4845_v6  ;;  %5233 = vmatmul.bf16.gmra.mxu2 %v5066_v46  ;;  %v878_v6 = vpack.c.bf16 %v864_v54, %v863_v11 }
 0x5d1   : > { %v4798_v40 = vpop.f32.mrf.mxu1  ;;  %v4847_v34 = vpop.f32.mrf.mxu2 }
 0x5d2   : > { %v5038_v62 = vmax.f32 %v4894_v51, 0.0  ;;  %v4799_v58 = vadd.f32 %v4798_v40, %v4750_v53  ;;  %v4848_v63 = vadd.f32 %v4847_v34, %v9722_v61  ;;  %v866_v53 = vld [vmem:[%s9772_s27 + $0x28] sm:$0xff] }
 0x5d3   : > { %v4751_v5 = vpop.f32.mrf.mxu0 }
 0x5d4   : > { %v5067_v30 = vpack.c.bf16 %v5038_v62, %v5035_v3  ;;  %4993 = vmatmul.bf16.gmra.mxu1 %v9694_v44  ;;  %v4752_v35 = vadd.f32 %v4751_v5, %v9717_v26  ;;  %v5040_v27 = vmax.f32 %v4799_v58, 0.0 }
 0x5d6   : > { %5282 = vmatmul.bf16.gmra.mxu3 %v5067_v30  ;;  %v865_v30 = vld [vmem:[%s9772_s27 + $0x20] sm:$0xff] }
 0x5d7   : > { %v4896_v16 = vpop.f32.mrf.mxu3 }
 0x5d8   : > { %v4897_v57 = vadd.f32 %v4896_v16, %v4848_v63 }
 0x5d9   : > { %v4800_v15 = vpop.f32.mrf.mxu1  ;;  %v4849_v31 = vpop.f32.mrf.mxu2 }
 0x5da   : > { %v4801_v29 = vadd.f32 %v4800_v15, %v4752_v35  ;;  %v4850_v44 = vadd.f32 %v4849_v31, %v9722_v61  ;;  %v5041_v56 = vmax.f32 %v4897_v57, 0.0  ;;  %v879_v15 = vpack.c.bf16 %v866_v53, %v865_v30 }
 0x5db   : > { %v4754_v50 = vpop.f32.mrf.mxu0 }
 0x5dc   : > { %v5043_v37 = vmax.f32 %v4801_v29, 0.0 }
 0x5de   : > { %v5068_v4 = vpack.c.bf16 %v5043_v37, %v5040_v27  ;;  %4949 = vmatmul.bf16.gmra.mxu0 %v9700_v20  ;;  %v4755_v20 = vadd.f32 %v4754_v50, %v9717_v26 }
 0x5df   : > { %v4898_v59 = vpop.f32.mrf.mxu3 }
 0x5e0   : > { %v4899_v7 = vadd.f32 %v4898_v59, %v4850_v44  ;;  %5238 = vmatmul.bf16.gmra.mxu2 %v5068_v4  ;;  %v867_v4 = vld [vmem:[%s9772_s27 + $0x30] sm:$0xff]  ;;  %v868_v44 = vld [vmem:[%s9772_s27 + $0x38] sm:$0xff] }
 0x5e1   : > { %v4803_v8 = vpop.f32.mrf.mxu1  ;;  %v4852_v48 = vpop.f32.mrf.mxu2 }
 0x5e2   : > { %v5044_v22 = vmax.f32 %v4899_v7, 0.0  ;;  %v4804_v19 = vadd.f32 %v4803_v8, %v4755_v20  ;;  %v4853_v13 = vadd.f32 %v4852_v48, %v9722_v61  ;;  %v880_v48 = vpack.c.bf16 %v868_v44, %v867_v4 }
 0x5e3   : > { %v4756_v10 = vpop.f32.mrf.mxu0 }
 0x5e4   : > { %v5069_v25 = vpack.c.bf16 %v5044_v22, %v5041_v56  ;;  %4998 = vmatmul.bf16.gmra.mxu1 %v9706_v17  ;;  %v4757_v60 = vadd.f32 %v4756_v10, %v9717_v26  ;;  %v5046_v21 = vmax.f32 %v4804_v19, 0.0  ;;  %v870_v19 = vld [vmem:[%s9772_s27 + $0x48] sm:$0xff] }
 0x5e6   : > { %5287 = vmatmul.bf16.gmra.mxu3 %v5069_v25 }
 0x5e7   : > { %v4901_v24 = vpop.f32.mrf.mxu3 }
 0x5e8   : > { %v4902_v14 = vadd.f32 %v4901_v24, %v4853_v13 }
 0x5e9   : > { %v4805_v9 = vpop.f32.mrf.mxu1  ;;  %v4854_v36 = vpop.f32.mrf.mxu2 }
 0x5ea   : > { %v4806_v39 = vadd.f32 %v4805_v9, %v4757_v60  ;;  %v4855_v18 = vadd.f32 %v4854_v36, %v9722_v61  ;;  %v5047_v38 = vmax.f32 %v4902_v14, 0.0 }
 0x5eb   : > { %v4915_v41 = vpop.f32.mrf.mxu0 }
 0x5ec   : > { %v5049_v17 = vmax.f32 %v4806_v39, 0.0  ;;  %v4916_v2 = vadd.f32 %v4915_v41, %v9781_v0 }
 0x5ee   : > { %v5070_v12 = vpack.c.bf16 %v5049_v17, %v5046_v21  ;;  %7150 = vmatmul.msk.bf16.vlgmr.msra.gmra.mxu0 %vm5310_vm1, %v877_v52  ;;  %v881_v52 = vpack.c.bf16 %v870_v19, %v869_v33  ;;  %v9846_v19 = vld [vmem:[%s9946_s12] ss:$0 sm:$0xff] }
 0x5ef   : > { %v4903_v26 = vpop.f32.mrf.mxu3 }
 0x5f0   : > { %v4904_v28 = vadd.f32 %v4903_v26, %v4855_v18  ;;  %5243 = vmatmul.bf16.gmra.mxu2 %v5070_v12  ;;  %v871_v18 = vld [vmem:[%s9772_s27 + $0x50] sm:$0xff]  ;;  %v872_v26 = vld [vmem:[%s9772_s27 + $0x58] sm:$0xff] }
 0x5f1   : > { %v4964_v23 = vpop.f32.mrf.mxu1 }
 0x5f2   : > { %v5050_v43 = vmax.f32 %v4904_v28, 0.0  ;;  %v4965_v47 = vadd.f32 %v4964_v23, %v4916_v2 }
 0x5f3   : > { %v4917_v49 = vpop.f32.mrf.mxu0 }
 0x5f4   : > { %v5071_v61 = vpack.c.bf16 %v5050_v43, %v5047_v38  ;;  %v5006_v32 = vmax.f32 %v4965_v47, 0.0  ;;  %v4918_v1 = vadd.f32 %v4917_v49, %v9781_v0  ;;  %v882_v38 = vpack.c.bf16 %v872_v26, %v871_v18 }
 0x5f6   : > { %5724 = vst [vmem:[%s9790_s3 + $0x8] sm:$0xff] %v5006_v32  ;;  %5292 = vmatmul.bf16.gmra.mxu3 %v5071_v61 }
 0x5f9   : > { %v4966_v42 = vpop.f32.mrf.mxu1 }
 0x5fa   : > { %v4967_v46 = vadd.f32 %v4966_v42, %v4918_v1  ;;  %v873_v1 = vld [vmem:[%s9772_s27 + $0x60] sm:$0xff]  ;;  %v874_v42 = vld [vmem:[%s9772_s27 + $0x68] sm:$0xff] }
 0x5fb   : > { %v4920_v55 = vpop.f32.mrf.mxu0 }
 0x5fc   : > { %v5009_v51 = vmax.f32 %v4967_v46, 0.0  ;;  %v4921_v40 = vadd.f32 %v4920_v55, %v9781_v0 }
 0x5fe   : > { %5725 = vst [vmem:[%s9790_s3 + $0x18] sm:$0xff] %v5009_v51  ;;  %7151 = vmatmul.msk.bf16.gmra.mxu0 %vm5310_vm1, %v878_v6 }
 0x601   : > { %v4969_v34 = vpop.f32.mrf.mxu1 }
 0x602   : > { %v4970_v3 = vadd.f32 %v4969_v34, %v4921_v40  ;;  %v883_v34 = vpack.c.bf16 %v874_v42, %v873_v1 }
 0x603   : > { %v4922_v62 = vpop.f32.mrf.mxu0  ;;  %v5209_v51 = vpop.f32.mrf.mxu2 }
 0x604   : > { %v5012_v5 = vmax.f32 %v4970_v3, 0.0  ;;  %v4923_v16 = vadd.f32 %v4922_v62, %v9781_v0 }
 0x606   : > { %5726 = vst [vmem:[%s9790_s3 + $0x28] sm:$0xff] %v5012_v5 }
 0x609   : > { %v4971_v58 = vpop.f32.mrf.mxu1  ;;  %v5258_v46 = vpop.f32.mrf.mxu3 }
 0x60a   : > { %v4972_v35 = vadd.f32 %v4971_v58, %v4923_v16 }
 0x60b   : > { %v4925_v31 = vpop.f32.mrf.mxu0 }
 0x60c   : > { %v5015_v29 = vmax.f32 %v4972_v35, 0.0  ;;  %v4926_v50 = vadd.f32 %v4925_v31, %v9781_v0  ;;  %v5211_v35 = vpop.f32.mrf.mxu2  ;;  %v875_v31 = vld [vmem:[%s9772_s27 + $0x70] sm:$0xff] }
 0x60e   : > { %5727 = vst [vmem:[%s9790_s3 + $0x38] sm:$0xff] %v5015_v29  ;;  %7152 = vmatmul.msk.bf16.gmra.mxu0 %vm5310_vm1, %v879_v15  ;;  %v876_v29 = vld [vmem:[%s9772_s27 + $0x78] sm:$0xff] }
 0x611   : > { %v4974_v27 = vpop.f32.mrf.mxu1  ;;  %v5260_v53 = vpop.f32.mrf.mxu3 }
 0x612   : > { %v4975_v63 = vadd.f32 %v4974_v27, %v4926_v50 }
 0x613   : > { %v4927_v37 = vpop.f32.mrf.mxu0 }
 0x614   : > { %v5018_v57 = vmax.f32 %v4975_v63, 0.0  ;;  %v4928_v59 = vadd.f32 %v4927_v37, %v9781_v0  ;;  %v884_v37 = vpack.c.bf16 %v876_v29, %v875_v31 }
 0x616   : > { %5728 = vst [vmem:[%s9790_s3 + $0x48] sm:$0xff] %v5018_v57 }
 0x619   : > { %v4976_v7 = vpop.f32.mrf.mxu1  ;;  %v5263_v4 = vpop.f32.mrf.mxu3 }
 0x61a   : > { %v4977_v8 = vadd.f32 %v4976_v7, %v4928_v59  ;;  %v5214_v59 = vpop.f32.mrf.mxu2 }
 0x61b   : > { %v4930_v56 = vpop.f32.mrf.mxu0 }
 0x61c   : > { %v5021_v22 = vmax.f32 %v4977_v8, 0.0  ;;  %v4931_v10 = vadd.f32 %v4930_v56, %v9781_v0 }
 0x61e   : > { %5729 = vst [vmem:[%s9790_s3 + $0x58] sm:$0xff] %v5021_v22  ;;  %7153 = vmatmul.msk.bf16.gmra.mxu0 %vm5310_vm1, %v880_v48 }
 0x621   : > { %v4979_v25 = vpop.f32.mrf.mxu1 }
 0x622   : > { %v4980_v20 = vadd.f32 %v4979_v25, %v4931_v10  ;;  %v5265_v10 = vpop.f32.mrf.mxu3  ;;  %v5216_v25 = vpop.f32.mrf.mxu2 }
 0x623   : > { %v4932_v24 = vpop.f32.mrf.mxu0 }
 0x624   : > { %v5024_v45 = vmax.f32 %v4980_v20, 0.0  ;;  %v4933_v60 = vadd.f32 %v4932_v24, %v9781_v0 }
 0x626   : > { %5730 = vst [vmem:[%s9790_s3 + $0x68] sm:$0xff] %v5024_v45  ;;  %v5259_v45 = vadd.f32 %v5258_v46, %v5209_v51 }
 0x629   : > { %v4981_v9 = vpop.f32.mrf.mxu1 }
 0x62a   : > { %v4982_v39 = vadd.f32 %v4981_v9, %v4933_v60 }
 0x62b   : > { %v4935_v36 = vpop.f32.mrf.mxu0 }
 0x62c   : > { %v5027_v41 = vmax.f32 %v4982_v39, 0.0  ;;  %v4936_v21 = vadd.f32 %v4935_v36, %v9781_v0  ;;  %v5268_v36 = vpop.f32.mrf.mxu3 }
 0x62e   : > { %5731 = vst [vmem:[%s9790_s3 + $0x78] sm:$0xff] %v5027_v41  ;;  %7154 = vmatmul.msk.bf16.gmra.mxu0 %vm5310_vm1, %v881_v52 }
 0x631   : > { %v4984_v13 = vpop.f32.mrf.mxu1 }
 0x632   : > { %v4985_v17 = vadd.f32 %v4984_v13, %v4936_v21  ;;  %v5261_v21 = vadd.f32 %v5260_v53, %v5211_v35  ;;  %v5219_v13 = vpop.f32.mrf.mxu2 }
 0x633   : > { %v4937_v14 = vpop.f32.mrf.mxu0 }
 0x634   : > { %v5030_v12 = vmax.f32 %v4985_v17, 0.0  ;;  %v4938_v2 = vadd.f32 %v4937_v14, %v9781_v0 }
 0x636   : > { %5732 = vst [vmem:[%s9790_s3 + $0x88] sm:$0xff] %v5030_v12 }
 0x639   : > { %v4986_v28 = vpop.f32.mrf.mxu1 }
 0x63a   : > { %v4987_v23 = vadd.f32 %v4986_v28, %v4938_v2  ;;  %v5264_v2 = vadd.f32 %v5263_v4, %v5214_v59  ;;  %v5270_v28 = vpop.f32.mrf.mxu3 }
 0x63b   : > { %v4940_v43 = vpop.f32.mrf.mxu0 }
 0x63c   : > { %v5033_v47 = vmax.f32 %v4987_v23, 0.0  ;;  %v4941_v49 = vadd.f32 %v4940_v43, %v9781_v0 }
 0x63e   : > { %5733 = vst [vmem:[%s9790_s3 + $0x98] sm:$0xff] %v5033_v47  ;;  %7155 = vmatmul.msk.bf16.gmra.mxu0 %vm5310_vm1, %v882_v38  ;;  %v5221_v38 = vpop.f32.mrf.mxu2 }
 0x641   : > { %v4989_v61 = vpop.f32.mrf.mxu1 }
 0x642   : > { %v4990_v32 = vadd.f32 %v4989_v61, %v4941_v49  ;;  %v9852_v46 = vpop.f32.mrf.mxu3 }
 0x643   : > { %v4942_v11 = vpop.f32.mrf.mxu0 }
 0x644   : > { %v5036_v54 = vmax.f32 %v4990_v32, 0.0  ;;  %v4943_v6 = vadd.f32 %v4942_v11, %v9781_v0 }
 0x646   : > { %5734 = vst [vmem:[%s9790_s3 + $0xa8] sm:$0xff] %v5036_v54  ;;  %v5266_v54 = vadd.f32 %v5265_v10, %v5216_v25  ;;  %v5271_v25 = vadd.f32 %v5270_v28, %v5221_v38 }
 0x649   : > { %v4991_v55 = vpop.f32.mrf.mxu1 }
 0x64a   : > { %v4992_v40 = vadd.f32 %v4991_v55, %v4943_v6  ;;  %v5275_v4 = vpop.f32.mrf.mxu3 }
 0x64b   : > { %v4945_v3 = vpop.f32.mrf.mxu0 }
 0x64c   : > { %v5039_v62 = vmax.f32 %v4992_v40, 0.0  ;;  %v4946_v5 = vadd.f32 %v4945_v3, %v9781_v0  ;;  %v5224_v40 = vpop.f32.mrf.mxu2 }
 0x64e   : > { %5735 = vst [vmem:[%s9790_s3 + $0xb8] sm:$0xff] %v5039_v62  ;;  %7156 = vmatmul.msk.bf16.gmra.mxu0 %vm5310_vm1, %v883_v34 }
 0x651   : > { %v4994_v30 = vpop.f32.mrf.mxu1 }
 0x652   : > { %v4995_v16 = vadd.f32 %v4994_v30, %v4946_v5 }
 0x653   : > { %v4947_v58 = vpop.f32.mrf.mxu0 }
 0x654   : > { %v5042_v15 = vmax.f32 %v4995_v16, 0.0  ;;  %v4948_v50 = vadd.f32 %v4947_v58, %v9781_v0  ;;  %v5269_v58 = vadd.f32 %v5268_v36, %v5219_v13 }
 0x656   : > { %5736 = vst [vmem:[%s9790_s3 + $0xc8] sm:$0xff] %v5042_v15 }
 0x659   : > { %v4996_v27 = vpop.f32.mrf.mxu1 }
 0x65a   : > { %v4997_v63 = vadd.f32 %v4996_v27, %v4948_v50 }
 0x65b   : > { %v4950_v57 = vpop.f32.mrf.mxu0 }
 0x65c   : > { %v5045_v44 = vmax.f32 %v4997_v63, 0.0  ;;  %v4951_v7 = vadd.f32 %v4950_v57, %v9781_v0 }
 0x65e   : > { %5737 = vst [vmem:[%s9790_s3 + $0xd8] sm:$0xff] %v5045_v44  ;;  %7157 = vmatmul.msk.bf16.gmra.mxu0 %vm5310_vm1, %v884_v37 }
 0x661   : > { %v4999_v8 = vpop.f32.mrf.mxu1 }
 0x662   : > { %v5000_v48 = vadd.f32 %v4999_v8, %v4951_v7 }
 0x663   : > { %v4952_v56 = vpop.f32.mrf.mxu0 }
 0x664   : > { %v5048_v22 = vmax.f32 %v5000_v48, 0.0  ;;  %v4953_v20 = vadd.f32 %v4952_v56, %v9781_v0  ;;  %v5226_v48 = vpop.f32.mrf.mxu2 }
 0x666   : > { %5738 = vst [vmem:[%s9790_s3 + $0xe8] sm:$0xff] %v5048_v22 }
 0x669   : > { %v5001_v24 = vpop.f32.mrf.mxu1 }
 0x66a   : > { %v5002_v33 = vadd.f32 %v5001_v24, %v4953_v20 }
 0x66b   : > { %v5344_v60 = vpop.f32.mrf.mxu0 }
 0x66c   : > { %v5051_v9 = vmax.f32 %v5002_v33, 0.0  ;;  %v5345_v39 = vadd.f32 %v5344_v60, %v5259_v45 }
 0x66e   : > { %5739 = vst [vmem:[%s9790_s3 + $0xf8] sm:$0xff] %v5051_v9  ;;  %v5388_v52 = vadd.f32 %v9846_v19, %v5345_v39 }
 0x670   : > { %v7158_v41 = vmul.f32 -1.442695, %v5388_v52 }
 0x672   : > { %7571 = vpow2.f32 %v7158_v41 }
 0x673   : > { %v5346_v0 = vpop.f32.mrf.mxu0 }
 0x674   : > { %v5347_v17 = vadd.f32 %v5346_v0, %v5261_v21 }
 0x676   : > { %v5389_v14 = vadd.f32 %v9846_v19, %v5347_v17  ;;  %v5278_v17 = vpop.f32.mrf.mxu3 }
 0x678   : > { %v7572_v12 = vpop.eup %7571  ;;  %v7159_v18 = vmul.f32 -1.442695, %v5389_v14 }
 0x679   : > { %v5452_v26 = vadd.f32 1.0, %v7572_v12 }
 0x67a   : > { %7573 = vpow2.f32 %v7159_v18 }
 0x67b   : > { %7575 = vrcp.f32 %v5452_v26  ;;  %v5349_v23 = vpop.f32.mrf.mxu0  ;;  %v5479_v51 = vand.u32 2147483648, %v5452_v26  ;;  %v5477_v3 = vand.u32 2147483647, %v5452_v26  ;;  %vm5473_vm3 = vweird.f32 %v5452_v26 }
 0x67c   : > { %v5350_v43 = vadd.f32 %v5349_v23, %v5264_v2  ;;  %v5229_v23 = vpop.f32.mrf.mxu2 }
 0x67d   : > { %v5480_v35 = vor.u32 1.1754944e-38, %v5479_v51  ;;  %vm5478_vm5 = vcmp.eq.f32.partialorder %v5477_v3, 8.507059e+37 }
 0x67e   : > { %v5390_v47 = vadd.f32 %v9846_v19, %v5350_v43 }
 0x680   : > { %v7574_v49 = vpop.eup %7573  ;;  %v7160_v61 = vmul.f32 -1.442695, %v5390_v47 }
 0x681   : > { %v7576_v32 = vpop.eup %7575  ;;  %v5453_v11 = vadd.f32 1.0, %v7574_v49 }
 0x682   : > { %v5469_v1 = vmul.f32 %v7576_v32, %v5452_v26  ;;  %7577 = vpow2.f32 %v7160_v61  ;;  %vm5474_vm2 = vweird.f32 %v7576_v32  ;;  %v5274_v26 = vadd.f32 %v9852_v46, %v5224_v40 }
 0x683   : > { %7579 = vrcp.f32 %v5453_v11  ;;  %v5351_v42 = vpop.f32.mrf.mxu0  ;;  %vm5475_vm4 = vmor %vm5473_vm3, %vm5474_vm2  ;;  %v5494_v57 = vand.u32 2147483648, %v5453_v11  ;;  %v5492_v59 = vand.u32 2147483647, %v5453_v11  ;;  %vm5488_vm7 = vweird.f32 %v5453_v11 }
 0x684   : > { %v5470_v6 = vsub.f32 1.0, %v5469_v1  ;;  %v5352_v55 = vadd.f32 %v5351_v42, %v5266_v54  ;;  %v5276_v40 = vadd.f32 %v5275_v4, %v5226_v48 }
 0x685   : > { %v5495_v20 = vor.u32 1.1754944e-38, %v5494_v57  ;;  %vm5493_vm9 = vcmp.eq.f32.partialorder %v5492_v59, 8.507059e+37 }
 0x686   : > { %v5471_v34 = vmul.f32 %v7576_v32, %v5470_v6  ;;  %v5391_v62 = vadd.f32 %v9846_v19, %v5352_v55 }
 0x688   : > { %v7578_v5 = vpop.eup %7577  ;;  %v5472_v30 = vadd.f32 %v7576_v32, %v5471_v34  ;;  %v7161_v53 = vmul.f32 -1.442695, %v5391_v62  ;;  %v5280_v62 = vpop.f32.mrf.mxu3 }
 0x689   : > { %v7580_v16 = vpop.eup %7579  ;;  %v5454_v15 = vadd.f32 1.0, %v7578_v5 }
 0x68a   : > { %v5476_v31 = vsel %vm5475_vm4, %v7576_v32, %v5472_v30  ;;  %v5484_v29 = vmul.f32 %v7580_v16, %v5453_v11  ;;  %7581 = vpow2.f32 %v7161_v53  ;;  %vm5489_vm6 = vweird.f32 %v7580_v16 }
 0x68b   : > { %v5481_v50 = vsel %vm5478_vm5, %v5480_v35, %v5476_v31  ;;  %7583 = vrcp.f32 %v5454_v15  ;;  %v5354_v27 = vpop.f32.mrf.mxu0  ;;  %vm5490_vm8 = vmor %vm5488_vm7, %vm5489_vm6  ;;  %v5509_v36 = vand.u32 2147483648, %v5454_v15  ;;  %v5507_v21 = vand.u32 2147483647, %v5454_v15 }
 0x68c   : > { %5708 = vst [vmem:[%s9790_s3] sm:$0xff] %v5481_v50  ;;  %v5485_v63 = vsub.f32 1.0, %v5484_v29  ;;  %v5355_v37 = vadd.f32 %v5354_v27, %v5269_v58  ;;  %vm5503_vm11 = vweird.f32 %v5454_v15  ;;  %v5231_v58 = vpop.f32.mrf.mxu2 }
 0x68d   : > { %v5510_v2 = vor.u32 1.1754944e-38, %v5509_v36  ;;  %vm5508_vm13 = vcmp.eq.f32.partialorder %v5507_v21, 8.507059e+37  ;;  %v5281_v21 = vadd.f32 %v5280_v62, %v5231_v58 }
 0x68e   : > { %v5486_v44 = vmul.f32 %v7580_v16, %v5485_v63  ;;  %v5392_v7 = vadd.f32 %v9846_v19, %v5355_v37 }
 0x690   : > { %v7582_v8 = vpop.eup %7581  ;;  %v5487_v56 = vadd.f32 %v7580_v16, %v5486_v44  ;;  %v7162_v22 = vmul.f32 -1.442695, %v5392_v7  ;;  %v5279_v44 = vadd.f32 %v5278_v17, %v5229_v23 }
 0x691   : > { %v7584_v10 = vpop.eup %7583  ;;  %v5455_v24 = vadd.f32 1.0, %v7582_v8 }
 0x692   : > { %v5491_v45 = vsel %vm5490_vm8, %v7580_v16, %v5487_v56  ;;  %v5499_v33 = vmul.f32 %v7584_v10, %v5454_v15  ;;  %7585 = vpow2.f32 %v7162_v22  ;;  %vm5504_vm10 = vweird.f32 %v7584_v10 }
 0x693   : > { %v5496_v60 = vsel %vm5493_vm9, %v5495_v20, %v5491_v45  ;;  %7587 = vrcp.f32 %v5455_v24  ;;  %v5356_v9 = vpop.f32.mrf.mxu0  ;;  %vm5505_vm12 = vmor %vm5503_vm11, %vm5504_vm10  ;;  %v5524_v11 = vand.u32 2147483648, %v5455_v24  ;;  %v5522_v1 = vand.u32 2147483647, %v5455_v24 }
 0x694   : > { %5709 = vst [vmem:[%s9790_s3 + $0x10] sm:$0xff] %v5496_v60  ;;  %v5500_v39 = vsub.f32 1.0, %v5499_v33  ;;  %v5357_v52 = vadd.f32 %v5356_v9, %v5271_v25  ;;  %vm5518_vm15 = vweird.f32 %v5455_v24  ;;  %v5234_v45 = vpop.f32.mrf.mxu2 }
 0x695   : > { %v5525_v34 = vor.u32 1.1754944e-38, %v5524_v11  ;;  %vm5523_vm1 = vcmp.eq.f32.partialorder %v5522_v1, 8.507059e+37 }
 0x696   : > { %v5501_v41 = vmul.f32 %v7584_v10, %v5500_v39  ;;  %v5393_v13 = vadd.f32 %v9846_v19, %v5357_v52 }
 0x698   : > { %v7586_v0 = vpop.eup %7585  ;;  %v5502_v14 = vadd.f32 %v7584_v10, %v5501_v41  ;;  %v7163_v12 = vmul.f32 -1.442695, %v5393_v13 }
 0x699   : > { %v7588_v18 = vpop.eup %7587  ;;  %v5456_v28 = vadd.f32 1.0, %v7586_v0 }
 0x69a   : > { %v5506_v38 = vsel %vm5505_vm12, %v7584_v10, %v5502_v14  ;;  %v5514_v43 = vmul.f32 %v7588_v18, %v5455_v24  ;;  %7589 = vpow2.f32 %v7163_v12  ;;  %vm5519_vm14 = vweird.f32 %v7588_v18  ;;  %v5283_v10 = vpop.f32.mrf.mxu3 }
 0x69b   : > { %v5511_v47 = vsel %vm5508_vm13, %v5510_v2, %v5506_v38  ;;  %7591 = vrcp.f32 %v5456_v28  ;;  %v5359_v49 = vpop.f32.mrf.mxu0  ;;  %vm5520_vm0 = vmor %vm5518_vm15, %vm5519_vm14  ;;  %v5539_v31 = vand.u32 2147483648, %v5456_v28  ;;  %v5537_v50 = vand.u32 2147483647, %v5456_v28 }
 0x69c   : > { %5710 = vst [vmem:[%s9790_s3 + $0x20] sm:$0xff] %v5511_v47  ;;  %v5515_v61 = vsub.f32 1.0, %v5514_v43  ;;  %v5360_v32 = vadd.f32 %v5359_v49, %v5274_v26  ;;  %vm5533_vm3 = vweird.f32 %v5456_v28  ;;  %v5284_v1 = vadd.f32 %v5283_v10, %v5234_v45 }
 0x69d   : > { %v5540_v59 = vor.u32 1.1754944e-38, %v5539_v31  ;;  %vm5538_vm5 = vcmp.eq.f32.partialorder %v5537_v50, 8.507059e+37 }
 0x69e   : > { %v5516_v54 = vmul.f32 %v7588_v18, %v5515_v61  ;;  %v5394_v42 = vadd.f32 %v9846_v19, %v5360_v32  ;;  %v5236_v61 = vpop.f32.mrf.mxu2 }
 0x6a0   : > { %v7590_v46 = vpop.eup %7589  ;;  %v5517_v6 = vadd.f32 %v7588_v18, %v5516_v54  ;;  %v7164_v55 = vmul.f32 -1.442695, %v5394_v42 }
 0x6a1   : > { %v7592_v51 = vpop.eup %7591  ;;  %v5457_v3 = vadd.f32 1.0, %v7590_v46 }
 0x6a2   : > { %v5521_v5 = vsel %vm5520_vm0, %v7588_v18, %v5517_v6  ;;  %v5529_v30 = vmul.f32 %v7592_v51, %v5456_v28  ;;  %7593 = vpow2.f32 %v7164_v55  ;;  %vm5534_vm2 = vweird.f32 %v7592_v51  ;;  %v5285_v23 = vpop.f32.mrf.mxu3 }
 0x6a3   : > { %v5526_v53 = vsel %vm5523_vm1, %v5525_v34, %v5521_v5  ;;  %7595 = vrcp.f32 %v5457_v3  ;;  %v5361_v16 = vpop.f32.mrf.mxu0  ;;  %vm5535_vm4 = vmor %vm5533_vm3, %vm5534_vm2  ;;  %v5554_v24 = vand.u32 2147483648, %v5457_v3  ;;  %v5552_v60 = vand.u32 2147483647, %v5457_v3 }
 0x6a4   : > { %5711 = vst [vmem:[%s9790_s3 + $0x30] sm:$0xff] %v5526_v53  ;;  %v5530_v35 = vsub.f32 1.0, %v5529_v30  ;;  %v5362_v15 = vadd.f32 %v5361_v16, %v5276_v40  ;;  %vm5548_vm7 = vweird.f32 %v5457_v3 }
 0x6a5   : > { %v5555_v13 = vor.u32 1.1754944e-38, %v5554_v24  ;;  %vm5553_vm9 = vcmp.eq.f32.partialorder %v5552_v60, 8.507059e+37 }
 0x6a6   : > { %v5531_v29 = vmul.f32 %v7592_v51, %v5530_v35  ;;  %v5395_v27 = vadd.f32 %v9846_v19, %v5362_v15 }
 0x6a8   : > { %v7594_v63 = vpop.eup %7593  ;;  %v5532_v37 = vadd.f32 %v7592_v51, %v5531_v29  ;;  %v7165_v57 = vmul.f32 -1.442695, %v5395_v27  ;;  %v5286_v29 = vadd.f32 %v5285_v23, %v5236_v61 }
 0x6a9   : > { %v7596_v4 = vpop.eup %7595  ;;  %v5458_v7 = vadd.f32 1.0, %v7594_v63  ;;  %v5239_v63 = vpop.f32.mrf.mxu2 }
 0x6aa   : > { %v5536_v8 = vsel %vm5535_vm4, %v7592_v51, %v5532_v37  ;;  %v5544_v48 = vmul.f32 %v7596_v4, %v5457_v3  ;;  %7597 = vpow2.f32 %v7165_v57  ;;  %vm5549_vm6 = vweird.f32 %v7596_v4  ;;  %v5288_v58 = vpop.f32.mrf.mxu3 }
 0x6ab   : > { %v5541_v56 = vsel %vm5538_vm5, %v5540_v59, %v5536_v8  ;;  %7599 = vrcp.f32 %v5458_v7  ;;  %v5364_v22 = vpop.f32.mrf.mxu0  ;;  %vm5550_vm8 = vmor %vm5548_vm7, %vm5549_vm6  ;;  %v5569_v28 = vand.u32 2147483648, %v5458_v7  ;;  %v5567_v43 = vand.u32 2147483647, %v5458_v7 }
 0x6ac   : > { %5712 = vst [vmem:[%s9790_s3 + $0x40] sm:$0xff] %v5541_v56  ;;  %v5545_v25 = vsub.f32 1.0, %v5544_v48  ;;  %v5365_v20 = vadd.f32 %v5364_v22, %v5279_v44  ;;  %vm5563_vm11 = vweird.f32 %v5458_v7  ;;  %v5289_v45 = vadd.f32 %v5288_v58, %v5239_v63 }
 0x6ad   : > { %v5570_v42 = vor.u32 1.1754944e-38, %v5569_v28  ;;  %vm5568_vm13 = vcmp.eq.f32.partialorder %v5567_v43, 8.507059e+37 }
 0x6ae   : > { %v5546_v33 = vmul.f32 %v7596_v4, %v5545_v25  ;;  %v5396_v9 = vadd.f32 %v9846_v19, %v5365_v20 }
 0x6b0   : > { %v7598_v39 = vpop.eup %7597  ;;  %v5547_v52 = vadd.f32 %v7596_v4, %v5546_v33  ;;  %v7166_v36 = vmul.f32 -1.442695, %v5396_v9 }
 0x6b1   : > { %v7600_v41 = vpop.eup %7599  ;;  %v5459_v0 = vadd.f32 1.0, %v7598_v39 }
 0x6b2   : > { %v5551_v17 = vsel %vm5550_vm8, %v7596_v4, %v5547_v52  ;;  %v5559_v14 = vmul.f32 %v7600_v41, %v5458_v7  ;;  %7601 = vpow2.f32 %v7166_v36  ;;  %vm5564_vm10 = vweird.f32 %v7600_v41  ;;  %v5290_v9 = vpop.f32.mrf.mxu3 }
 0x6b3   : > { %v5556_v12 = vsel %vm5553_vm9, %v5555_v13, %v5551_v17  ;;  %7603 = vrcp.f32 %v5459_v0  ;;  %v5366_v18 = vpop.f32.mrf.mxu0  ;;  %vm5565_vm12 = vmor %vm5563_vm11, %vm5564_vm10  ;;  %v5584_v62 = vand.u32 2147483648, %v5459_v0  ;;  %v5582_v30 = vand.u32 2147483647, %v5459_v0 }
 0x6b4   : > { %5713 = vst [vmem:[%s9790_s3 + $0x50] sm:$0xff] %v5556_v12  ;;  %v5560_v26 = vsub.f32 1.0, %v5559_v14  ;;  %v5367_v2 = vadd.f32 %v5366_v18, %v5281_v21  ;;  %vm5578_vm15 = vweird.f32 %v5459_v0  ;;  %v5241_v21 = vpop.f32.mrf.mxu2 }
 0x6b5   : > { %v5585_v50 = vor.u32 1.1754944e-38, %v5584_v62  ;;  %vm5583_vm1 = vcmp.eq.f32.partialorder %v5582_v30, 8.507059e+37 }
 0x6b6   : > { %v5561_v38 = vmul.f32 %v7600_v41, %v5560_v26  ;;  %v5397_v47 = vadd.f32 %v9846_v19, %v5367_v2 }
 0x6b8   : > { %v7602_v49 = vpop.eup %7601  ;;  %v5562_v32 = vadd.f32 %v7600_v41, %v5561_v38  ;;  %v7167_v11 = vmul.f32 -1.442695, %v5397_v47  ;;  %v5291_v38 = vadd.f32 %v5290_v9, %v5241_v21 }
 0x6b9   : > { %v7604_v54 = vpop.eup %7603  ;;  %v5460_v46 = vadd.f32 1.0, %v7602_v49 }
 0x6ba   : > { %v5566_v6 = vsel %vm5565_vm12, %v7600_v41, %v5562_v32  ;;  %v5574_v55 = vmul.f32 %v7604_v54, %v5459_v0  ;;  %7605 = vpow2.f32 %v7167_v11  ;;  %vm5579_vm14 = vweird.f32 %v7604_v54 }
 0x6bb   : > { %v5571_v51 = vsel %vm5568_vm13, %v5570_v42, %v5566_v6  ;;  %7607 = vrcp.f32 %v5460_v46  ;;  %v5369_v40 = vpop.f32.mrf.mxu0  ;;  %vm5580_vm0 = vmor %vm5578_vm15, %vm5579_vm14  ;;  %v5599_v8 = vand.u32 2147483648, %v5460_v46  ;;  %v5597_v56 = vand.u32 2147483647, %v5460_v46 }
 0x6bc   : > { %5714 = vst [vmem:[%s9790_s3 + $0x60] sm:$0xff] %v5571_v51  ;;  %v5575_v34 = vsub.f32 1.0, %v5574_v55  ;;  %v5370_v3 = vadd.f32 %v5369_v40, %v5284_v1  ;;  %vm5593_vm3 = vweird.f32 %v5460_v46  ;;  %v5244_v6 = vpop.f32.mrf.mxu2 }
 0x6bd   : > { %v5600_v33 = vor.u32 1.1754944e-38, %v5599_v8  ;;  %vm5598_vm5 = vcmp.eq.f32.partialorder %v5597_v56, 8.507059e+37 }
 0x6be   : > { %v5576_v5 = vmul.f32 %v7604_v54, %v5575_v34  ;;  %v5398_v53 = vadd.f32 %v9846_v19, %v5370_v3 }
 0x6c0   : > { %v7606_v16 = vpop.eup %7605  ;;  %v5577_v35 = vadd.f32 %v7604_v54, %v5576_v5  ;;  %v7168_v15 = vmul.f32 -1.442695, %v5398_v53 }
 0x6c1   : > { %v7608_v31 = vpop.eup %7607  ;;  %v5461_v27 = vadd.f32 1.0, %v7606_v16 }
 0x6c2   : > { %v5581_v37 = vsel %vm5580_vm0, %v7604_v54, %v5577_v35  ;;  %v5589_v57 = vmul.f32 %v7608_v31, %v5460_v46  ;;  %7609 = vpow2.f32 %v7168_v15  ;;  %vm5594_vm2 = vweird.f32 %v7608_v31  ;;  %v5293_v54 = vpop.f32.mrf.mxu3 }
 0x6c3   : > { %v5586_v4 = vsel %vm5583_vm1, %v5585_v50, %v5581_v37  ;;  %7611 = vrcp.f32 %v5461_v27  ;;  %v5371_v44 = vpop.f32.mrf.mxu0  ;;  %vm5595_vm4 = vmor %vm5593_vm3, %vm5594_vm2  ;;  %v5614_v17 = vand.u32 2147483648, %v5461_v27  ;;  %v5612_v12 = vand.u32 2147483647, %v5461_v27 }
 0x6c4   : > { %5715 = vst [vmem:[%s9790_s3 + $0x70] sm:$0xff] %v5586_v4  ;;  %v5590_v59 = vsub.f32 1.0, %v5589_v57  ;;  %v5372_v7 = vadd.f32 %v5371_v44, %v5286_v29  ;;  %vm5608_vm7 = vweird.f32 %v5461_v27  ;;  %v5294_v30 = vadd.f32 %v5293_v54, %v5244_v6 }
 0x6c5   : > { %v5615_v43 = vor.u32 1.1754944e-38, %v5614_v17  ;;  %vm5613_vm9 = vcmp.eq.f32.partialorder %v5612_v12, 8.507059e+37 }
 0x6c6   : > { %v5591_v48 = vmul.f32 %v7608_v31, %v5590_v59  ;;  %v5399_v22 = vadd.f32 %v9846_v19, %v5372_v7  ;;  %v5246_v59 = vpop.f32.mrf.mxu2 }
 0x6c8   : > { %v7610_v10 = vpop.eup %7609  ;;  %v5592_v25 = vadd.f32 %v7608_v31, %v5591_v48  ;;  %v7169_v20 = vmul.f32 -1.442695, %v5399_v22 }
 0x6c9   : > { %v7612_v24 = vpop.eup %7611  ;;  %v5462_v60 = vadd.f32 1.0, %v7610_v10 }
 0x6ca   : > { %v5596_v39 = vsel %vm5595_vm4, %v7608_v31, %v5592_v25  ;;  %v5604_v52 = vmul.f32 %v7612_v24, %v5461_v27  ;;  %7613 = vpow2.f32 %v7169_v20  ;;  %vm5609_vm6 = vweird.f32 %v7612_v24  ;;  %v5295_v63 = vpop.f32.mrf.mxu3 }
 0x6cb   : > { %v5601_v36 = vsel %vm5598_vm5, %v5600_v33, %v5596_v39  ;;  %7615 = vrcp.f32 %v5462_v60  ;;  %v5374_v41 = vpop.f32.mrf.mxu0  ;;  %vm5610_vm8 = vmor %vm5608_vm7, %vm5609_vm6  ;;  %v5629_v46 = vand.u32 2147483648, %v5462_v60  ;;  %v5627_v51 = vand.u32 2147483647, %v5462_v60 }
 0x6cc   : > { %5716 = vst [vmem:[%s9790_s3 + $0x80] sm:$0xff] %v5601_v36  ;;  %v5605_v13 = vsub.f32 1.0, %v5604_v52  ;;  %v5375_v0 = vadd.f32 %v5374_v41, %v5289_v45  ;;  %vm5623_vm11 = vweird.f32 %v5462_v60  ;;  %v5296_v56 = vadd.f32 %v5295_v63, %v5246_v59 }
 0x6cd   : > { %v5630_v53 = vor.u32 1.1754944e-38, %v5629_v46  ;;  %vm5628_vm13 = vcmp.eq.f32.partialorder %v5627_v51, 8.507059e+37 }
 0x6ce   : > { %v5606_v14 = vmul.f32 %v7612_v24, %v5605_v13  ;;  %v5400_v18 = vadd.f32 %v9846_v19, %v5375_v0 }
 0x6d0   : > { %v7614_v26 = vpop.eup %7613  ;;  %v5607_v2 = vadd.f32 %v7612_v24, %v5606_v14  ;;  %v7170_v28 = vmul.f32 -1.442695, %v5400_v18 }
 0x6d1   : > { %v7616_v23 = vpop.eup %7615  ;;  %v5463_v47 = vadd.f32 1.0, %v7614_v26 }
 0x6d2   : > { %v5611_v49 = vsel %vm5610_vm8, %v7612_v24, %v5607_v2  ;;  %v5619_v61 = vmul.f32 %v7616_v23, %v5462_v60  ;;  %7617 = vpow2.f32 %v7170_v28  ;;  %vm5624_vm10 = vweird.f32 %v7616_v23 }
 0x6d3   : > { %v5616_v32 = vsel %vm5613_vm9, %v5615_v43, %v5611_v49  ;;  %7619 = vrcp.f32 %v5463_v47  ;;  %v5376_v11 = vpop.f32.mrf.mxu0  ;;  %vm5625_vm12 = vmor %vm5623_vm11, %vm5624_vm10  ;;  %v5644_v27 = vand.u32 2147483648, %v5463_v47  ;;  %v5642_v57 = vand.u32 2147483647, %v5463_v47 }
 0x6d4   : > { %5717 = vst [vmem:[%s9790_s3 + $0x90] sm:$0xff] %v5616_v32  ;;  %v5620_v1 = vsub.f32 1.0, %v5619_v61  ;;  %v5377_v42 = vadd.f32 %v5376_v11, %v5291_v38  ;;  %vm5638_vm15 = vweird.f32 %v5463_v47 }
 0x6d5   : > { %v5645_v22 = vor.u32 1.1754944e-38, %v5644_v27  ;;  %vm5643_vm1 = vcmp.eq.f32.partialorder %v5642_v57, 8.507059e+37 }
 0x6d6   : > { %v5621_v55 = vmul.f32 %v7616_v23, %v5620_v1  ;;  %v5401_v40 = vadd.f32 %v9846_v19, %v5377_v42 }
 0x6d8   : > { %v7618_v34 = vpop.eup %7617  ;;  %v5622_v3 = vadd.f32 %v7616_v23, %v5621_v55  ;;  %v7171_v62 = vmul.f32 -1.442695, %v5401_v40 }
 0x6d9   : > { %v7620_v5 = vpop.eup %7619  ;;  %v5464_v16 = vadd.f32 1.0, %v7618_v34 }
 0x6da   : > { %v5626_v58 = vsel %vm5625_vm12, %v7616_v23, %v5622_v3  ;;  %v5634_v35 = vmul.f32 %v7620_v5, %v5463_v47  ;;  %7621 = vpow2.f32 %v7171_v62  ;;  %vm5639_vm14 = vweird.f32 %v7620_v5 }
 0x6db   : > { %v5631_v15 = vsel %vm5628_vm13, %v5630_v53, %v5626_v58  ;;  %7623 = vrcp.f32 %v5464_v16  ;;  %v5379_v31 = vpop.f32.mrf.mxu0  ;;  %vm5640_vm0 = vmor %vm5638_vm15, %vm5639_vm14  ;;  %v5659_v9 = vand.u32 2147483648, %v5464_v16  ;;  %v5657_v52 = vand.u32 2147483647, %v5464_v16 }
 0x6dc   : > { %5718 = vst [vmem:[%s9790_s3 + $0xa0] sm:$0xff] %v5631_v15  ;;  %v5635_v29 = vsub.f32 1.0, %v5634_v35  ;;  %v5380_v50 = vadd.f32 %v5379_v31, %v5294_v30  ;;  %vm5653_vm3 = vweird.f32 %v5464_v16 }
 0x6dd   : > { %v5660_v17 = vor.u32 1.1754944e-38, %v5659_v9  ;;  %vm5658_vm5 = vcmp.eq.f32.partialorder %v5657_v52, 8.507059e+37 }
 0x6de   : > { %v5636_v37 = vmul.f32 %v7620_v5, %v5635_v29  ;;  %v5402_v4 = vadd.f32 %v9846_v19, %v5380_v50 }
 0x6e0   : > { %v7622_v44 = vpop.eup %7621  ;;  %v5637_v7 = vadd.f32 %v7620_v5, %v5636_v37  ;;  %v7172_v8 = vmul.f32 -1.442695, %v5402_v4 }
 0x6e1   : > { %v7624_v48 = vpop.eup %7623  ;;  %v5465_v10 = vadd.f32 1.0, %v7622_v44 }
 0x6e2   : > { %v5641_v25 = vsel %vm5640_vm0, %v7620_v5, %v5637_v7  ;;  %v5649_v20 = vmul.f32 %v7624_v48, %v5464_v16  ;;  %7625 = vpow2.f32 %v7172_v8  ;;  %vm5654_vm2 = vweird.f32 %v7624_v48 }
 0x6e3   : > { %v5646_v24 = vsel %vm5643_vm1, %v5645_v22, %v5641_v25  ;;  %7627 = vrcp.f32 %v5465_v10  ;;  %v5381_v45 = vpop.f32.mrf.mxu0  ;;  %vm5655_vm4 = vmor %vm5653_vm3, %vm5654_vm2  ;;  %v5674_v28 = vand.u32 2147483648, %v5465_v10  ;;  %vm5668_vm7 = vweird.f32 %v5465_v10 }
 0x6e4   : > { %5719 = vst [vmem:[%s9790_s3 + $0xb0] sm:$0xff] %v5646_v24  ;;  %v5650_v33 = vsub.f32 1.0, %v5649_v20  ;;  %v5382_v60 = vadd.f32 %v5381_v45, %v5296_v56 }
 0x6e5   : > { %v5675_v49 = vor.u32 1.1754944e-38, %v5674_v28 }
 0x6e6   : > { %v5651_v39 = vmul.f32 %v7624_v48, %v5650_v33  ;;  %v5403_v36 = vadd.f32 %v9846_v19, %v5382_v60  ;;  %v5672_v19 = vand.u32 2147483647, %v5465_v10 }
 0x6e8   : > { %v7626_v41 = vpop.eup %7625  ;;  %v5652_v21 = vadd.f32 %v7624_v48, %v5651_v39  ;;  %v7173_v13 = vmul.f32 -1.442695, %v5403_v36  ;;  %vm5673_vm9 = vcmp.eq.f32.partialorder %v5672_v19, 8.507059e+37 }
 0x6e9   : > { %v7628_v0 = vpop.eup %7627  ;;  %v5466_v14 = vadd.f32 1.0, %v7626_v41 }
 0x6ea   : > { %v5656_v12 = vsel %vm5655_vm4, %v7624_v48, %v5652_v21  ;;  %v5664_v18 = vmul.f32 %v7628_v0, %v5465_v10  ;;  %7629 = vpow2.f32 %v7173_v13  ;;  %vm5669_vm6 = vweird.f32 %v7628_v0 }
 0x6eb   : > { %v5661_v26 = vsel %vm5658_vm5, %v5660_v17, %v5656_v12  ;;  %7631 = vrcp.f32 %v5466_v14  ;;  %vm5670_vm8 = vmor %vm5668_vm7, %vm5669_vm6  ;;  %v5689_v42 = vand.u32 2147483648, %v5466_v14  ;;  %v5687_v6 = vand.u32 2147483647, %v5466_v14 }
 0x6ec   : > { %5720 = vst [vmem:[%s9790_s3 + $0xc0] sm:$0xff] %v5661_v26  ;;  %v5665_v2 = vsub.f32 1.0, %v5664_v18  ;;  %vm5683_vm11 = vweird.f32 %v5466_v14 }
 0x6ed   : > { %v5690_v40 = vor.u32 1.1754944e-38, %v5689_v42  ;;  %vm5688_vm13 = vcmp.eq.f32.partialorder %v5687_v6, 8.507059e+37 }
 0x6ee   : > { %v5666_v23 = vmul.f32 %v7628_v0, %v5665_v2 }
 0x6f0   : > { %v7630_v38 = vpop.eup %7629  ;;  %v5667_v43 = vadd.f32 %v7628_v0, %v5666_v23 }
 0x6f1   : > { %v7632_v47 = vpop.eup %7631  ;;  %v5467_v61 = vadd.f32 1.0, %v7630_v38 }
 0x6f2   : > { %v5671_v32 = vsel %vm5670_vm8, %v7628_v0, %v5667_v43  ;;  %v5679_v11 = vmul.f32 %v7632_v47, %v5466_v14  ;;  %vm5684_vm10 = vweird.f32 %v7632_v47 }
 0x6f3   : > { %v5676_v54 = vsel %vm5673_vm9, %v5675_v49, %v5671_v32  ;;  %7633 = vrcp.f32 %v5467_v61  ;;  %vm5685_vm12 = vmor %vm5683_vm11, %vm5684_vm10  ;;  %v5704_v30 = vand.u32 2147483648, %v5467_v61  ;;  %v5702_v16 = vand.u32 2147483647, %v5467_v61 }
 0x6f4   : > { %5721 = vst [vmem:[%s9790_s3 + $0xd0] sm:$0xff] %v5676_v54  ;;  %v5680_v1 = vsub.f32 1.0, %v5679_v11  ;;  %vm5698_vm15 = vweird.f32 %v5467_v61 }
 0x6f5   : > { %v5705_v35 = vor.u32 1.1754944e-38, %v5704_v30  ;;  %vm5703_vm1 = vcmp.eq.f32.partialorder %v5702_v16, 8.507059e+37 }
 0x6f6   : > { %v5681_v46 = vmul.f32 %v7632_v47, %v5680_v1 }
 0x6f8   : > { %v5682_v55 = vadd.f32 %v7632_v47, %v5681_v46 }
 0x6f9   : > { %v7634_v51 = vpop.eup %7633 }
 0x6fa   : > { %v5686_v34 = vsel %vm5685_vm12, %v7632_v47, %v5682_v55  ;;  %v5694_v3 = vmul.f32 %v7634_v51, %v5467_v61  ;;  %vm5699_vm14 = vweird.f32 %v7634_v51 }
 0x6fb   : > { %v5691_v62 = vsel %vm5688_vm13, %v5690_v40, %v5686_v34  ;;  %vm5700_vm0 = vmor %vm5698_vm15, %vm5699_vm14 }
 0x6fc   : > { %5722 = vst [vmem:[%s9790_s3 + $0xe0] sm:$0xff] %v5691_v62  ;;  %v5695_v5 = vsub.f32 1.0, %v5694_v3 }
 0x6fe   : > { %v5696_v53 = vmul.f32 %v7634_v51, %v5695_v5 }
 0x700   : > { %v5697_v58 = vadd.f32 %v7634_v51, %v5696_v53 }
 0x702   : > { %v5701_v15 = vsel %vm5700_vm0, %v7634_v51, %v5697_v58 }
 0x703   : > { %v5706_v31 = vsel %vm5703_vm1, %v5705_v35, %v5701_v15 }
 0x704   : > { %5723 = vst [vmem:[%s9790_s3 + $0xf0] sm:$0xff] %v5706_v31 }
 0x705 PF: > { %s37_s4 = sadd.s32 1, %s7837_s4  }
 0x706   : > { %p34_p7 = scmp.ge.s32.totalorder %s37_s4, 4  }
 0x708   :  { %36 = sbr.rel (!%p34_p7) target bundleno = 19 (0x13), region = 170 }
 0x70d   :  { %5764 = vsyncpa [#allocation3], 1 }
 0x70e   :  { %5766 = vsyncpa [#allocation3 + $0x1], 1 }
 0x70f   :  { %5767 = vsyncpa [#allocation5], 1 }
 0x710   :  { %5768 = vsyncpa [#allocation8], 1 }
 0x711   :  { %5769 = vsyncpa [#allocation11], 1 }

</bundles_post_ra>
